<compile_context>
chip_gen: v6e
topology: v6e:2x2x1
jax: 0.10.0
libtpu: 0.0.40
codegen_flags: <defaults>
</compile_context>

<pallas_src>
import jax
import jax.numpy as jnp
from jax import lax
from jax.experimental import pallas as pl
from jax.experimental.pallas import tpu as pltpu

DIN = 2048
DOUT = 2048
BN_EPS = 1e-5


def mlp_bn_relu_kernel(x_ref, w_ref, gamma_ref, beta_ref, o_ref):
    # x_ref: (N, DIN) f32, resident across the grid.
    # w_ref: (tn, DIN) bf16 slab, streamed (PyTorch Linear layout, no transpose).
    xb = x_ref[...].astype(w_ref.dtype)          # tiny (N, DIN) cast, hidden under DMA
    y = lax.dot_general(
        xb, w_ref[...],
        dimension_numbers=(((1,), (1,)), ((), ())),   # contract DIN of both -> (N, tn)
        preferred_element_type=jnp.float32,
    )

    # BatchNorm1d (training mode): biased batch stats over axis 0, two-pass
    # (center first) to avoid catastrophic cancellation of E[y^2]-mean^2.
    n = y.shape[0]                                # static: full batch is resident
    inv_n = jnp.float32(1.0 / n)
    mean = jnp.sum(y, axis=0, keepdims=True) * inv_n          # (1, tn)
    y_c = y - mean
    var = jnp.sum(y_c * y_c, axis=0, keepdims=True) * inv_n   # (1, tn), biased
    inv = lax.rsqrt(var + jnp.float32(BN_EPS))                # EUP

    out = y_c * (inv * gamma_ref[...]) + beta_ref[...]
    o_ref[...] = jnp.maximum(out, 0.0).astype(o_ref.dtype)


def mlp_bn_relu(x, weight, gamma, beta, *, tn=1024):
    """x: (N, DIN) f32; weight: (DOUT, DIN) — pass it pre-cast to bf16 (cast once,
    outside the hot path) for halved HBM traffic; gamma, beta: (DOUT,) f32.
    Returns relu(batchnorm1d_train(x @ weight.T))."""
    n, din = x.shape
    dout = weight.shape[0]
    assert din == weight.shape[1]
    assert dout % tn == 0
    # BN batch stats are only correct because the whole batch lives in one tile.
    # Re-derive tiling (two-pass stats) before scaling N beyond VMEM residency.
    assert n * din * x.dtype.itemsize <= 8 << 20, "batch must stay VMEM-resident"

    gamma2 = gamma.reshape(1, dout)
    beta2 = beta.reshape(1, dout)

    grid = (dout // tn,)
    bytes_accessed = (x.size * x.dtype.itemsize
                      + weight.size * weight.dtype.itemsize
                      + n * dout * x.dtype.itemsize
                      + 2 * dout * 4)
    return pl.pallas_call(
        mlp_bn_relu_kernel,
        out_shape=jax.ShapeDtypeStruct((n, dout), x.dtype),
        grid_spec=pltpu.PrefetchScalarGridSpec(
            num_scalar_prefetch=0,
            grid=grid,
            in_specs=[
                pl.BlockSpec((n, din), lambda j: (0, 0)),    # x: resident
                pl.BlockSpec((tn, din), lambda j: (j, 0)),   # weight slab (no .T)
                pl.BlockSpec((1, tn), lambda j: (0, j)),     # gamma
                pl.BlockSpec((1, tn), lambda j: (0, j)),     # beta
            ],
            out_specs=pl.BlockSpec((n, tn), lambda j: (0, j)),
        ),
        compiler_params=pltpu.CompilerParams(
            dimension_semantics=("parallel",),   # dout blocks shard across v7x's 2 TCs
        ),
        cost_estimate=pl.CostEstimate(
            flops=2 * n * din * dout,
            transcendentals=dout,                # rsqrt per output feature
            bytes_accessed=bytes_accessed,
        ),
    )(x, weight, gamma2, beta2)


def reference(x, weight, gamma, beta):
    """Pure-f32 reference matching PyTorch semantics (training-mode BatchNorm1d)."""
    y = x @ weight.T
    mean = jnp.mean(y, axis=0, keepdims=True)
    var = jnp.mean((y - mean) ** 2, axis=0, keepdims=True)   # biased
    y_hat = (y - mean) / jnp.sqrt(var + BN_EPS)
    return jnp.maximum(y_hat * gamma[None, :] + beta[None, :], 0.0)


if __name__ == "__main__":
    key = jax.random.PRNGKey(0)
    kx, kw, kg, kb = jax.random.split(key, 4)

    N = 8  # small batch; din/dout fixed at 2048 by the module definition
    x = jax.random.normal(kx, (N, DIN), dtype=jnp.float32)
    weight = jax.random.normal(kw, (DOUT, DIN), dtype=jnp.float32) * 0.02
    gamma = 1.0 + 0.1 * jax.random.normal(kg, (DOUT,), dtype=jnp.float32)
    beta = 0.1 * jax.random.normal(kb, (DOUT,), dtype=jnp.float32)

    # One-time weight cast (model weight would be stored in bf16); NOT per call.
    weight_bf16 = weight.astype(jnp.bfloat16)

    out = mlp_bn_relu(x, weight_bf16, gamma, beta)
    out = jax.block_until_ready(out)
    assert out.shape == (N, DOUT)

    # Tight check: kernel math vs a reference using the SAME bf16-quantized operands
    # (validates the fused BN/ReLU + f32-accumulated MXU path precisely).
    xq = x.astype(jnp.bfloat16).astype(jnp.float32)
    wq = weight_bf16.astype(jnp.float32)
    ref_q = reference(xq, wq, gamma, beta)
    assert jnp.allclose(out, ref_q, atol=2e-3, rtol=2e-3), "mismatch vs bf16-quantized reference"

    # Loose check: vs the true f32 module semantics (documents bf16 streaming cost).
    ref_f32 = reference(x, weight, gamma, beta)
    assert jnp.allclose(out, ref_f32, atol=3e-2, rtol=3e-2), "mismatch vs f32 reference"

    print("KERNEL_OK")
</pallas_src>

<mosaic_0001>
module attributes {stable_mosaic.version = 11 : i64} {
  func.func @mlp_bn_relu_kernel(%arg0: i32, %arg1: memref<8x2048xf32, #tpu.memory_space<vmem>>, %arg2: memref<1024x2048xbf16, #tpu.memory_space<vmem>>, %arg3: memref<1x1024xf32, #tpu.memory_space<vmem>>, %arg4: memref<1x1024xf32, #tpu.memory_space<vmem>>, %arg5: memref<8x1024xf32, #tpu.memory_space<vmem>>) attributes {dimension_semantics = [#tpu.dimension_semantics<parallel>], iteration_bounds = array<i64: 2>, scalar_prefetch = 0 : i64, scratch_operands = 0 : i64, tpu.core_type = #tpu.core_type<tc>, window_params = [{pipeline_mode = #tpu.pipeline_mode<synchronous>, transform_indices = @transform_0, window_bounds = array<i64: 8, 2048>}, {transform_indices = @transform_1, window_bounds = array<i64: 1024, 2048>}, {transform_indices = @transform_2, window_bounds = array<i64: 1, 1024>}, {transform_indices = @transform_3, window_bounds = array<i64: 1, 1024>}, {transform_indices = @transform_4, window_bounds = array<i64: 8, 1024>}]} {
    %c0 = arith.constant 0 : index
    %c0_0 = arith.constant 0 : index
    %0 = vector.load %arg1[%c0, %c0_0] : memref<8x2048xf32, #tpu.memory_space<vmem>>, vector<8x2048xf32>
    %1 = arith.truncf %0 : vector<8x2048xf32> to vector<8x2048xbf16>
    %c0_1 = arith.constant 0 : index
    %c0_2 = arith.constant 0 : index
    %2 = vector.load %arg2[%c0_1, %c0_2] : memref<1024x2048xbf16, #tpu.memory_space<vmem>>, vector<1024x2048xbf16>
    %cst = arith.constant dense<0.000000e+00> : vector<8x1024xf32>
    %3 = tpu.matmul %1, %2, %cst {dimension_numbers = #tpu.dot_dimension_numbers<[1], [1], [0], [0], [0, 0, 1, 0], [], []>} : vector<8x2048xbf16>, vector<1024x2048xbf16>, vector<8x1024xf32> -> vector<8x1024xf32>
    %cst_3 = arith.constant dense<0.000000e+00> : vector<1024xf32>
    %4 = vector.multi_reduction <add>, %3, %cst_3 [0] : vector<8x1024xf32> to vector<1024xf32>
    %5 = vector.shape_cast %4 : vector<1024xf32> to vector<1x1024xf32>
    %cst_4 = arith.constant 1.250000e-01 : f32
    %6 = vector.broadcast %cst_4 : f32 to vector<1x1024xf32>
    %7 = arith.mulf %5, %6 : vector<1x1024xf32>
    %8 = vector.broadcast %7 : vector<1x1024xf32> to vector<8x1024xf32>
    %9 = arith.subf %3, %8 : vector<8x1024xf32>
    %10 = arith.mulf %9, %9 : vector<8x1024xf32>
    %cst_5 = arith.constant dense<0.000000e+00> : vector<1024xf32>
    %11 = vector.multi_reduction <add>, %10, %cst_5 [0] : vector<8x1024xf32> to vector<1024xf32>
    %12 = vector.shape_cast %11 : vector<1024xf32> to vector<1x1024xf32>
    %cst_6 = arith.constant 1.250000e-01 : f32
    %13 = vector.broadcast %cst_6 : f32 to vector<1x1024xf32>
    %14 = arith.mulf %12, %13 : vector<1x1024xf32>
    %cst_7 = arith.constant 9.99999974E-6 : f32
    %15 = vector.broadcast %cst_7 : f32 to vector<1x1024xf32>
    %16 = arith.addf %14, %15 : vector<1x1024xf32>
    %17 = math.rsqrt %16 : vector<1x1024xf32>
    %c0_8 = arith.constant 0 : index
    %c0_9 = arith.constant 0 : index
    %18 = vector.load %arg3[%c0_8, %c0_9] : memref<1x1024xf32, #tpu.memory_space<vmem>>, vector<1x1024xf32>
    %19 = arith.mulf %17, %18 : vector<1x1024xf32>
    %20 = vector.broadcast %19 : vector<1x1024xf32> to vector<8x1024xf32>
    %21 = arith.mulf %9, %20 : vector<8x1024xf32>
    %c0_10 = arith.constant 0 : index
    %c0_11 = arith.constant 0 : index
    %22 = vector.load %arg4[%c0_10, %c0_11] : memref<1x1024xf32, #tpu.memory_space<vmem>>, vector<1x1024xf32>
    %23 = vector.broadcast %22 : vector<1x1024xf32> to vector<8x1024xf32>
    %24 = arith.addf %21, %23 : vector<8x1024xf32>
    %cst_12 = arith.constant 0.000000e+00 : f32
    %25 = vector.broadcast %cst_12 : f32 to vector<8x1024xf32>
    %26 = arith.maximumf %24, %25 : vector<8x1024xf32>
    %c0_13 = arith.constant 0 : index
    %c0_14 = arith.constant 0 : index
    %27 = vector.load %arg5[%c0_13, %c0_14] : memref<8x1024xf32, #tpu.memory_space<vmem>>, vector<8x1024xf32>
    tpu.vector_store %arg5[%c0_13, %c0_14], %26 {strides = array<i32>} : memref<8x1024xf32, #tpu.memory_space<vmem>>, vector<8x1024xf32>,
    return
  }
  func.func @transform_0(%arg0: i32) -> (i32, i32) {
    %c0_i32 = arith.constant 0 : i32
    %c0_i32_0 = arith.constant 0 : i32
    %c0_i32_1 = arith.constant 0 : i32
    return %c0_i32, %c0_i32_0 : i32, i32
  }
  func.func @transform_1(%arg0: i32) -> (i32, i32) {
    %c0_i32 = arith.constant 0 : i32
    %c0_i32_0 = arith.constant 0 : i32
    return %arg0, %c0_i32 : i32, i32
  }
  func.func @transform_2(%arg0: i32) -> (i32, i32) {
    %c0_i32 = arith.constant 0 : i32
    %c0_i32_0 = arith.constant 0 : i32
    return %c0_i32, %arg0 : i32, i32
  }
  func.func @transform_3(%arg0: i32) -> (i32, i32) {
    %c0_i32 = arith.constant 0 : i32
    %c0_i32_0 = arith.constant 0 : i32
    return %c0_i32, %arg0 : i32, i32
  }
  func.func @transform_4(%arg0: i32) -> (i32, i32) {
    %c0_i32 = arith.constant 0 : i32
    %c0_i32_0 = arith.constant 0 : i32
    return %c0_i32, %arg0 : i32, i32
  }
}

</mosaic_0001>

<bundles_post_ra>
// kernel: tpu_custom_call.1
= control target key start
LH: loop header
LB: loop body
LE: loop exit
PB: predicated region body
PF: predicated region fallthrough
CT: control target
= control target key end

     0   :  { %s11114_s0 = inlined_call_operand.hbm [shape: f32[8,2048], index: 0, kind: input, shape index: {}]   ;;  %s11115_s1 = inlined_call_operand.hbm [shape: bf16[2048,2048], index: 1, kind: input, shape index: {}]   ;;  %s11116_s2 = inlined_call_operand.hbm [shape: f32[1,2048], index: 2, kind: input, shape index: {}]   ;;  %s11117_s3 = inlined_call_operand.hbm [shape: f32[1,2048], index: 3, kind: input, shape index: {}]   ;;  %s11118_s4 = inlined_call_operand.hbm [shape: f32[8,2048], index: 4, kind: output, shape index: {}]  }
   0x1   :  { %11128 = sst [smem:[#allocation17_spill]] %s11115_s1 }
   0x2   :  { %9 = vsyncpa [#allocation3], 0 }
   0x3   :  { %10 = vsyncpa [#allocation6], 0 }
   0x4   :  { %12 = vsyncpa [#allocation6 + $0x1], 0 }
   0x5   :  { %13 = vsyncpa [#allocation9], 0 }
   0x6   :  { %15 = vsyncpa [#allocation9 + $0x1], 0 }
   0x7   :  { %16 = vsyncpa [#allocation4], 0 }
   0x8   :  { %18 = vsyncpa [#allocation4 + $0x1], 0  ;;  %s9594_s15 = smov 0   ;;  %s9596_s16 = smov 0  }
   0x9   :  { %s9598_s17 = smov 0   ;;  %s9600_s18 = smov 0  }
   0xa LB: > { %11129 = sst [smem:[#allocation15_spill]] %s9556_s17  ;;  %s9615_s19 = sadd.s32 1, %s9560_s18   ;;  %s9560_s18 = sphi %s9600_s18, %s11154_s18   ;;  %s9556_s17 = sphi %s9598_s17, %s11151_s17   ;;  %s9552_s16 = sphi %s9596_s16, %s11153_s16   ;;  %s9548_s15 = sphi %s9594_s15, %s11152_s15  }
   0xb   : > { %s52_s20 = sadd.s32 1, %s9556_s17  ;;  %s49_s21 = ssub.s32 %s9560_s18, %s9615_s19 }
   0xc   : > { %p11119_p0 = scmp.ne.s32.totalorder %s9556_s17, %s9552_s16  ;;  %p50_p1 = scmp.eq.s32.totalorder %s49_s21, 0 }
   0xd   : > { %p60_p2 = scmp.eq.s32.totalorder %s9560_s18, 0  ;;  %p9320_p4 = scmp.lt.s32.totalorder %s9560_s18, 2 }
   0xe   : > { %s9626_s22 = scalar_select %p50_p1, %s9556_s17, %s52_s20  }
   0xf   : > { %p61_p5 = por %p60_p2, %p11119_p0  ;;  %s178_s23 = sand.u32 1, %s9560_s18  }
  0x10   : > { %11130 = sst [smem:[#allocation16_spill]] %s9626_s22  ;;  %s9633_s24 = sand.u32 1, %s9556_s17  }
  0x11   : > { %s8239_s25 = sshll.u32 %s9633_s24, 13  ;;  %s9285_s26 = sshll.u32 %s9560_s18, 17 }
  0x12   : > { %s11131_s1 = sld [smem:[#allocation17_spill]]  ;;  %s182_s30 = scalar_lea.vmem [#allocation5], %s8239_s25 }
  0x13   : > { %s190_s5 = sshll.u32 %s182_s30, 4  ;;  %p9642_p6 = pnand %p9320_p4, %p61_p5  ;;  %s9646_s5 = int_to_ptr.vmem [resolvable:$true] %s190_s5 }
  0x14   : > { %s9648_s7 = scalar_lea.sflag [#allocation6], %s178_s23 }
  0x15   : > { %p9654_p8 = pneg %p9642_p6 }
  0x18   : > { %s9640_s29 = scalar_lea.hbm %s11131_s1, %s9285_s26  ;;  %s9383_s12 = scalar_lea.hbm %s11131_s1, 262144 }
  0x19   : > { %s9378_s8 = scalar_lea.hbm %s9640_s29, 131072  ;;  %p9384_p11 = scmp.lt.s32.totalorder %s9640_s29, %s11131_s1 }
  0x1a   : > { %p9379_p7 = scmp.ne.s32.totalorder %s9640_s29, %s9378_s8  ;;  %p9385_p12 = scmp.lt.s32.totalorder %s9383_s12, %s9378_s8 }
  0x1c   : > { %p9381_p9 = pnand %p9654_p8, %p9379_p7  ;;  %p9386_p13 = por %p9385_p12, %p9384_p11 }
  0x1e   : > { %p9382_p10 = pneg %p9381_p9 }
  0x20   : > { %p9387_p1 = pnand %p9386_p13, %p9382_p10 }
  0x22   : > { %9390 = shalt.err (!%p9387_p1)
}
  0x23   : > { %s9391_s20 = scalar_lea.vmem %s9646_s5, 131072  ;;  %s9562_s21 = smov [#allocation5]  }
  0x24   : > { %p9392_p2 = scmp.ne.s32.totalorder %s9646_s5, %s9391_s20  ;;  %s9396_s23 = sshll.u32 %s9562_s21, 4  ;;  %s9397_s23 = int_to_ptr.vmem [resolvable:$false] %s9396_s23 }
  0x25   : > { %s9398_s25 = scalar_lea.vmem %s9397_s23, 262144  ;;  %p9399_p7 = scmp.lt.s32.totalorder %s9646_s5, %s9397_s23 }
  0x26   : > { %p9394_p4 = pnand %p9392_p2, %p9654_p8  ;;  %p9400_p9 = scmp.lt.s32.totalorder %s9398_s25, %s9391_s20 }
  0x28   : > { %p9395_p5 = pneg %p9394_p4  ;;  %p9401_p3 = por %p9400_p9, %p9399_p7 }
  0x2a   : > { %p9402_p0 = pnand %p9401_p3, %p9395_p5 }
  0x2c   : > { %9405 = shalt.err (!%p9402_p0)
}
  0x2d   : > { %s9563_s26 = smov 1024   ;;  %s9564_s27 = smov 64  }
  0x2e   : > { %9308 = dma.hbm_to_vmem [thread:$0]  (!%p9642_p6), %s9640_s29, 131072, %s9646_s5, %s9648_s7, %s9563_s26, %s9563_s26, %s9564_s27  }
  0x2f   : > { %s9678_s28 = sadd.s32 4294967295, %s9560_s18   ;;  %s8235_s30 = sadd.s32 4294967294, %s9560_s18  }
  0x30   : > { %p65_p0 = scmp.ne.s32.totalorder %s9552_s16, %s9548_s15  ;;  %p11121_p3 = scmp.eq.s32.totalorder %s9678_s28, 0 }
  0x31   : > { %p141_p10 = scmp.eq.s32.totalorder %s9678_s28, 1  ;;  %p147_p11 = scmp.eq.s32.totalorder %s8235_s30, 1 }
  0x32   : > { %p9687_p12 = por %p11121_p3, %p65_p0  ;;  %p8236_p13 = scmp.ge.s32.totalorder %s9560_s18, 1 }
  0x33   : > { %p11135_p1 = scmp.ne.s32.totalorder %s9556_s17, %s9552_s16  ;;  %p9699_p4 = por %p147_p11, %p65_p0 }
  0x34   : > { %s11134_s8 = scalar_select %p9687_p12, 1, 0 }
  0x35   : > { %p9695_p2 = por %p141_p10, %p11135_p1  ;;  %p154_p5 = scmp.lt.s32.totalorder %s9560_s18, 3 }
  0x36   : > { %s11137_s5 = scalar_select %p9699_p4, 1, 0 }
  0x37   : > { %s11136_s29 = scalar_select %p9695_p2, 1, 0 }
  0x38   : > { %s11124_s10 = sshll.u32 %s9633_s24, 3  ;;  %p9705_p7 = pnand %p8236_p13, %p154_p5 }
  0x39   : > { %s9565_s12 = smov [#allocation2]   ;;  %s11120_s14 = sshll.u32 %s9560_s18, 7 }
  0x3a   : > { %s11138_s11 = scalar_select %p9705_p7, 1, 0 }
  0x3b   : > { %s167_s13 = sshll.u32 %s9565_s12, 4  ;;  %p9301_p9 = pneg %p9705_p7  ;;  %s9709_s13 = int_to_ptr.vmem [resolvable:$true] %s167_s13 }
  0x3c   : > { %s9719_s23 = scalar_lea.hbm %s11116_s2, %s11120_s14  ;;  %s204_s25 = scalar_lea.vmem [#allocation7], %s11124_s10 }
  0x3d   : > { %s212_s26 = sshll.u32 %s204_s25, 4  ;;  %p9725_p0 = pnand %p9301_p9, %p11121_p3  ;;  %s213_s26 = int_to_ptr.vmem [resolvable:$true] %s212_s26 }
  0x3e   : > { %s9406_s30 = scalar_lea.hbm %s9719_s23, 128  ;;  %s9411_s21 = scalar_lea.hbm %s11116_s2, 256 }
  0x3f   : > { %s11139_s27 = scalar_select %p9725_p0, 1, 0 }
  0x40   : > { %p9407_p10 = scmp.ne.s32.totalorder %s9719_s23, %s9406_s30  ;;  %p9412_p1 = scmp.lt.s32.totalorder %s9719_s23, %s11116_s2 }
  0x41   : > { %p9413_p5 = scmp.lt.s32.totalorder %s9411_s21, %s9406_s30 }
  0x42   : > { %p9409_p11 = pnand %p9407_p10, %p9654_p8 }
  0x43   : > { %p9414_p4 = por %p9413_p5, %p9412_p1 }
  0x44   : > { %p9410_p13 = pneg %p9409_p11 }
  0x46   : > { %p9415_p9 = pnand %p9414_p4, %p9410_p13 }
  0x48   : > { %9418 = shalt.err (!%p9415_p9)
}
  0x49   : > { %s9419_s25 = scalar_lea.vmem %s213_s26, 128  ;;  %s9566_s10 = smov [#allocation7]  }
  0x4a   : > { %p9420_p3 = scmp.ne.s32.totalorder %s213_s26, %s9419_s25  ;;  %s9424_s22 = sshll.u32 %s9566_s10, 4  ;;  %s9425_s22 = int_to_ptr.vmem [resolvable:$false] %s9424_s22 }
  0x4b   : > { %s9426_s17 = scalar_lea.vmem %s9425_s22, 256  ;;  %p9427_p10 = scmp.lt.s32.totalorder %s213_s26, %s9425_s22 }
  0x4c   : > { %p9422_p2 = pnand %p9420_p3, %p9654_p8  ;;  %p9428_p11 = scmp.lt.s32.totalorder %s9426_s17, %s9419_s25 }
  0x4e   : > { %p9423_p12 = pneg %p9422_p2  ;;  %p9429_p7 = por %p9428_p11, %p9427_p10 }
  0x50   : > { %p9430_p0 = pnand %p9429_p7, %p9423_p12 }
  0x52   : > { %9433 = shalt.err (!%p9430_p0)
}
  0x53   : > { %9311 = dma.hbm_to_vmem [thread:$0]  (!%p9642_p6), %s9719_s23, 128, %s213_s26, %s9648_s7  }
  0x54   : > { %p11140_p3 = scmp.ne.s32.totalorder %s11139_s27, 0  ;;  %s9445_s1 = scalar_lea.vmem %s9709_s13, 2048 }
  0x55   : > { %p9446_p4 = scmp.ne.s32.totalorder %s9709_s13, %s9445_s1  ;;  %p9453_p5 = scmp.lt.s32.totalorder %s9709_s13, %s9709_s13 }
  0x56   : > { %p9436_p2 = pneg %p11140_p3  ;;  %p9454_p9 = scmp.lt.s32.totalorder %s9445_s1, %s9445_s1 }
  0x58   : > { %p9448_p13 = pnand %p9446_p4, %p9436_p2  ;;  %p9455_p12 = por %p9454_p9, %p9453_p5 }
  0x5a   : > { %p9449_p1 = pneg %p9448_p13 }
  0x5c   : > { %p9456_p7 = pnand %p9455_p12, %p9449_p1 }
  0x5e   : > { %9459 = shalt.err (!%p9456_p7)
}
  0x5f   : > { %9304 = dma.hbm_to_vmem [thread:$0]  (!%p11140_p3), %s11114_s0, 2048, %s9709_s13, [#allocation3]  }
  0x60   : > { %s11141_s7 = sshll.u32 %s9560_s18, 7  ;;  %s11142_s26 = sshll.u32 %s9633_s24, 3 }
  0x61   : > { %s9763_s23 = scalar_lea.hbm %s11117_s3, %s11141_s7  ;;  %s223_s27 = scalar_lea.vmem [#allocation8], %s11142_s26 }
  0x62   : > { %s231_s30 = sshll.u32 %s223_s27, 4  ;;  %s220_s12 = scalar_lea.sflag [#allocation9], %s9633_s24  ;;  %s232_s30 = int_to_ptr.vmem [resolvable:$true] %s231_s30 }
  0x63   : > { %s9460_s20 = scalar_lea.hbm %s9763_s23, 128  ;;  %s9465_s25 = scalar_lea.hbm %s11117_s3, 256 }
  0x64   : > { %p9461_p0 = scmp.ne.s32.totalorder %s9763_s23, %s9460_s20  ;;  %p9466_p3 = scmp.lt.s32.totalorder %s9763_s23, %s11117_s3 }
  0x65   : > { %p9467_p2 = scmp.lt.s32.totalorder %s9465_s25, %s9460_s20 }
  0x66   : > { %p9463_p10 = pnand %p9461_p0, %p9654_p8 }
  0x67   : > { %p9468_p4 = por %p9467_p2, %p9466_p3 }
  0x68   : > { %p9464_p11 = pneg %p9463_p10 }
  0x6a   : > { %p9469_p13 = pnand %p9468_p4, %p9464_p11 }
  0x6c   : > { %9472 = shalt.err (!%p9469_p13)
}
  0x6d   : > { %s9473_s22 = scalar_lea.vmem %s232_s30, 128  ;;  %s9567_s24 = smov [#allocation8]  }
  0x6e   : > { %p9474_p1 = scmp.ne.s32.totalorder %s232_s30, %s9473_s22  ;;  %s9478_s7 = sshll.u32 %s9567_s24, 4  ;;  %s9479_s7 = int_to_ptr.vmem [resolvable:$false] %s9478_s7 }
  0x6f   : > { %s9480_s10 = scalar_lea.vmem %s9479_s7, 256  ;;  %p9481_p12 = scmp.lt.s32.totalorder %s232_s30, %s9479_s7 }
  0x70   : > { %p9476_p5 = pnand %p9474_p1, %p9654_p8  ;;  %p9482_p7 = scmp.lt.s32.totalorder %s9480_s10, %s9473_s22 }
  0x72   : > { %p9477_p9 = pneg %p9476_p5  ;;  %p9483_p0 = por %p9482_p7, %p9481_p12 }
  0x74   : > { %p9484_p10 = pnand %p9483_p0, %p9477_p9 }
  0x76   : > { %9487 = shalt.err (!%p9484_p10)
}
  0x77   : > { %9314 = dma.hbm_to_vmem [thread:$0]  (!%p9642_p6), %s9763_s23, 128, %s232_s30, %s220_s12  }
  0x78   : > { %p11143_p11 = scmp.ne.s32.totalorder %s11138_s11, 0 }
  0x79   : > { %p11144_p3 = scmp.eq.s32.totalorder (!%p11143_p11), %s9678_s28, 0 }
  0x7a   : > { %240 = sbr.rel (%p11143_p11) target bundleno = 2458 (0x99a), region = 36 }
  0x7f   : > { %9531 = dma.done.wait (%p11144_p3), [#allocation3], 2048   ;;  %p11145_p8 = pmov %p11144_p3 }
  0x80   : > { %s246_s9 = sand.u32 1, %s9678_s28   ;;  %s9792_s14 = sand.u32 1, %s9552_s16  }
  0x81   : > { %9533 = vsyncadd (%p11145_p8), [#allocation3], 4294965248  ;;  %s8251_s26 = sshll.u32 %s9792_s14, 13  ;;  %s247_s6 = scalar_lea.sflag [#allocation6], %s246_s9 }
  0x82   : > { %s9795_s27 = scalar_lea.vmem [#allocation5], %s8251_s26  ;;  %p11146_p6 = scmp.ne.s32.totalorder %s11134_s8, 0 }
  0x84   : > { %9535 = dma.done.wait (%p11146_p6), %s247_s6, 131200  }
  0x85   : > { %9537 = vsyncadd (%p11146_p6), %s247_s6, 4294836096  ;;  %s8252_s11 = sshll.u32 %s9792_s14, 3  ;;  %s265_s30 = scalar_lea.sflag [#allocation9], %s9792_s14 }
  0x86   : > { %s9802_s23 = scalar_lea.vmem [#allocation7], %s8252_s11  ;;  %s9805_s12 = scalar_lea.vmem [#allocation8], %s8252_s11 }
  0x87   : > { %9539 = dma.done.wait (%p11146_p6), %s265_s30, 128  }
  0x88   : > { %9541 = vsyncadd (%p11146_p6), %s265_s30, 4294967168  ;;  %v451_v0 = vld [vmem:[%s9795_s27 + $0x380] sm:$0xff]  ;;  %v452_v2 = vld [vmem:[%s9795_s27 + $0x388] sm:$0xff]  ;;  %s8254_s8 = sshll.u32 %s9792_s14, 6  ;;  %s9288_s13 = sshll.u32 %s9678_s28, 10 }
  0x89   : > { %v459_v1 = vld [vmem:[%s9795_s27 + $0x3c0] sm:$0xff]  ;;  %v460_v4 = vld [vmem:[%s9795_s27 + $0x3c8] sm:$0xff]  ;;  %v310_v31 = vld [vmem:[#allocation2 + $0x18] sm:$0xff]  ;;  %s10298_s20 = scalar_lea.vmem [#allocation10], %s8254_s8  ;;  %s8108_s17 = scalar_lea.hbm %s11118_s4, %s9288_s13 }
  0x8a   : > { %v8368_v3 = vcombine.high %v451_v0, %v459_v1  ;;  %v8367_v5 = vcombine.low %v451_v0, %v459_v1  ;;  %v435_v6 = vld [vmem:[%s9795_s27 + $0x300] sm:$0xff]  ;;  %v8370_v8 = vcombine.high %v452_v2, %v460_v4  ;;  %v8369_v9 = vcombine.low %v452_v2, %v460_v4  ;;  %v436_v11 = vld [vmem:[%s9795_s27 + $0x308] sm:$0xff]  ;;  %s8110_s21 = sshll.u32 %s10298_s20, 4  ;;  %s8096_s22 = scalar_lea.sflag [#allocation4], %s9792_s14  ;;  %s8111_s21 = int_to_ptr.vmem [resolvable:$true] %s8110_s21 }
  0x8b   : > { %v443_v7 = vld [vmem:[%s9795_s27 + $0x340] sm:$0xff]  ;;  %v444_v12 = vld [vmem:[%s9795_s27 + $0x348] sm:$0xff]  ;;  %v9831_v35 = vpack.c.bf16 %v310_v31, %v310_v31  ;;  %s9488_s24 = scalar_lea.vmem %s8111_s21, 1024  ;;  %p11147_p4 = scmp.ne.s32.totalorder %s11136_s29, 0 }
  0x8c   : > { %v8352_v10 = vcombine.high %v435_v6, %v443_v7  ;;  %6483 = vmatprep.subr.bf16.mxu0 %v8368_v3  ;;  %v8354_v13 = vcombine.high %v436_v11, %v444_v12  ;;  %6524 = vmatprep.subr.bf16.mxu1 %v8370_v8  ;;  %v419_v14 = vld [vmem:[%s9795_s27 + $0x280] sm:$0xff]  ;;  %v420_v16 = vld [vmem:[%s9795_s27 + $0x288] sm:$0xff]  ;;  %v8351_v18 = vcombine.low %v435_v6, %v443_v7  ;;  %p9489_p2 = scmp.ne.s32.totalorder %s8111_s21, %s9488_s24  ;;  %s9568_s7 = smov [#allocation10]  }
  0x8d   : > { %6484 = vmatpush1.bf16.xpose.msra.mxu0 %v8367_v5  ;;  %6525 = vmatpush1.bf16.xpose.msra.mxu1 %v8369_v9  ;;  %v427_v15 = vld [vmem:[%s9795_s27 + $0x2c0] sm:$0xff]  ;;  %v428_v17 = vld [vmem:[%s9795_s27 + $0x2c8] sm:$0xff]  ;;  %v8353_v19 = vcombine.low %v436_v11, %v444_v12  ;;  %s9492_s10 = sshll.u32 %s9568_s7, 4  ;;  %s9493_s10 = int_to_ptr.vmem [resolvable:$false] %s9492_s10 }
  0x8e   : > { %6485 = vmatprep.subr.bf16.mxu0 %v8352_v10  ;;  %6526 = vmatprep.subr.bf16.mxu1 %v8354_v13  ;;  %v8336_v20 = vcombine.high %v419_v14, %v427_v15  ;;  %v8338_v21 = vcombine.high %v420_v16, %v428_v17  ;;  %v403_v22 = vld [vmem:[%s9795_s27 + $0x200] sm:$0xff]  ;;  %v404_v24 = vld [vmem:[%s9795_s27 + $0x208] sm:$0xff]  ;;  %v8335_v26 = vcombine.low %v419_v14, %v427_v15  ;;  %p9490_p13 = pnand %p9489_p2, %p11147_p4  ;;  %s9494_s28 = scalar_lea.vmem %s9493_s10, 2048 }
  0x8f   : > { %v411_v23 = vld [vmem:[%s9795_s27 + $0x240] sm:$0xff]  ;;  %v412_v25 = vld [vmem:[%s9795_s27 + $0x248] sm:$0xff]  ;;  %v8337_v27 = vcombine.low %v420_v16, %v428_v17  ;;  %6556 = vmatprep.mubr.bf16.mxu1 %v9831_v35  ;;  %p9495_p5 = scmp.lt.s32.totalorder %s8111_s21, %s9493_s10  ;;  %p9496_p9 = scmp.lt.s32.totalorder %s9494_s28, %s9488_s24 }
  0x90   : > { %v8320_v28 = vcombine.high %v403_v22, %v411_v23  ;;  %v8322_v29 = vcombine.high %v404_v24, %v412_v25  ;;  %v308_v30 = vld [vmem:[#allocation2 + $0x8] sm:$0xff]  ;;  %v387_v32 = vld [vmem:[%s9795_s27 + $0x180] sm:$0xff]  ;;  %v8319_v38 = vcombine.low %v403_v22, %v411_v23  ;;  %v8321_v39 = vcombine.low %v404_v24, %v412_v25  ;;  %p9491_p1 = pneg %p9490_p13 }
  0x91   : > { %v395_v33 = vld [vmem:[%s9795_s27 + $0x1c0] sm:$0xff]  ;;  %v9829_v34 = vpack.c.bf16 %v308_v30, %v308_v30  ;;  %v388_v36 = vld [vmem:[%s9795_s27 + $0x188] sm:$0xff]  ;;  %p9497_p12 = por %p9496_p9, %p9495_p5 }
  0x92   : > { %v396_v37 = vld [vmem:[%s9795_s27 + $0x1c8] sm:$0xff]  ;;  %v8304_v40 = vcombine.high %v387_v32, %v395_v33  ;;  %v371_v42 = vld [vmem:[%s9795_s27 + $0x100] sm:$0xff]  ;;  %v8303_v46 = vcombine.low %v387_v32, %v395_v33 }
  0x93   : > { %6515 = vmatprep.mubr.bf16.mxu0 %v9829_v34  ;;  %v8306_v41 = vcombine.high %v388_v36, %v396_v37  ;;  %v379_v43 = vld [vmem:[%s9795_s27 + $0x140] sm:$0xff]  ;;  %v372_v44 = vld [vmem:[%s9795_s27 + $0x108] sm:$0xff]  ;;  %v8305_v47 = vcombine.low %v388_v36, %v396_v37  ;;  %p9498_p7 = pnand %p9497_p12, %p9491_p1 }
  0x94   : > { %v380_v45 = vld [vmem:[%s9795_s27 + $0x148] sm:$0xff]  ;;  %v8288_v48 = vcombine.high %v371_v42, %v379_v43  ;;  %v355_v50 = vld [vmem:[%s9795_s27 + $0x80] sm:$0xff]  ;;  %v8287_v54 = vcombine.low %v371_v42, %v379_v43 }
  0x95   : > { %6486 = vmatpush1.bf16.xpose.msra.mxu0 %v8351_v18  ;;  %6527 = vmatpush1.bf16.xpose.msra.mxu1 %v8353_v19  ;;  %v8290_v49 = vcombine.high %v372_v44, %v380_v45  ;;  %v363_v51 = vld [vmem:[%s9795_s27 + $0xc0] sm:$0xff]  ;;  %v356_v52 = vld [vmem:[%s9795_s27 + $0x88] sm:$0xff]  ;;  %v8289_v55 = vcombine.low %v372_v44, %v380_v45 }
  0x96   : > { %6487 = vmatprep.subr.bf16.mxu0 %v8336_v20  ;;  %6528 = vmatprep.subr.bf16.mxu1 %v8338_v21  ;;  %v364_v53 = vld [vmem:[%s9795_s27 + $0xc8] sm:$0xff]  ;;  %v8272_v56 = vcombine.high %v355_v50, %v363_v51  ;;  %v339_v58 = vld [vmem:[%s9795_s27] sm:$0xff]  ;;  %v8271_v62 = vcombine.low %v355_v50, %v363_v51 }
  0x97   : > { %v8274_v57 = vcombine.high %v356_v52, %v364_v53  ;;  %v347_v59 = vld [vmem:[%s9795_s27 + $0x40] sm:$0xff]  ;;  %v340_v60 = vld [vmem:[%s9795_s27 + $0x8] sm:$0xff]  ;;  %v8273_v63 = vcombine.low %v356_v52, %v364_v53 }
  0x98   : > { %v348_v61 = vld [vmem:[%s9795_s27 + $0x48] sm:$0xff]  ;;  %v8256_v0 = vcombine.high %v339_v58, %v347_v59  ;;  %v579_v2 = vld [vmem:[%s9795_s27 + $0x780] sm:$0xff]  ;;  %v8255_v6 = vcombine.low %v339_v58, %v347_v59 }
  0x99   : > { %v8258_v1 = vcombine.high %v340_v60, %v348_v61  ;;  %v587_v3 = vld [vmem:[%s9795_s27 + $0x7c0] sm:$0xff]  ;;  %v580_v4 = vld [vmem:[%s9795_s27 + $0x788] sm:$0xff]  ;;  %v8257_v7 = vcombine.low %v340_v60, %v348_v61 }
  0x9a   : > { %v588_v5 = vld [vmem:[%s9795_s27 + $0x7c8] sm:$0xff]  ;;  %v8496_v8 = vcombine.high %v579_v2, %v587_v3  ;;  %v563_v10 = vld [vmem:[%s9795_s27 + $0x700] sm:$0xff]  ;;  %v8495_v14 = vcombine.low %v579_v2, %v587_v3 }
  0x9b   : > { %v8498_v9 = vcombine.high %v580_v4, %v588_v5  ;;  %v571_v11 = vld [vmem:[%s9795_s27 + $0x740] sm:$0xff]  ;;  %v564_v12 = vld [vmem:[%s9795_s27 + $0x708] sm:$0xff]  ;;  %v8497_v15 = vcombine.low %v580_v4, %v588_v5  ;;  %v453_v4 = vld [vmem:[%s9795_s27 + $0x390] sm:$0xff] }
  0x9c   : > { %v572_v13 = vld [vmem:[%s9795_s27 + $0x748] sm:$0xff]  ;;  %v8480_v16 = vcombine.high %v563_v10, %v571_v11  ;;  %v547_v18 = vld [vmem:[%s9795_s27 + $0x680] sm:$0xff]  ;;  %v8479_v22 = vcombine.low %v563_v10, %v571_v11  ;;  %v461_v5 = vld [vmem:[%s9795_s27 + $0x3d0] sm:$0xff] }
  0x9d   : > { %6488 = vmatpush1.bf16.xpose.msra.mxu0 %v8335_v26  ;;  %6529 = vmatpush1.bf16.xpose.msra.mxu1 %v8337_v27  ;;  %v8482_v17 = vcombine.high %v564_v12, %v572_v13  ;;  %v555_v19 = vld [vmem:[%s9795_s27 + $0x6c0] sm:$0xff]  ;;  %v548_v20 = vld [vmem:[%s9795_s27 + $0x688] sm:$0xff]  ;;  %v8481_v23 = vcombine.low %v564_v12, %v572_v13  ;;  %v8372_v10 = vcombine.high %v453_v4, %v461_v5  ;;  %v309_v13 = vld [vmem:[#allocation2 + $0x10] sm:$0xff] }
  0x9e   : > { %6489 = vmatprep.subr.bf16.mxu0 %v8320_v28  ;;  %6530 = vmatprep.subr.bf16.mxu1 %v8322_v29  ;;  %v556_v21 = vld [vmem:[%s9795_s27 + $0x6c8] sm:$0xff]  ;;  %v8464_v24 = vcombine.high %v547_v18, %v555_v19  ;;  %v531_v26 = vld [vmem:[%s9795_s27 + $0x600] sm:$0xff]  ;;  %v8463_v30 = vcombine.low %v547_v18, %v555_v19  ;;  %v446_v18 = vld [vmem:[%s9795_s27 + $0x358] sm:$0xff] }
  0x9f   : > { %v8466_v25 = vcombine.high %v548_v20, %v556_v21  ;;  %v539_v27 = vld [vmem:[%s9795_s27 + $0x640] sm:$0xff]  ;;  %v532_v28 = vld [vmem:[%s9795_s27 + $0x608] sm:$0xff]  ;;  %v8465_v31 = vcombine.low %v548_v20, %v556_v21  ;;  %v9891_v20 = vpack.c.bf16 %v309_v13, %v309_v13  ;;  %v8371_v21 = vcombine.low %v453_v4, %v461_v5 }
  0xa0   : > { %v540_v29 = vld [vmem:[%s9795_s27 + $0x648] sm:$0xff]  ;;  %v8448_v32 = vcombine.high %v531_v26, %v539_v27  ;;  %v515_v36 = vld [vmem:[%s9795_s27 + $0x580] sm:$0xff] }
  0xa1   : > { %v8450_v33 = vcombine.high %v532_v28, %v540_v29  ;;  %v523_v37 = vld [vmem:[%s9795_s27 + $0x5c0] sm:$0xff]  ;;  %v312_v19 = vld [vmem:[#allocation2 + $0x28] sm:$0xff] }
  0xa2   : > { %v8432_v42 = vcombine.high %v515_v36, %v523_v37  ;;  %v499_v44 = vld [vmem:[%s9795_s27 + $0x500] sm:$0xff] }
  0xa3   : > { %v507_v45 = vld [vmem:[%s9795_s27 + $0x540] sm:$0xff] }
  0xa4   : > { %v8416_v50 = vcombine.high %v499_v44, %v507_v45  ;;  %v483_v52 = vld [vmem:[%s9795_s27 + $0x480] sm:$0xff] }
  0xa5   : > { %6490 = vmatpush1.bf16.xpose.msra.mxu0 %v8319_v38  ;;  %6531 = vmatpush1.bf16.xpose.msra.mxu1 %v8321_v39  ;;  %v516_v38 = vld [vmem:[%s9795_s27 + $0x588] sm:$0xff]  ;;  %v491_v53 = vld [vmem:[%s9795_s27 + $0x4c0] sm:$0xff] }
  0xa6   : > { %6491 = vmatprep.subr.bf16.mxu0 %v8304_v40  ;;  %6532 = vmatprep.subr.bf16.mxu1 %v8306_v41  ;;  %v524_v39 = vld [vmem:[%s9795_s27 + $0x5c8] sm:$0xff]  ;;  %v8447_v40 = vcombine.low %v531_v26, %v539_v27  ;;  %v8449_v41 = vcombine.low %v532_v28, %v540_v29  ;;  %v8400_v58 = vcombine.high %v483_v52, %v491_v53  ;;  %v467_v60 = vld [vmem:[%s9795_s27 + $0x400] sm:$0xff]  ;;  %v421_v28 = vld [vmem:[%s9795_s27 + $0x290] sm:$0xff] }
  0xa7   : > { %v8434_v43 = vcombine.high %v516_v38, %v524_v39  ;;  %v475_v61 = vld [vmem:[%s9795_s27 + $0x440] sm:$0xff]  ;;  %v9893_v26 = vpack.c.bf16 %v312_v19, %v312_v19  ;;  %v429_v29 = vld [vmem:[%s9795_s27 + $0x2d0] sm:$0xff] }
  0xa8   : > { %v8384_v2 = vcombine.high %v467_v60, %v475_v61  ;;  %v307_v12 = vld [vmem:[#allocation2] sm:$0xff] }
  0xad   : > { %6492 = vmatpush1.bf16.xpose.msra.mxu0 %v8303_v46  ;;  %6533 = vmatpush1.bf16.xpose.msra.mxu1 %v8305_v47  ;;  %v500_v46 = vld [vmem:[%s9795_s27 + $0x508] sm:$0xff] }
  0xae   : > { %6493 = vmatprep.subr.bf16.mxu0 %v8288_v48  ;;  %6534 = vmatprep.subr.bf16.mxu1 %v8290_v49  ;;  %v508_v47 = vld [vmem:[%s9795_s27 + $0x548] sm:$0xff]  ;;  %v8431_v48 = vcombine.low %v515_v36, %v523_v37  ;;  %v8433_v49 = vcombine.low %v516_v38, %v524_v39  ;;  %v8340_v36 = vcombine.high %v421_v28, %v429_v29  ;;  %v405_v38 = vld [vmem:[%s9795_s27 + $0x210] sm:$0xff] }
  0xaf   : > { %v8418_v51 = vcombine.high %v500_v46, %v508_v47  ;;  %v413_v39 = vld [vmem:[%s9795_s27 + $0x250] sm:$0xff] }
  0xb5   : > { %6494 = vmatpush1.bf16.xpose.msra.mxu0 %v8287_v54  ;;  %6535 = vmatpush1.bf16.xpose.msra.mxu1 %v8289_v55  ;;  %v484_v54 = vld [vmem:[%s9795_s27 + $0x488] sm:$0xff] }
  0xb6   : > { %6495 = vmatprep.subr.bf16.mxu0 %v8272_v56  ;;  %6536 = vmatprep.subr.bf16.mxu1 %v8274_v57  ;;  %v492_v55 = vld [vmem:[%s9795_s27 + $0x4c8] sm:$0xff]  ;;  %v8415_v56 = vcombine.low %v499_v44, %v507_v45  ;;  %v8417_v57 = vcombine.low %v500_v46, %v508_v47  ;;  %v8324_v44 = vcombine.high %v405_v38, %v413_v39  ;;  %v389_v46 = vld [vmem:[%s9795_s27 + $0x190] sm:$0xff] }
  0xb7   : > { %v8402_v59 = vcombine.high %v484_v54, %v492_v55  ;;  %v397_v47 = vld [vmem:[%s9795_s27 + $0x1d0] sm:$0xff] }
  0xbd   : > { %6496 = vmatpush1.bf16.xpose.msra.mxu0 %v8271_v62  ;;  %6537 = vmatpush1.bf16.xpose.msra.mxu1 %v8273_v63  ;;  %v468_v62 = vld [vmem:[%s9795_s27 + $0x408] sm:$0xff] }
  0xbe   : > { %6497 = vmatprep.subr.bf16.mxu0 %v8256_v0  ;;  %6538 = vmatprep.subr.bf16.mxu1 %v8258_v1  ;;  %v476_v63 = vld [vmem:[%s9795_s27 + $0x448] sm:$0xff]  ;;  %v8399_v0 = vcombine.low %v483_v52, %v491_v53  ;;  %v8401_v1 = vcombine.low %v484_v54, %v492_v55  ;;  %v8308_v52 = vcombine.high %v389_v46, %v397_v47  ;;  %v373_v54 = vld [vmem:[%s9795_s27 + $0x110] sm:$0xff] }
  0xbf   : > { %v8386_v3 = vcombine.high %v468_v62, %v476_v63  ;;  %v381_v55 = vld [vmem:[%s9795_s27 + $0x150] sm:$0xff] }
  0xc5   : > { %6498 = vmatpush1.bf16.xpose.msra.mxu0 %v8255_v6  ;;  %6539 = vmatpush1.bf16.xpose.msra.mxu1 %v8257_v7  ;;  %v454_v6 = vld [vmem:[%s9795_s27 + $0x398] sm:$0xff] }
  0xc6   : > { %6499 = vmatprep.subr.bf16.mxu0 %v8496_v8  ;;  %6540 = vmatprep.subr.bf16.mxu1 %v8498_v9  ;;  %v462_v7 = vld [vmem:[%s9795_s27 + $0x3d8] sm:$0xff]  ;;  %v8383_v8 = vcombine.low %v467_v60, %v475_v61  ;;  %v8385_v9 = vcombine.low %v468_v62, %v476_v63  ;;  %v8292_v60 = vcombine.high %v373_v54, %v381_v55  ;;  %v357_v62 = vld [vmem:[%s9795_s27 + $0x90] sm:$0xff] }
  0xc7   : > { %v8374_v11 = vcombine.high %v454_v6, %v462_v7  ;;  %v365_v63 = vld [vmem:[%s9795_s27 + $0xd0] sm:$0xff] }
  0xc8   : > { %v8276_v4 = vcombine.high %v357_v62, %v365_v63 }
  0xcd   : > { %6500 = vmatpush2.bf16.xpose.msra.mxu0 %v8495_v14  ;;  %6541 = vmatpush2.bf16.xpose.msra.mxu1 %v8497_v15  ;;  %v437_v14 = vld [vmem:[%s9795_s27 + $0x310] sm:$0xff] }
  0xce   : > { %6501 = vmatprep.subr.bf16.mxu0 %v8480_v16  ;;  %6542 = vmatprep.subr.bf16.mxu1 %v8482_v17  ;;  %v445_v15 = vld [vmem:[%s9795_s27 + $0x350] sm:$0xff]  ;;  %v9887_v16 = vpack.c.bf16 %v307_v12, %v307_v12  ;;  %v438_v17 = vld [vmem:[%s9795_s27 + $0x318] sm:$0xff] }
  0xd5   : > { %6502 = vmatpush2.bf16.xpose.msra.mxu0 %v8479_v22  ;;  %6543 = vmatpush2.bf16.xpose.msra.mxu1 %v8481_v23  ;;  %v314_v22 = vld [vmem:[#allocation2 + $0x38] sm:$0xff]  ;;  %v8373_v23 = vcombine.low %v454_v6, %v462_v7  ;;  %v341_v6 = vld [vmem:[%s9795_s27 + $0x10] sm:$0xff] }
  0xd6   : > { %6503 = vmatprep.subr.bf16.mxu0 %v8464_v24  ;;  %6544 = vmatprep.subr.bf16.mxu1 %v8466_v25  ;;  %v8356_v24 = vcombine.high %v437_v14, %v445_v15  ;;  %v8358_v25 = vcombine.high %v438_v17, %v446_v18  ;;  %v9896_v27 = vpack.c.bf16 %v314_v22, %v314_v22  ;;  %v349_v7 = vld [vmem:[%s9795_s27 + $0x50] sm:$0xff] }
  0xd7   : > { %v8260_v12 = vcombine.high %v341_v6, %v349_v7  ;;  %v8259_v19 = vcombine.low %v341_v6, %v349_v7  ;;  %v486_v6 = vld [vmem:[%s9795_s27 + $0x498] sm:$0xff] }
  0xd8   : > { %v494_v7 = vld [vmem:[%s9795_s27 + $0x4d8] sm:$0xff] }
  0xdd   : > { %6504 = vmatpush2.bf16.xpose.msra.mxu0 %v8463_v30  ;;  %6545 = vmatpush2.bf16.xpose.msra.mxu1 %v8465_v31  ;;  %v422_v30 = vld [vmem:[%s9795_s27 + $0x298] sm:$0xff] }
  0xde   : > { %6505 = vmatprep.subr.bf16.mxu0 %v8448_v32  ;;  %6546 = vmatprep.subr.bf16.mxu1 %v8450_v33  ;;  %v430_v31 = vld [vmem:[%s9795_s27 + $0x2d8] sm:$0xff]  ;;  %v8355_v32 = vcombine.low %v437_v14, %v445_v15  ;;  %v8357_v33 = vcombine.low %v438_v17, %v446_v18  ;;  %v581_v14 = vld [vmem:[%s9795_s27 + $0x790] sm:$0xff] }
  0xdf   : > { %v8342_v37 = vcombine.high %v422_v30, %v430_v31  ;;  %v589_v15 = vld [vmem:[%s9795_s27 + $0x7d0] sm:$0xff]  ;;  %v582_v17 = vld [vmem:[%s9795_s27 + $0x798] sm:$0xff] }
  0xe0   : > { %v590_v18 = vld [vmem:[%s9795_s27 + $0x7d8] sm:$0xff]  ;;  %v8500_v22 = vcombine.high %v581_v14, %v589_v15 }
  0xe5   : > { %6506 = vmatpush2.bf16.xpose.msra.mxu0 %v8447_v40  ;;  %6547 = vmatpush2.bf16.xpose.msra.mxu1 %v8449_v41  ;;  %v406_v40 = vld [vmem:[%s9795_s27 + $0x218] sm:$0xff] }
  0xe6   : > { %6507 = vmatprep.subr.bf16.mxu0 %v8432_v42  ;;  %6548 = vmatprep.subr.bf16.mxu1 %v8434_v43  ;;  %v414_v41 = vld [vmem:[%s9795_s27 + $0x258] sm:$0xff]  ;;  %v8339_v42 = vcombine.low %v421_v28, %v429_v29  ;;  %v8341_v43 = vcombine.low %v422_v30, %v430_v31  ;;  %v8499_v30 = vcombine.low %v581_v14, %v589_v15 }
  0xe7   : > { %v8326_v45 = vcombine.high %v406_v40, %v414_v41  ;;  %v566_v28 = vld [vmem:[%s9795_s27 + $0x718] sm:$0xff]  ;;  %v8501_v31 = vcombine.low %v582_v17, %v590_v18 }
  0xe8   : > { %v574_v29 = vld [vmem:[%s9795_s27 + $0x758] sm:$0xff] }
  0xe9   : > { %v470_v14 = vld [vmem:[%s9795_s27 + $0x418] sm:$0xff] }
  0xea   : > { %v478_v15 = vld [vmem:[%s9795_s27 + $0x458] sm:$0xff] }
  0xed   : > { %6508 = vmatpush2.bf16.xpose.msra.mxu0 %v8431_v48  ;;  %6549 = vmatpush2.bf16.xpose.msra.mxu1 %v8433_v49  ;;  %v390_v48 = vld [vmem:[%s9795_s27 + $0x198] sm:$0xff] }
  0xee   : > { %6509 = vmatprep.subr.bf16.mxu0 %v8416_v50  ;;  %6550 = vmatprep.subr.bf16.mxu1 %v8418_v51  ;;  %v398_v49 = vld [vmem:[%s9795_s27 + $0x1d8] sm:$0xff]  ;;  %v8323_v50 = vcombine.low %v405_v38, %v413_v39  ;;  %v8325_v51 = vcombine.low %v406_v40, %v414_v41  ;;  %v8485_v41 = vcombine.low %v566_v28, %v574_v29 }
  0xef   : > { %v8310_v53 = vcombine.high %v390_v48, %v398_v49  ;;  %v550_v38 = vld [vmem:[%s9795_s27 + $0x698] sm:$0xff] }
  0xf0   : > { %v558_v39 = vld [vmem:[%s9795_s27 + $0x6d8] sm:$0xff] }
  0xf5   : > { %6510 = vmatpush2.bf16.xpose.msra.mxu0 %v8415_v56  ;;  %6551 = vmatpush2.bf16.xpose.msra.mxu1 %v8417_v57  ;;  %v374_v56 = vld [vmem:[%s9795_s27 + $0x118] sm:$0xff] }
  0xf6   : > { %6511 = vmatprep.subr.bf16.mxu0 %v8400_v58  ;;  %6552 = vmatprep.subr.bf16.mxu1 %v8402_v59  ;;  %v382_v57 = vld [vmem:[%s9795_s27 + $0x158] sm:$0xff]  ;;  %v8307_v58 = vcombine.low %v389_v46, %v397_v47  ;;  %v8309_v59 = vcombine.low %v390_v48, %v398_v49  ;;  %v8469_v49 = vcombine.low %v550_v38, %v558_v39 }
  0xf7   : > { %v8294_v61 = vcombine.high %v374_v56, %v382_v57  ;;  %v534_v46 = vld [vmem:[%s9795_s27 + $0x618] sm:$0xff] }
  0xf8   : > { %v542_v47 = vld [vmem:[%s9795_s27 + $0x658] sm:$0xff] }
  0xfd   : > { %6512 = vmatpush2.bf16.xpose.msra.mxu0 %v8399_v0  ;;  %6553 = vmatpush2.bf16.xpose.msra.mxu1 %v8401_v1  ;;  %v358_v0 = vld [vmem:[%s9795_s27 + $0x98] sm:$0xff] }
  0xfe   : > { %6513 = vmatprep.subr.bf16.mxu0 %v8384_v2  ;;  %6554 = vmatprep.subr.bf16.mxu1 %v8386_v3  ;;  %v366_v1 = vld [vmem:[%s9795_s27 + $0xd8] sm:$0xff]  ;;  %v8291_v2 = vcombine.low %v373_v54, %v381_v55  ;;  %v8293_v3 = vcombine.low %v374_v56, %v382_v57  ;;  %v8453_v57 = vcombine.low %v534_v46, %v542_v47 }
  0xff   : > { %v8278_v5 = vcombine.high %v358_v0, %v366_v1  ;;  %v518_v54 = vld [vmem:[%s9795_s27 + $0x598] sm:$0xff] }
 0x100   : > { %v526_v55 = vld [vmem:[%s9795_s27 + $0x5d8] sm:$0xff] }
 0x105   : > { %6514 = vmatpush2.bf16.xpose.msra.mxu0 %v8383_v8  ;;  %6555 = vmatpush2.bf16.xpose.msra.mxu1 %v8385_v9  ;;  %v342_v8 = vld [vmem:[%s9795_s27 + $0x18] sm:$0xff] }
 0x106   : > { %6565 = vmatprep.subr.bf16.mxu0 %v8372_v10  ;;  %6606 = vmatprep.subr.bf16.mxu1 %v8374_v11  ;;  %v350_v9 = vld [vmem:[%s9795_s27 + $0x58] sm:$0xff]  ;;  %v8275_v10 = vcombine.low %v357_v62, %v365_v63  ;;  %v8277_v11 = vcombine.low %v358_v0, %v366_v1  ;;  %v8437_v1 = vcombine.low %v518_v54, %v526_v55 }
 0x107   : > { %v8262_v13 = vcombine.high %v342_v8, %v350_v9  ;;  %v502_v62 = vld [vmem:[%s9795_s27 + $0x518] sm:$0xff] }
 0x108   : > { %v510_v63 = vld [vmem:[%s9795_s27 + $0x558] sm:$0xff] }
 0x10c   : > { %6516 = vmatmul.mubr.bf16.vlgmr.msra.gmra.mxu0 %v9887_v16  ;;  %6557 = vmatmul.mubr.bf16.vlgmr.msra.gmra.mxu1 %v9891_v20 }
 0x10d   : > { %6566 = vmatpush1.bf16.xpose.msra.mxu0 %v8371_v21  ;;  %6607 = vmatpush1.bf16.xpose.msra.mxu1 %v8373_v23  ;;  %v8261_v21 = vcombine.low %v342_v8, %v350_v9  ;;  %v8502_v23 = vcombine.high %v582_v17, %v590_v18  ;;  %v8421_v9 = vcombine.low %v502_v62, %v510_v63 }
 0x10e   : > { %6567 = vmatprep.subr.bf16.mxu0 %v8356_v24  ;;  %6608 = vmatprep.subr.bf16.mxu1 %v8358_v25  ;;  %v565_v24 = vld [vmem:[%s9795_s27 + $0x710] sm:$0xff]  ;;  %v8405_v18 = vcombine.low %v486_v6, %v494_v7 }
 0x10f   : > { %6597 = vmatprep.mubr.bf16.mxu0 %v9893_v26  ;;  %6638 = vmatprep.mubr.bf16.mxu1 %v9896_v27  ;;  %v573_v25 = vld [vmem:[%s9795_s27 + $0x750] sm:$0xff] }
 0x110   : > { %v8483_v40 = vcombine.low %v565_v24, %v573_v25 }
 0x115   : > { %6568 = vmatpush1.bf16.xpose.msra.mxu0 %v8355_v32  ;;  %6609 = vmatpush1.bf16.xpose.msra.mxu1 %v8357_v33  ;;  %v8484_v32 = vcombine.high %v565_v24, %v573_v25  ;;  %v8486_v33 = vcombine.high %v566_v28, %v574_v29  ;;  %v456_v24 = vld [vmem:[%s9795_s27 + $0x3a8] sm:$0xff]  ;;  %v8389_v29 = vcombine.low %v470_v14, %v478_v15 }
 0x116   : > { %6569 = vmatprep.subr.bf16.mxu0 %v8340_v36  ;;  %6610 = vmatprep.subr.bf16.mxu1 %v8342_v37  ;;  %v549_v36 = vld [vmem:[%s9795_s27 + $0x690] sm:$0xff]  ;;  %v464_v25 = vld [vmem:[%s9795_s27 + $0x3e8] sm:$0xff] }
 0x117   : > { %v557_v37 = vld [vmem:[%s9795_s27 + $0x6d0] sm:$0xff] }
 0x118   : > { %v8467_v48 = vcombine.low %v549_v36, %v557_v37 }
 0x11d   : > { %6570 = vmatpush1.bf16.xpose.msra.mxu0 %v8339_v42  ;;  %6611 = vmatpush1.bf16.xpose.msra.mxu1 %v8341_v43  ;;  %v8468_v42 = vcombine.high %v549_v36, %v557_v37  ;;  %v8470_v43 = vcombine.high %v550_v38, %v558_v39  ;;  %v439_v36 = vld [vmem:[%s9795_s27 + $0x320] sm:$0xff]  ;;  %v440_v39 = vld [vmem:[%s9795_s27 + $0x328] sm:$0xff] }
 0x11e   : > { %6571 = vmatprep.subr.bf16.mxu0 %v8324_v44  ;;  %6612 = vmatprep.subr.bf16.mxu1 %v8326_v45  ;;  %v533_v44 = vld [vmem:[%s9795_s27 + $0x610] sm:$0xff]  ;;  %v447_v37 = vld [vmem:[%s9795_s27 + $0x360] sm:$0xff] }
 0x11f   : > { %v541_v45 = vld [vmem:[%s9795_s27 + $0x650] sm:$0xff] }
 0x120   : > { %v8451_v56 = vcombine.low %v533_v44, %v541_v45 }
 0x125   : > { %6572 = vmatpush1.bf16.xpose.msra.mxu0 %v8323_v50  ;;  %6613 = vmatpush1.bf16.xpose.msra.mxu1 %v8325_v51  ;;  %v8452_v50 = vcombine.high %v533_v44, %v541_v45  ;;  %v8454_v51 = vcombine.high %v534_v46, %v542_v47  ;;  %v318_v44 = vld [vmem:[#allocation2 + $0x58] sm:$0xff]  ;;  %v8377_v45 = vcombine.low %v456_v24, %v464_v25 }
 0x126   : > { %6573 = vmatprep.subr.bf16.mxu0 %v8308_v52  ;;  %6614 = vmatprep.subr.bf16.mxu1 %v8310_v53  ;;  %v517_v52 = vld [vmem:[%s9795_s27 + $0x590] sm:$0xff]  ;;  %v8360_v46 = vcombine.high %v439_v36, %v447_v37 }
 0x127   : > { %v525_v53 = vld [vmem:[%s9795_s27 + $0x5d0] sm:$0xff] }
 0x128   : > { %v8435_v0 = vcombine.low %v517_v52, %v525_v53 }
 0x12d   : > { %6574 = vmatpush1.bf16.xpose.msra.mxu0 %v8307_v58  ;;  %6615 = vmatpush1.bf16.xpose.msra.mxu1 %v8309_v59  ;;  %v8436_v58 = vcombine.high %v517_v52, %v525_v53  ;;  %v8438_v59 = vcombine.high %v518_v54, %v526_v55  ;;  %v424_v52 = vld [vmem:[%s9795_s27 + $0x2a8] sm:$0xff]  ;;  %v8359_v54 = vcombine.low %v439_v36, %v447_v37 }
 0x12e   : > { %6575 = vmatprep.subr.bf16.mxu0 %v8292_v60  ;;  %6616 = vmatprep.subr.bf16.mxu1 %v8294_v61  ;;  %v501_v60 = vld [vmem:[%s9795_s27 + $0x510] sm:$0xff]  ;;  %v432_v53 = vld [vmem:[%s9795_s27 + $0x2e8] sm:$0xff] }
 0x12f   : > { %v509_v61 = vld [vmem:[%s9795_s27 + $0x550] sm:$0xff] }
 0x130   : > { %v8419_v8 = vcombine.low %v501_v60, %v509_v61 }
 0x135   : > { %6576 = vmatpush1.bf16.xpose.msra.mxu0 %v8291_v2  ;;  %6617 = vmatpush1.bf16.xpose.msra.mxu1 %v8293_v3  ;;  %v8420_v2 = vcombine.high %v501_v60, %v509_v61  ;;  %v8422_v3 = vcombine.high %v502_v62, %v510_v63  ;;  %v408_v60 = vld [vmem:[%s9795_s27 + $0x228] sm:$0xff]  ;;  %v8345_v63 = vcombine.low %v424_v52, %v432_v53 }
 0x136   : > { %6577 = vmatprep.subr.bf16.mxu0 %v8276_v4  ;;  %6618 = vmatprep.subr.bf16.mxu1 %v8278_v5  ;;  %v485_v4 = vld [vmem:[%s9795_s27 + $0x490] sm:$0xff]  ;;  %v416_v61 = vld [vmem:[%s9795_s27 + $0x268] sm:$0xff] }
 0x137   : > { %v493_v5 = vld [vmem:[%s9795_s27 + $0x4d0] sm:$0xff] }
 0x138   : > { %v8403_v17 = vcombine.low %v485_v4, %v493_v5 }
 0x13d   : > { %6578 = vmatpush1.bf16.xpose.msra.mxu0 %v8275_v10  ;;  %6619 = vmatpush1.bf16.xpose.msra.mxu1 %v8277_v11  ;;  %v8404_v10 = vcombine.high %v485_v4, %v493_v5  ;;  %v8406_v11 = vcombine.high %v486_v6, %v494_v7  ;;  %v392_v4 = vld [vmem:[%s9795_s27 + $0x1a8] sm:$0xff]  ;;  %v8329_v7 = vcombine.low %v408_v60, %v416_v61 }
 0x13e   : > { %6579 = vmatprep.subr.bf16.mxu0 %v8260_v12  ;;  %6620 = vmatprep.subr.bf16.mxu1 %v8262_v13  ;;  %v469_v12 = vld [vmem:[%s9795_s27 + $0x410] sm:$0xff]  ;;  %v400_v5 = vld [vmem:[%s9795_s27 + $0x1e8] sm:$0xff] }
 0x13f   : > { %v477_v13 = vld [vmem:[%s9795_s27 + $0x450] sm:$0xff] }
 0x140   : > { %v8387_v28 = vcombine.low %v469_v12, %v477_v13 }
 0x145   : > { %6580 = vmatpush1.bf16.xpose.msra.mxu0 %v8259_v19  ;;  %6621 = vmatpush1.bf16.xpose.msra.mxu1 %v8261_v21  ;;  %v8388_v19 = vcombine.high %v469_v12, %v477_v13  ;;  %v8390_v21 = vcombine.high %v470_v14, %v478_v15  ;;  %v376_v12 = vld [vmem:[%s9795_s27 + $0x128] sm:$0xff]  ;;  %v8313_v15 = vcombine.low %v392_v4, %v400_v5 }
 0x146   : > { %6581 = vmatprep.subr.bf16.mxu0 %v8500_v22  ;;  %6622 = vmatprep.subr.bf16.mxu1 %v8502_v23  ;;  %v455_v22 = vld [vmem:[%s9795_s27 + $0x3a0] sm:$0xff]  ;;  %v384_v13 = vld [vmem:[%s9795_s27 + $0x168] sm:$0xff] }
 0x147   : > { %v463_v23 = vld [vmem:[%s9795_s27 + $0x3e0] sm:$0xff] }
 0x14d   : > { %6582 = vmatpush2.bf16.xpose.msra.mxu0 %v8499_v30  ;;  %6623 = vmatpush2.bf16.xpose.msra.mxu1 %v8501_v31  ;;  %v8376_v30 = vcombine.high %v455_v22, %v463_v23  ;;  %v8378_v31 = vcombine.high %v456_v24, %v464_v25  ;;  %v8297_v25 = vcombine.low %v376_v12, %v384_v13 }
 0x14e   : > { %6583 = vmatprep.subr.bf16.mxu0 %v8484_v32  ;;  %6624 = vmatprep.subr.bf16.mxu1 %v8486_v33  ;;  %v311_v32 = vld [vmem:[#allocation2 + $0x20] sm:$0xff]  ;;  %v313_v33 = vld [vmem:[#allocation2 + $0x30] sm:$0xff] }
 0x14f   : > { %v9963_v38 = vpack.c.bf16 %v311_v32, %v311_v32  ;;  %v344_v32 = vld [vmem:[%s9795_s27 + $0x28] sm:$0xff] }
 0x155   : > { %6584 = vmatpush2.bf16.xpose.msra.mxu0 %v8483_v40  ;;  %6625 = vmatpush2.bf16.xpose.msra.mxu1 %v8485_v41  ;;  %v448_v40 = vld [vmem:[%s9795_s27 + $0x368] sm:$0xff] }
 0x156   : > { %6585 = vmatprep.subr.bf16.mxu0 %v8468_v42  ;;  %6626 = vmatprep.subr.bf16.mxu1 %v8470_v43  ;;  %v316_v41 = vld [vmem:[#allocation2 + $0x48] sm:$0xff]  ;;  %v9967_v42 = vpack.c.bf16 %v313_v33, %v313_v33  ;;  %v8375_v43 = vcombine.low %v455_v22, %v463_v23  ;;  %v8362_v47 = vcombine.high %v440_v39, %v448_v40 }
 0x157   : > { %v8361_v55 = vcombine.low %v440_v39, %v448_v40  ;;  %v360_v22 = vld [vmem:[%s9795_s27 + $0xa8] sm:$0xff] }
 0x158   : > { %v368_v23 = vld [vmem:[%s9795_s27 + $0xe8] sm:$0xff] }
 0x159   : > { %v352_v33 = vld [vmem:[%s9795_s27 + $0x68] sm:$0xff]  ;;  %v8281_v37 = vcombine.low %v360_v22, %v368_v23 }
 0x15a   : > { %v8266_v40 = vcombine.high %v344_v32, %v352_v33 }
 0x15d   : > { %6586 = vmatpush2.bf16.xpose.msra.mxu0 %v8467_v48  ;;  %6627 = vmatpush2.bf16.xpose.msra.mxu1 %v8469_v49  ;;  %v9969_v48 = vpack.c.bf16 %v316_v41, %v316_v41  ;;  %v9972_v49 = vpack.c.bf16 %v318_v44, %v318_v44  ;;  %v583_v41 = vld [vmem:[%s9795_s27 + $0x7a0] sm:$0xff]  ;;  %v584_v44 = vld [vmem:[%s9795_s27 + $0x7a8] sm:$0xff] }
 0x15e   : > { %6587 = vmatprep.subr.bf16.mxu0 %v8452_v50  ;;  %6628 = vmatprep.subr.bf16.mxu1 %v8454_v51  ;;  %v423_v50 = vld [vmem:[%s9795_s27 + $0x2a0] sm:$0xff] }
 0x15f   : > { %v431_v51 = vld [vmem:[%s9795_s27 + $0x2e0] sm:$0xff] }
 0x160   : > { %v8343_v62 = vcombine.low %v423_v50, %v431_v51 }
 0x165   : > { %6588 = vmatpush2.bf16.xpose.msra.mxu0 %v8451_v56  ;;  %6629 = vmatpush2.bf16.xpose.msra.mxu1 %v8453_v57  ;;  %v8344_v56 = vcombine.high %v423_v50, %v431_v51  ;;  %v8346_v57 = vcombine.high %v424_v52, %v432_v53  ;;  %v567_v52 = vld [vmem:[%s9795_s27 + $0x720] sm:$0xff] }
 0x166   : > { %6589 = vmatprep.subr.bf16.mxu0 %v8436_v58  ;;  %6630 = vmatprep.subr.bf16.mxu1 %v8438_v59  ;;  %v407_v58 = vld [vmem:[%s9795_s27 + $0x220] sm:$0xff] }
 0x167   : > { %v415_v59 = vld [vmem:[%s9795_s27 + $0x260] sm:$0xff] }
 0x168   : > { %v8327_v6 = vcombine.low %v407_v58, %v415_v59  ;;  %v575_v53 = vld [vmem:[%s9795_s27 + $0x760] sm:$0xff] }
 0x16d   : > { %6590 = vmatpush2.bf16.xpose.msra.mxu0 %v8435_v0  ;;  %6631 = vmatpush2.bf16.xpose.msra.mxu1 %v8437_v1  ;;  %v8328_v0 = vcombine.high %v407_v58, %v415_v59  ;;  %v8330_v1 = vcombine.high %v408_v60, %v416_v61  ;;  %v8488_v58 = vcombine.high %v567_v52, %v575_v53 }
 0x16e   : > { %6591 = vmatprep.subr.bf16.mxu0 %v8420_v2  ;;  %6632 = vmatprep.subr.bf16.mxu1 %v8422_v3  ;;  %v391_v2 = vld [vmem:[%s9795_s27 + $0x1a0] sm:$0xff] }
 0x16f   : > { %v399_v3 = vld [vmem:[%s9795_s27 + $0x1e0] sm:$0xff] }
 0x170   : > { %v8311_v14 = vcombine.low %v391_v2, %v399_v3 }
 0x175   : > { %6592 = vmatpush2.bf16.xpose.msra.mxu0 %v8419_v8  ;;  %6633 = vmatpush2.bf16.xpose.msra.mxu1 %v8421_v9  ;;  %v8312_v8 = vcombine.high %v391_v2, %v399_v3  ;;  %v8314_v9 = vcombine.high %v392_v4, %v400_v5  ;;  %v559_v2 = vld [vmem:[%s9795_s27 + $0x6e0] sm:$0xff]  ;;  %v552_v5 = vld [vmem:[%s9795_s27 + $0x6a8] sm:$0xff] }
 0x176   : > { %6593 = vmatprep.subr.bf16.mxu0 %v8404_v10  ;;  %6634 = vmatprep.subr.bf16.mxu1 %v8406_v11  ;;  %v375_v10 = vld [vmem:[%s9795_s27 + $0x120] sm:$0xff] }
 0x177   : > { %v383_v11 = vld [vmem:[%s9795_s27 + $0x160] sm:$0xff] }
 0x178   : > { %v8295_v24 = vcombine.low %v375_v10, %v383_v11 }
 0x17d   : > { %6594 = vmatpush2.bf16.xpose.msra.mxu0 %v8403_v17  ;;  %6635 = vmatpush2.bf16.xpose.msra.mxu1 %v8405_v18  ;;  %v8296_v17 = vcombine.high %v375_v10, %v383_v11  ;;  %v8298_v18 = vcombine.high %v376_v12, %v384_v13 }
 0x17e   : > { %6595 = vmatprep.subr.bf16.mxu0 %v8388_v19  ;;  %6636 = vmatprep.subr.bf16.mxu1 %v8390_v21  ;;  %v359_v19 = vld [vmem:[%s9795_s27 + $0xa0] sm:$0xff] }
 0x17f   : > { %v367_v21 = vld [vmem:[%s9795_s27 + $0xe0] sm:$0xff] }
 0x180   : > { %v8279_v36 = vcombine.low %v359_v19, %v367_v21 }
 0x185   : > { %6596 = vmatpush2.bf16.xpose.msra.mxu0 %v8387_v28  ;;  %6637 = vmatpush2.bf16.xpose.msra.mxu1 %v8389_v29  ;;  %v8280_v28 = vcombine.high %v359_v19, %v367_v21  ;;  %v8282_v29 = vcombine.high %v360_v22, %v368_v23 }
 0x186   : > { %6647 = vmatprep.subr.bf16.mxu0 %v8376_v30  ;;  %6688 = vmatprep.subr.bf16.mxu1 %v8378_v31  ;;  %v343_v30 = vld [vmem:[%s9795_s27 + $0x20] sm:$0xff] }
 0x187   : > { %v351_v31 = vld [vmem:[%s9795_s27 + $0x60] sm:$0xff] }
 0x188   : > { %v8264_v39 = vcombine.high %v343_v30, %v351_v31 }
 0x18c   : > { %6598 = vmatmul.mubr.bf16.vlgmr.msra.gmra.mxu0 %v9963_v38  ;;  %6639 = vmatmul.mubr.bf16.vlgmr.msra.gmra.mxu1 %v9967_v42 }
 0x18d   : > { %6648 = vmatpush1.bf16.xpose.msra.mxu0 %v8375_v43  ;;  %6689 = vmatpush1.bf16.xpose.msra.mxu1 %v8377_v45  ;;  %v591_v43 = vld [vmem:[%s9795_s27 + $0x7e0] sm:$0xff]  ;;  %v592_v45 = vld [vmem:[%s9795_s27 + $0x7e8] sm:$0xff] }
 0x18e   : > { %6649 = vmatprep.subr.bf16.mxu0 %v8360_v46  ;;  %6690 = vmatprep.subr.bf16.mxu1 %v8362_v47  ;;  %v8263_v46 = vcombine.low %v343_v30, %v351_v31  ;;  %v8265_v47 = vcombine.low %v344_v32, %v352_v33  ;;  %v8504_v50 = vcombine.high %v583_v41, %v591_v43 }
 0x18f   : > { %6679 = vmatprep.mubr.bf16.mxu0 %v9969_v48  ;;  %6720 = vmatprep.mubr.bf16.mxu1 %v9972_v49  ;;  %v8506_v51 = vcombine.high %v584_v44, %v592_v45 }
 0x195   : > { %6650 = vmatpush1.bf16.xpose.msra.mxu0 %v8359_v54  ;;  %6691 = vmatpush1.bf16.xpose.msra.mxu1 %v8361_v55  ;;  %v568_v54 = vld [vmem:[%s9795_s27 + $0x728] sm:$0xff] }
 0x196   : > { %6651 = vmatprep.subr.bf16.mxu0 %v8344_v56  ;;  %6692 = vmatprep.subr.bf16.mxu1 %v8346_v57  ;;  %v576_v55 = vld [vmem:[%s9795_s27 + $0x768] sm:$0xff]  ;;  %v8503_v56 = vcombine.low %v583_v41, %v591_v43  ;;  %v8505_v57 = vcombine.low %v584_v44, %v592_v45 }
 0x197   : > { %v8490_v59 = vcombine.high %v568_v54, %v576_v55  ;;  %v8489_v10 = vcombine.low %v568_v54, %v576_v55 }
 0x19d   : > { %6652 = vmatpush1.bf16.xpose.msra.mxu0 %v8343_v62  ;;  %6693 = vmatpush1.bf16.xpose.msra.mxu1 %v8345_v63 }
 0x19e   : > { %6653 = vmatprep.subr.bf16.mxu0 %v8328_v0  ;;  %6694 = vmatprep.subr.bf16.mxu1 %v8330_v1  ;;  %v551_v1 = vld [vmem:[%s9795_s27 + $0x6a0] sm:$0xff] }
 0x19f   : > { %v8472_v11 = vcombine.high %v551_v1, %v559_v2  ;;  %v8471_v19 = vcombine.low %v551_v1, %v559_v2  ;;  %v457_v1 = vld [vmem:[%s9795_s27 + $0x3b0] sm:$0xff] }
 0x1a0   : > { %v465_v2 = vld [vmem:[%s9795_s27 + $0x3f0] sm:$0xff] }
 0x1a5   : > { %6654 = vmatpush1.bf16.xpose.msra.mxu0 %v8327_v6  ;;  %6695 = vmatpush1.bf16.xpose.msra.mxu1 %v8329_v7  ;;  %v560_v6 = vld [vmem:[%s9795_s27 + $0x6e8] sm:$0xff] }
 0x1a6   : > { %6655 = vmatprep.subr.bf16.mxu0 %v8312_v8  ;;  %6696 = vmatprep.subr.bf16.mxu1 %v8314_v9  ;;  %v8487_v8 = vcombine.low %v567_v52, %v575_v53  ;;  %v8474_v13 = vcombine.high %v552_v5, %v560_v6  ;;  %v8473_v21 = vcombine.low %v552_v5, %v560_v6  ;;  %v466_v5 = vld [vmem:[%s9795_s27 + $0x3f8] sm:$0xff] }
 0x1ad   : > { %6656 = vmatpush1.bf16.xpose.msra.mxu0 %v8311_v14  ;;  %6697 = vmatpush1.bf16.xpose.msra.mxu1 %v8313_v15  ;;  %v535_v14 = vld [vmem:[%s9795_s27 + $0x620] sm:$0xff] }
 0x1ae   : > { %6657 = vmatprep.subr.bf16.mxu0 %v8296_v17  ;;  %6698 = vmatprep.subr.bf16.mxu1 %v8298_v18  ;;  %v543_v15 = vld [vmem:[%s9795_s27 + $0x660] sm:$0xff]  ;;  %v536_v17 = vld [vmem:[%s9795_s27 + $0x628] sm:$0xff] }
 0x1af   : > { %v544_v18 = vld [vmem:[%s9795_s27 + $0x668] sm:$0xff]  ;;  %v8456_v22 = vcombine.high %v535_v14, %v543_v15  ;;  %v8455_v30 = vcombine.low %v535_v14, %v543_v15  ;;  %v442_v15 = vld [vmem:[%s9795_s27 + $0x338] sm:$0xff] }
 0x1b0   : > { %v8458_v23 = vcombine.high %v536_v17, %v544_v18  ;;  %v8457_v31 = vcombine.low %v536_v17, %v544_v18  ;;  %v450_v17 = vld [vmem:[%s9795_s27 + $0x378] sm:$0xff]  ;;  %v320_v18 = vld [vmem:[#allocation2 + $0x68] sm:$0xff] }
 0x1b5   : > { %6658 = vmatpush1.bf16.xpose.msra.mxu0 %v8295_v24  ;;  %6699 = vmatpush1.bf16.xpose.msra.mxu1 %v8297_v25  ;;  %v519_v24 = vld [vmem:[%s9795_s27 + $0x5a0] sm:$0xff] }
 0x1b6   : > { %6659 = vmatprep.subr.bf16.mxu0 %v8280_v28  ;;  %6700 = vmatprep.subr.bf16.mxu1 %v8282_v29  ;;  %v527_v25 = vld [vmem:[%s9795_s27 + $0x5e0] sm:$0xff]  ;;  %v520_v28 = vld [vmem:[%s9795_s27 + $0x5a8] sm:$0xff] }
 0x1b7   : > { %v528_v29 = vld [vmem:[%s9795_s27 + $0x5e8] sm:$0xff]  ;;  %v8440_v32 = vcombine.high %v519_v24, %v527_v25  ;;  %v8439_v41 = vcombine.low %v519_v24, %v527_v25  ;;  %v8366_v25 = vcombine.high %v442_v15, %v450_v17 }
 0x1b8   : > { %v8442_v33 = vcombine.high %v520_v28, %v528_v29  ;;  %v8441_v43 = vcombine.low %v520_v28, %v528_v29  ;;  %v10049_v28 = vpack.c.bf16 %v320_v18, %v320_v18  ;;  %v346_v18 = vld [vmem:[%s9795_s27 + $0x38] sm:$0xff] }
 0x1bd   : > { %6660 = vmatpush1.bf16.xpose.msra.mxu0 %v8279_v36  ;;  %6701 = vmatpush1.bf16.xpose.msra.mxu1 %v8281_v37  ;;  %v503_v36 = vld [vmem:[%s9795_s27 + $0x520] sm:$0xff] }
 0x1be   : > { %6661 = vmatprep.subr.bf16.mxu0 %v8264_v39  ;;  %6702 = vmatprep.subr.bf16.mxu1 %v8266_v40  ;;  %v511_v37 = vld [vmem:[%s9795_s27 + $0x560] sm:$0xff]  ;;  %v504_v39 = vld [vmem:[%s9795_s27 + $0x528] sm:$0xff] }
 0x1bf   : > { %v512_v40 = vld [vmem:[%s9795_s27 + $0x568] sm:$0xff]  ;;  %v8424_v44 = vcombine.high %v503_v36, %v511_v37  ;;  %v8423_v52 = vcombine.low %v503_v36, %v511_v37  ;;  %v8365_v37 = vcombine.low %v442_v15, %v450_v17  ;;  %v345_v15 = vld [vmem:[%s9795_s27 + $0x30] sm:$0xff] }
 0x1c0   : > { %v8426_v45 = vcombine.high %v504_v39, %v512_v40  ;;  %v8425_v53 = vcombine.low %v504_v39, %v512_v40  ;;  %v353_v17 = vld [vmem:[%s9795_s27 + $0x70] sm:$0xff] }
 0x1c5   : > { %6662 = vmatpush1.bf16.xpose.msra.mxu0 %v8263_v46  ;;  %6703 = vmatpush1.bf16.xpose.msra.mxu1 %v8265_v47  ;;  %v487_v46 = vld [vmem:[%s9795_s27 + $0x4a0] sm:$0xff] }
 0x1c6   : > { %6663 = vmatprep.subr.bf16.mxu0 %v8504_v50  ;;  %6704 = vmatprep.subr.bf16.mxu1 %v8506_v51  ;;  %v495_v47 = vld [vmem:[%s9795_s27 + $0x4e0] sm:$0xff]  ;;  %v488_v50 = vld [vmem:[%s9795_s27 + $0x4a8] sm:$0xff] }
 0x1c7   : > { %v496_v51 = vld [vmem:[%s9795_s27 + $0x4e8] sm:$0xff]  ;;  %v8408_v54 = vcombine.high %v487_v46, %v495_v47 }
 0x1c8   : > { %v8410_v55 = vcombine.high %v488_v50, %v496_v51 }
 0x1cc   : > { %v6517_v60 = vpop.f32.mrf.mxu0  ;;  %v6558_v61 = vpop.f32.mrf.mxu1 }
 0x1cd   : > { %6664 = vmatpush2.bf16.xpose.msra.mxu0 %v8503_v56  ;;  %v10009_v62 = vadd.f32 %v6558_v61, %v6517_v60  ;;  %6705 = vmatpush2.bf16.xpose.msra.mxu1 %v8505_v57  ;;  %v471_v56 = vld [vmem:[%s9795_s27 + $0x420] sm:$0xff]  ;;  %v8407_v60 = vcombine.low %v487_v46, %v495_v47  ;;  %v8409_v61 = vcombine.low %v488_v50, %v496_v51 }
 0x1ce   : > { %v6519_v63 = vpop.f32.mrf.mxu0  ;;  %6665 = vmatprep.subr.bf16.mxu0 %v8488_v58  ;;  %v6560_v0 = vpop.f32.mrf.mxu1  ;;  %6706 = vmatprep.subr.bf16.mxu1 %v8490_v59  ;;  %v479_v57 = vld [vmem:[%s9795_s27 + $0x460] sm:$0xff]  ;;  %v472_v58 = vld [vmem:[%s9795_s27 + $0x428] sm:$0xff] }
 0x1cf   : > { %v10013_v3 = vadd.f32 %v6560_v0, %v6519_v63  ;;  %v480_v59 = vld [vmem:[%s9795_s27 + $0x468] sm:$0xff]  ;;  %v8392_v63 = vcombine.high %v471_v56, %v479_v57  ;;  %v8391_v6 = vcombine.low %v471_v56, %v479_v57 }
 0x1d0   : > { %v6521_v4 = vpop.f32.mrf.mxu0  ;;  %v6562_v7 = vpop.f32.mrf.mxu1  ;;  %v8394_v0 = vcombine.high %v472_v58, %v480_v59 }
 0x1d1   : > { %v458_v4 = vld [vmem:[%s9795_s27 + $0x3b8] sm:$0xff]  ;;  %v8393_v7 = vcombine.low %v472_v58, %v480_v59 }
 0x1d2   : > { %v6522_v9 = vpop.f32.mrf.mxu0  ;;  %v6563_v12 = vpop.f32.mrf.mxu1 }
 0x1d3   : > { %v8382_v9 = vcombine.high %v458_v4, %v466_v5  ;;  %v441_v12 = vld [vmem:[%s9795_s27 + $0x330] sm:$0xff] }
 0x1d5   : > { %6666 = vmatpush2.bf16.xpose.msra.mxu0 %v8487_v8  ;;  %6707 = vmatpush2.bf16.xpose.msra.mxu1 %v8489_v10  ;;  %v8380_v8 = vcombine.high %v457_v1, %v465_v2  ;;  %v315_v10 = vld [vmem:[#allocation2 + $0x40] sm:$0xff] }
 0x1d6   : > { %6667 = vmatprep.subr.bf16.mxu0 %v8472_v11  ;;  %6708 = vmatprep.subr.bf16.mxu1 %v8474_v13  ;;  %v317_v11 = vld [vmem:[#allocation2 + $0x50] sm:$0xff]  ;;  %v10043_v14 = vpack.c.bf16 %v315_v10, %v315_v10 }
 0x1d7   : > { %v449_v13 = vld [vmem:[%s9795_s27 + $0x370] sm:$0xff] }
 0x1d8   : > { %v8364_v24 = vcombine.high %v441_v12, %v449_v13  ;;  %v8363_v36 = vcombine.low %v441_v12, %v449_v13 }
 0x1dd   : > { %6668 = vmatpush2.bf16.xpose.msra.mxu0 %v8471_v19  ;;  %6709 = vmatpush2.bf16.xpose.msra.mxu1 %v8473_v21  ;;  %v10047_v19 = vpack.c.bf16 %v317_v11, %v317_v11  ;;  %v8379_v21 = vcombine.low %v457_v1, %v465_v2 }
 0x1de   : > { %6669 = vmatprep.subr.bf16.mxu0 %v8456_v22  ;;  %6710 = vmatprep.subr.bf16.mxu1 %v8458_v23  ;;  %v322_v22 = vld [vmem:[#allocation2 + $0x78] sm:$0xff]  ;;  %v8381_v23 = vcombine.low %v458_v4, %v466_v5 }
 0x1df   : > { %v10052_v29 = vpack.c.bf16 %v322_v22, %v322_v22 }
 0x1e5   : > { %6670 = vmatpush2.bf16.xpose.msra.mxu0 %v8455_v30  ;;  %6711 = vmatpush2.bf16.xpose.msra.mxu1 %v8457_v31  ;;  %v425_v30 = vld [vmem:[%s9795_s27 + $0x2b0] sm:$0xff] }
 0x1e6   : > { %6671 = vmatprep.subr.bf16.mxu0 %v8440_v32  ;;  %6712 = vmatprep.subr.bf16.mxu1 %v8442_v33  ;;  %v433_v31 = vld [vmem:[%s9795_s27 + $0x2f0] sm:$0xff]  ;;  %v426_v32 = vld [vmem:[%s9795_s27 + $0x2b8] sm:$0xff] }
 0x1e7   : > { %v434_v33 = vld [vmem:[%s9795_s27 + $0x2f8] sm:$0xff]  ;;  %v8348_v39 = vcombine.high %v425_v30, %v433_v31  ;;  %v8347_v46 = vcombine.low %v425_v30, %v433_v31  ;;  %v585_v30 = vld [vmem:[%s9795_s27 + $0x7b0] sm:$0xff] }
 0x1e8   : > { %v8350_v40 = vcombine.high %v426_v32, %v434_v33  ;;  %v8349_v47 = vcombine.low %v426_v32, %v434_v33  ;;  %v593_v31 = vld [vmem:[%s9795_s27 + $0x7f0] sm:$0xff]  ;;  %v586_v32 = vld [vmem:[%s9795_s27 + $0x7b8] sm:$0xff] }
 0x1e9   : > { %v594_v33 = vld [vmem:[%s9795_s27 + $0x7f8] sm:$0xff] }
 0x1ed   : > { %6672 = vmatpush2.bf16.xpose.msra.mxu0 %v8439_v41  ;;  %6713 = vmatpush2.bf16.xpose.msra.mxu1 %v8441_v43  ;;  %v409_v41 = vld [vmem:[%s9795_s27 + $0x230] sm:$0xff] }
 0x1ee   : > { %6673 = vmatprep.subr.bf16.mxu0 %v8424_v44  ;;  %6714 = vmatprep.subr.bf16.mxu1 %v8426_v45  ;;  %v417_v43 = vld [vmem:[%s9795_s27 + $0x270] sm:$0xff]  ;;  %v410_v44 = vld [vmem:[%s9795_s27 + $0x238] sm:$0xff] }
 0x1ef   : > { %v418_v45 = vld [vmem:[%s9795_s27 + $0x278] sm:$0xff]  ;;  %v8332_v50 = vcombine.high %v409_v41, %v417_v43  ;;  %v8331_v56 = vcombine.low %v409_v41, %v417_v43  ;;  %v569_v41 = vld [vmem:[%s9795_s27 + $0x730] sm:$0xff] }
 0x1f0   : > { %v8334_v51 = vcombine.high %v410_v44, %v418_v45  ;;  %v8333_v57 = vcombine.low %v410_v44, %v418_v45  ;;  %v577_v43 = vld [vmem:[%s9795_s27 + $0x770] sm:$0xff]  ;;  %v570_v44 = vld [vmem:[%s9795_s27 + $0x738] sm:$0xff] }
 0x1f1   : > { %v578_v45 = vld [vmem:[%s9795_s27 + $0x778] sm:$0xff] }
 0x1f5   : > { %6674 = vmatpush2.bf16.xpose.msra.mxu0 %v8423_v52  ;;  %6715 = vmatpush2.bf16.xpose.msra.mxu1 %v8425_v53  ;;  %v393_v52 = vld [vmem:[%s9795_s27 + $0x1b0] sm:$0xff] }
 0x1f6   : > { %6675 = vmatprep.subr.bf16.mxu0 %v8408_v54  ;;  %6716 = vmatprep.subr.bf16.mxu1 %v8410_v55  ;;  %v401_v53 = vld [vmem:[%s9795_s27 + $0x1f0] sm:$0xff]  ;;  %v394_v54 = vld [vmem:[%s9795_s27 + $0x1b8] sm:$0xff] }
 0x1f7   : > { %v402_v55 = vld [vmem:[%s9795_s27 + $0x1f8] sm:$0xff]  ;;  %v8316_v58 = vcombine.high %v393_v52, %v401_v53  ;;  %v8315_v1 = vcombine.low %v393_v52, %v401_v53 }
 0x1f8   : > { %v8318_v59 = vcombine.high %v394_v54, %v402_v55  ;;  %v8317_v2 = vcombine.low %v394_v54, %v402_v55 }
 0x1fd   : > { %6676 = vmatpush2.bf16.xpose.msra.mxu0 %v8407_v60  ;;  %6717 = vmatpush2.bf16.xpose.msra.mxu1 %v8409_v61  ;;  %v377_v60 = vld [vmem:[%s9795_s27 + $0x130] sm:$0xff] }
 0x1fe   : > { %6677 = vmatprep.subr.bf16.mxu0 %v8392_v63  ;;  %6718 = vmatprep.subr.bf16.mxu1 %v8394_v0  ;;  %v385_v61 = vld [vmem:[%s9795_s27 + $0x170] sm:$0xff]  ;;  %v378_v63 = vld [vmem:[%s9795_s27 + $0x138] sm:$0xff] }
 0x1ff   : > { %v386_v0 = vld [vmem:[%s9795_s27 + $0x178] sm:$0xff]  ;;  %v8300_v4 = vcombine.high %v377_v60, %v385_v61  ;;  %v8299_v10 = vcombine.low %v377_v60, %v385_v61  ;;  %v561_v60 = vld [vmem:[%s9795_s27 + $0x6f0] sm:$0xff] }
 0x200   : > { %v8302_v5 = vcombine.high %v378_v63, %v386_v0  ;;  %v8301_v11 = vcombine.low %v378_v63, %v386_v0  ;;  %v554_v63 = vld [vmem:[%s9795_s27 + $0x6b8] sm:$0xff] }
 0x201   : > { %v562_v0 = vld [vmem:[%s9795_s27 + $0x6f8] sm:$0xff] }
 0x205   : > { %6678 = vmatpush2.bf16.xpose.msra.mxu0 %v8391_v6  ;;  %6719 = vmatpush2.bf16.xpose.msra.mxu1 %v8393_v7  ;;  %v361_v6 = vld [vmem:[%s9795_s27 + $0xb0] sm:$0xff] }
 0x206   : > { %6729 = vmatprep.subr.bf16.mxu0 %v8380_v8  ;;  %6770 = vmatprep.subr.bf16.mxu1 %v8382_v9  ;;  %v369_v7 = vld [vmem:[%s9795_s27 + $0xf0] sm:$0xff]  ;;  %v362_v8 = vld [vmem:[%s9795_s27 + $0xb8] sm:$0xff] }
 0x207   : > { %v370_v9 = vld [vmem:[%s9795_s27 + $0xf8] sm:$0xff]  ;;  %v8284_v12 = vcombine.high %v361_v6, %v369_v7  ;;  %v8283_v22 = vcombine.low %v361_v6, %v369_v7 }
 0x208   : > { %v8286_v13 = vcombine.high %v362_v8, %v370_v9 }
 0x20c   : > { %6680 = vmatmul.mubr.bf16.vlgmr.msra.gmra.mxu0 %v10043_v14  ;;  %6721 = vmatmul.mubr.bf16.vlgmr.msra.gmra.mxu1 %v10047_v19 }
 0x20d   : > { %6730 = vmatpush1.bf16.xpose.msra.mxu0 %v8379_v21  ;;  %6771 = vmatpush1.bf16.xpose.msra.mxu1 %v8381_v23  ;;  %v354_v21 = vld [vmem:[%s9795_s27 + $0x78] sm:$0xff]  ;;  %v8285_v23 = vcombine.low %v362_v8, %v370_v9  ;;  %v537_v8 = vld [vmem:[%s9795_s27 + $0x630] sm:$0xff] }
 0x20e   : > { %6731 = vmatprep.subr.bf16.mxu0 %v8364_v24  ;;  %6772 = vmatprep.subr.bf16.mxu1 %v8366_v25  ;;  %v8268_v24 = vcombine.high %v345_v15, %v353_v17  ;;  %v8270_v25 = vcombine.high %v346_v18, %v354_v21  ;;  %v545_v9 = vld [vmem:[%s9795_s27 + $0x670] sm:$0xff] }
 0x20f   : > { %6761 = vmatprep.mubr.bf16.mxu0 %v10049_v28  ;;  %6802 = vmatprep.mubr.bf16.mxu1 %v10052_v29 }
 0x215   : > { %6732 = vmatpush1.bf16.xpose.msra.mxu0 %v8363_v36  ;;  %6773 = vmatpush1.bf16.xpose.msra.mxu1 %v8365_v37  ;;  %v8267_v36 = vcombine.low %v345_v15, %v353_v17  ;;  %v8269_v37 = vcombine.low %v346_v18, %v354_v21  ;;  %v8460_v15 = vcombine.high %v537_v8, %v545_v9  ;;  %v521_v18 = vld [vmem:[%s9795_s27 + $0x5b0] sm:$0xff] }
 0x216   : > { %6733 = vmatprep.subr.bf16.mxu0 %v8348_v39  ;;  %6774 = vmatprep.subr.bf16.mxu1 %v8350_v40  ;;  %v8508_v39 = vcombine.high %v585_v30, %v593_v31  ;;  %v8510_v40 = vcombine.high %v586_v32, %v594_v33  ;;  %v529_v21 = vld [vmem:[%s9795_s27 + $0x5f0] sm:$0xff] }
 0x21d   : > { %6734 = vmatpush1.bf16.xpose.msra.mxu0 %v8347_v46  ;;  %6775 = vmatpush1.bf16.xpose.msra.mxu1 %v8349_v47  ;;  %v8507_v46 = vcombine.low %v585_v30, %v593_v31  ;;  %v8509_v47 = vcombine.low %v586_v32, %v594_v33  ;;  %v8444_v30 = vcombine.high %v521_v18, %v529_v21  ;;  %v505_v32 = vld [vmem:[%s9795_s27 + $0x530] sm:$0xff] }
 0x21e   : > { %6735 = vmatprep.subr.bf16.mxu0 %v8332_v50  ;;  %6776 = vmatprep.subr.bf16.mxu1 %v8334_v51  ;;  %v8492_v50 = vcombine.high %v569_v41, %v577_v43  ;;  %v8494_v51 = vcombine.high %v570_v44, %v578_v45  ;;  %v513_v33 = vld [vmem:[%s9795_s27 + $0x570] sm:$0xff] }
 0x225   : > { %6736 = vmatpush1.bf16.xpose.msra.mxu0 %v8331_v56  ;;  %6777 = vmatpush1.bf16.xpose.msra.mxu1 %v8333_v57 }
 0x226   : > { %6737 = vmatprep.subr.bf16.mxu0 %v8316_v58  ;;  %6778 = vmatprep.subr.bf16.mxu1 %v8318_v59  ;;  %v553_v59 = vld [vmem:[%s9795_s27 + $0x6b0] sm:$0xff] }
 0x227   : > { %v8476_v6 = vcombine.high %v553_v59, %v561_v60 }
 0x22d   : > { %6738 = vmatpush1.bf16.xpose.msra.mxu0 %v8315_v1  ;;  %6779 = vmatpush1.bf16.xpose.msra.mxu1 %v8317_v2  ;;  %v8491_v2 = vcombine.low %v569_v41, %v577_v43  ;;  %v8428_v41 = vcombine.high %v505_v32, %v513_v33 }
 0x22e   : > { %6739 = vmatprep.subr.bf16.mxu0 %v8300_v4  ;;  %6780 = vmatprep.subr.bf16.mxu1 %v8302_v5  ;;  %v8493_v5 = vcombine.low %v570_v44, %v578_v45  ;;  %v489_v44 = vld [vmem:[%s9795_s27 + $0x4b0] sm:$0xff] }
 0x22f   : > { %v497_v45 = vld [vmem:[%s9795_s27 + $0x4f0] sm:$0xff] }
 0x235   : > { %6740 = vmatpush1.bf16.xpose.msra.mxu0 %v8299_v10  ;;  %6781 = vmatpush1.bf16.xpose.msra.mxu1 %v8301_v11  ;;  %v538_v10 = vld [vmem:[%s9795_s27 + $0x638] sm:$0xff] }
 0x236   : > { %6741 = vmatprep.subr.bf16.mxu0 %v8284_v12  ;;  %6782 = vmatprep.subr.bf16.mxu1 %v8286_v13  ;;  %v546_v11 = vld [vmem:[%s9795_s27 + $0x678] sm:$0xff]  ;;  %v8475_v12 = vcombine.low %v553_v59, %v561_v60  ;;  %v8477_v13 = vcombine.low %v554_v63, %v562_v0  ;;  %v8411_v59 = vcombine.low %v489_v44, %v497_v45 }
 0x237   : > { %v8462_v17 = vcombine.high %v538_v10, %v546_v11 }
 0x23d   : > { %6742 = vmatpush1.bf16.xpose.msra.mxu0 %v8283_v22  ;;  %6783 = vmatpush1.bf16.xpose.msra.mxu1 %v8285_v23  ;;  %v522_v22 = vld [vmem:[%s9795_s27 + $0x5b8] sm:$0xff] }
 0x23e   : > { %6743 = vmatprep.subr.bf16.mxu0 %v8268_v24  ;;  %6784 = vmatprep.subr.bf16.mxu1 %v8270_v25  ;;  %v530_v23 = vld [vmem:[%s9795_s27 + $0x5f8] sm:$0xff]  ;;  %v8459_v24 = vcombine.low %v537_v8, %v545_v9  ;;  %v8461_v25 = vcombine.low %v538_v10, %v546_v11  ;;  %v319_v8 = vld [vmem:[#allocation2 + $0x60] sm:$0xff]  ;;  %v321_v9 = vld [vmem:[#allocation2 + $0x70] sm:$0xff] }
 0x23f   : > { %v8446_v31 = vcombine.high %v522_v22, %v530_v23  ;;  %v691_v10 = vld [vmem:[%s9795_s27 + $0xb00] sm:$0xff] }
 0x240   : > { %v699_v11 = vld [vmem:[%s9795_s27 + $0xb40] sm:$0xff] }
 0x245   : > { %6744 = vmatpush1.bf16.xpose.msra.mxu0 %v8267_v36  ;;  %6785 = vmatpush1.bf16.xpose.msra.mxu1 %v8269_v37  ;;  %v506_v36 = vld [vmem:[%s9795_s27 + $0x538] sm:$0xff] }
 0x246   : > { %6745 = vmatprep.subr.bf16.mxu0 %v8508_v39  ;;  %6786 = vmatprep.subr.bf16.mxu1 %v8510_v40  ;;  %v514_v37 = vld [vmem:[%s9795_s27 + $0x578] sm:$0xff]  ;;  %v8443_v39 = vcombine.low %v521_v18, %v529_v21  ;;  %v8445_v40 = vcombine.low %v522_v22, %v530_v23  ;;  %v8608_v22 = vcombine.high %v691_v10, %v699_v11 }
 0x247   : > { %v8430_v43 = vcombine.high %v506_v36, %v514_v37 }
 0x24c   : > { %v6599_v52 = vpop.f32.mrf.mxu0  ;;  %v6640_v54 = vpop.f32.mrf.mxu1 }
 0x24d   : > { %v6600_v53 = vadd.f32 %v6599_v52, %v10009_v62  ;;  %6746 = vmatpush2.bf16.xpose.msra.mxu0 %v8507_v46  ;;  %6787 = vmatpush2.bf16.xpose.msra.mxu1 %v8509_v47  ;;  %v490_v46 = vld [vmem:[%s9795_s27 + $0x4b8] sm:$0xff]  ;;  %v8412_v52 = vcombine.high %v489_v44, %v497_v45 }
 0x24e   : > { %v6601_v55 = vpop.f32.mrf.mxu0  ;;  %6747 = vmatprep.subr.bf16.mxu0 %v8492_v50  ;;  %v6642_v58 = vpop.f32.mrf.mxu1  ;;  %6788 = vmatprep.subr.bf16.mxu1 %v8494_v51  ;;  %v498_v47 = vld [vmem:[%s9795_s27 + $0x4f8] sm:$0xff]  ;;  %v8427_v50 = vcombine.low %v505_v32, %v513_v33  ;;  %v8429_v51 = vcombine.low %v506_v36, %v514_v37  ;;  %v8607_v32 = vcombine.low %v691_v10, %v699_v11 }
 0x24f   : > { %v10090_v56 = vadd.f32 %v6640_v54, %v6600_v53  ;;  %v6602_v57 = vadd.f32 %v6601_v55, %v10013_v3  ;;  %v8478_v3 = vcombine.high %v554_v63, %v562_v0  ;;  %v8414_v53 = vcombine.high %v490_v46, %v498_v47  ;;  %v473_v54 = vld [vmem:[%s9795_s27 + $0x430] sm:$0xff]  ;;  %v707_v0 = vld [vmem:[%s9795_s27 + $0xb80] sm:$0xff] }
 0x250   : > { %v6603_v61 = vpop.f32.mrf.mxu0  ;;  %v6644_v1 = vpop.f32.mrf.mxu1  ;;  %v481_v55 = vld [vmem:[%s9795_s27 + $0x470] sm:$0xff]  ;;  %v8413_v60 = vcombine.low %v490_v46, %v498_v47 }
 0x251   : > { %v10097_v62 = vadd.f32 %v6642_v58, %v6602_v57  ;;  %v474_v57 = vld [vmem:[%s9795_s27 + $0x438] sm:$0xff]  ;;  %v8396_v61 = vcombine.high %v473_v54, %v481_v55  ;;  %v715_v1 = vld [vmem:[%s9795_s27 + $0xbc0] sm:$0xff] }
 0x252   : > { %v6604_v4 = vpop.f32.mrf.mxu0  ;;  %v6645_v7 = vpop.f32.mrf.mxu1  ;;  %v482_v58 = vld [vmem:[%s9795_s27 + $0x478] sm:$0xff]  ;;  %v8623_v18 = vcombine.low %v707_v0, %v715_v1 }
 0x253   : > { %v8398_v63 = vcombine.high %v474_v57, %v482_v58  ;;  %v716_v4 = vld [vmem:[%s9795_s27 + $0xbc8] sm:$0xff]  ;;  %v8624_v7 = vcombine.high %v707_v0, %v715_v1 }
 0x255   : > { %6748 = vmatpush2.bf16.xpose.msra.mxu0 %v8491_v2  ;;  %6789 = vmatpush2.bf16.xpose.msra.mxu1 %v8493_v5  ;;  %v708_v2 = vld [vmem:[%s9795_s27 + $0xb88] sm:$0xff]  ;;  %v8395_v5 = vcombine.low %v473_v54, %v481_v55 }
 0x256   : > { %6749 = vmatprep.subr.bf16.mxu0 %v8476_v6  ;;  %6790 = vmatprep.subr.bf16.mxu1 %v8478_v3  ;;  %v8397_v6 = vcombine.low %v474_v57, %v482_v58  ;;  %v8626_v3 = vcombine.high %v708_v2, %v716_v4  ;;  %v8625_v21 = vcombine.low %v708_v2, %v716_v4 }
 0x25d   : > { %6750 = vmatpush2.bf16.xpose.msra.mxu0 %v8475_v12  ;;  %6791 = vmatpush2.bf16.xpose.msra.mxu1 %v8477_v13  ;;  %v10125_v12 = vpack.c.bf16 %v319_v8, %v319_v8  ;;  %v692_v13 = vld [vmem:[%s9795_s27 + $0xb08] sm:$0xff] }
 0x25e   : > { %6751 = vmatprep.subr.bf16.mxu0 %v8460_v15  ;;  %6792 = vmatprep.subr.bf16.mxu1 %v8462_v17  ;;  %v700_v15 = vld [vmem:[%s9795_s27 + $0xb48] sm:$0xff]  ;;  %v10129_v17 = vpack.c.bf16 %v321_v9, %v321_v9 }
 0x25f   : > { %v8610_v23 = vcombine.high %v692_v13, %v700_v15  ;;  %v8609_v33 = vcombine.low %v692_v13, %v700_v15  ;;  %v595_v13 = vld [vmem:[%s9795_s27 + $0x800] sm:$0xff] }
 0x260   : > { %v603_v15 = vld [vmem:[%s9795_s27 + $0x840] sm:$0xff] }
 0x265   : > { %6752 = vmatpush2.bf16.xpose.msra.mxu0 %v8459_v24  ;;  %6793 = vmatpush2.bf16.xpose.msra.mxu1 %v8461_v25  ;;  %v675_v24 = vld [vmem:[%s9795_s27 + $0xa80] sm:$0xff] }
 0x266   : > { %6753 = vmatprep.subr.bf16.mxu0 %v8444_v30  ;;  %6794 = vmatprep.subr.bf16.mxu1 %v8446_v31  ;;  %v683_v25 = vld [vmem:[%s9795_s27 + $0xac0] sm:$0xff]  ;;  %v676_v30 = vld [vmem:[%s9795_s27 + $0xa88] sm:$0xff] }
 0x267   : > { %v684_v31 = vld [vmem:[%s9795_s27 + $0xac8] sm:$0xff]  ;;  %v8592_v36 = vcombine.high %v675_v24, %v683_v25  ;;  %v8591_v44 = vcombine.low %v675_v24, %v683_v25  ;;  %v8512_v24 = vcombine.high %v595_v13, %v603_v15 }
 0x268   : > { %v8594_v37 = vcombine.high %v676_v30, %v684_v31  ;;  %v8593_v45 = vcombine.low %v676_v30, %v684_v31  ;;  %v835_v30 = vld [vmem:[%s9795_s27 + $0xf80] sm:$0xff] }
 0x269   : > { %v843_v31 = vld [vmem:[%s9795_s27 + $0xfc0] sm:$0xff] }
 0x26d   : > { %6754 = vmatpush2.bf16.xpose.msra.mxu0 %v8443_v39  ;;  %6795 = vmatpush2.bf16.xpose.msra.mxu1 %v8445_v40  ;;  %v659_v39 = vld [vmem:[%s9795_s27 + $0xa00] sm:$0xff] }
 0x26e   : > { %6755 = vmatprep.subr.bf16.mxu0 %v8428_v41  ;;  %6796 = vmatprep.subr.bf16.mxu1 %v8430_v43  ;;  %v667_v40 = vld [vmem:[%s9795_s27 + $0xa40] sm:$0xff]  ;;  %v660_v41 = vld [vmem:[%s9795_s27 + $0xa08] sm:$0xff] }
 0x26f   : > { %v668_v43 = vld [vmem:[%s9795_s27 + $0xa48] sm:$0xff]  ;;  %v8576_v46 = vcombine.high %v659_v39, %v667_v40  ;;  %v8575_v54 = vcombine.low %v659_v39, %v667_v40  ;;  %v8752_v39 = vcombine.high %v835_v30, %v843_v31 }
 0x270   : > { %v8578_v47 = vcombine.high %v660_v41, %v668_v43  ;;  %v8577_v55 = vcombine.low %v660_v41, %v668_v43  ;;  %v819_v41 = vld [vmem:[%s9795_s27 + $0xf00] sm:$0xff] }
 0x271   : > { %v827_v43 = vld [vmem:[%s9795_s27 + $0xf40] sm:$0xff] }
 0x275   : > { %6756 = vmatpush2.bf16.xpose.msra.mxu0 %v8427_v50  ;;  %6797 = vmatpush2.bf16.xpose.msra.mxu1 %v8429_v51  ;;  %v643_v50 = vld [vmem:[%s9795_s27 + $0x980] sm:$0xff] }
 0x276   : > { %6757 = vmatprep.subr.bf16.mxu0 %v8412_v52  ;;  %6798 = vmatprep.subr.bf16.mxu1 %v8414_v53  ;;  %v651_v51 = vld [vmem:[%s9795_s27 + $0x9c0] sm:$0xff]  ;;  %v644_v52 = vld [vmem:[%s9795_s27 + $0x988] sm:$0xff] }
 0x277   : > { %v652_v53 = vld [vmem:[%s9795_s27 + $0x9c8] sm:$0xff]  ;;  %v8560_v57 = vcombine.high %v643_v50, %v651_v51  ;;  %v8559_v0 = vcombine.low %v643_v50, %v651_v51  ;;  %v8736_v50 = vcombine.high %v819_v41, %v827_v43 }
 0x278   : > { %v8562_v58 = vcombine.high %v644_v52, %v652_v53  ;;  %v8561_v1 = vcombine.low %v644_v52, %v652_v53 }
 0x27d   : > { %6758 = vmatpush2.bf16.xpose.msra.mxu0 %v8411_v59  ;;  %6799 = vmatpush2.bf16.xpose.msra.mxu1 %v8413_v60  ;;  %v627_v59 = vld [vmem:[%s9795_s27 + $0x900] sm:$0xff] }
 0x27e   : > { %6759 = vmatprep.subr.bf16.mxu0 %v8396_v61  ;;  %6800 = vmatprep.subr.bf16.mxu1 %v8398_v63  ;;  %v635_v60 = vld [vmem:[%s9795_s27 + $0x940] sm:$0xff]  ;;  %v628_v61 = vld [vmem:[%s9795_s27 + $0x908] sm:$0xff] }
 0x27f   : > { %v636_v63 = vld [vmem:[%s9795_s27 + $0x948] sm:$0xff]  ;;  %v8544_v2 = vcombine.high %v627_v59, %v635_v60  ;;  %v8543_v8 = vcombine.low %v627_v59, %v635_v60  ;;  %v803_v60 = vld [vmem:[%s9795_s27 + $0xe80] sm:$0xff] }
 0x280   : > { %v8546_v4 = vcombine.high %v628_v61, %v636_v63  ;;  %v8545_v9 = vcombine.low %v628_v61, %v636_v63  ;;  %v811_v61 = vld [vmem:[%s9795_s27 + $0xec0] sm:$0xff] }
 0x285   : > { %6760 = vmatpush2.bf16.xpose.msra.mxu0 %v8395_v5  ;;  %6801 = vmatpush2.bf16.xpose.msra.mxu1 %v8397_v6  ;;  %v611_v5 = vld [vmem:[%s9795_s27 + $0x880] sm:$0xff] }
 0x286   : > { %6811 = vmatprep.subr.bf16.mxu0 %v8624_v7  ;;  %6852 = vmatprep.subr.bf16.mxu1 %v8626_v3  ;;  %v619_v6 = vld [vmem:[%s9795_s27 + $0x8c0] sm:$0xff]  ;;  %v612_v7 = vld [vmem:[%s9795_s27 + $0x888] sm:$0xff] }
 0x287   : > { %v620_v3 = vld [vmem:[%s9795_s27 + $0x8c8] sm:$0xff]  ;;  %v8528_v10 = vcombine.high %v611_v5, %v619_v6 }
 0x288   : > { %v8530_v11 = vcombine.high %v612_v7, %v620_v3 }
 0x28c   : > { %6762 = vmatmul.mubr.bf16.vlgmr.msra.gmra.mxu0 %v10125_v12  ;;  %6803 = vmatmul.mubr.bf16.vlgmr.msra.gmra.mxu1 %v10129_v17 }
 0x28d   : > { %6812 = vmatpush1.bf16.xpose.msra.mxu0 %v8623_v18  ;;  %6853 = vmatpush1.bf16.xpose.msra.mxu1 %v8625_v21  ;;  %v596_v18 = vld [vmem:[%s9795_s27 + $0x808] sm:$0xff] }
 0x28e   : > { %6813 = vmatprep.subr.bf16.mxu0 %v8608_v22  ;;  %6854 = vmatprep.subr.bf16.mxu1 %v8610_v23  ;;  %v604_v21 = vld [vmem:[%s9795_s27 + $0x848] sm:$0xff]  ;;  %v8527_v22 = vcombine.low %v611_v5, %v619_v6  ;;  %v8529_v23 = vcombine.low %v612_v7, %v620_v3  ;;  %v8720_v7 = vcombine.high %v803_v60, %v811_v61 }
 0x28f   : > { %6843 = vmatprep.mubr.bf16.mxu0 %v9829_v34  ;;  %6884 = vmatprep.mubr.bf16.mxu1 %v9831_v35  ;;  %v8514_v25 = vcombine.high %v596_v18, %v604_v21 }
 0x295   : > { %6814 = vmatpush1.bf16.xpose.msra.mxu0 %v8607_v32  ;;  %6855 = vmatpush1.bf16.xpose.msra.mxu1 %v8609_v33  ;;  %v836_v32 = vld [vmem:[%s9795_s27 + $0xf88] sm:$0xff] }
 0x296   : > { %6815 = vmatprep.subr.bf16.mxu0 %v8592_v36  ;;  %6856 = vmatprep.subr.bf16.mxu1 %v8594_v37  ;;  %v844_v33 = vld [vmem:[%s9795_s27 + $0xfc8] sm:$0xff]  ;;  %v8511_v36 = vcombine.low %v595_v13, %v603_v15  ;;  %v8513_v37 = vcombine.low %v596_v18, %v604_v21  ;;  %v8719_v13 = vcombine.low %v803_v60, %v811_v61 }
 0x297   : > { %v8754_v40 = vcombine.high %v836_v32, %v844_v33  ;;  %v724_v60 = vld [vmem:[%s9795_s27 + $0xc08] sm:$0xff] }
 0x298   : > { %v732_v61 = vld [vmem:[%s9795_s27 + $0xc48] sm:$0xff] }
 0x29d   : > { %6816 = vmatpush1.bf16.xpose.msra.mxu0 %v8591_v44  ;;  %6857 = vmatpush1.bf16.xpose.msra.mxu1 %v8593_v45  ;;  %v820_v44 = vld [vmem:[%s9795_s27 + $0xf08] sm:$0xff] }
 0x29e   : > { %6817 = vmatprep.subr.bf16.mxu0 %v8576_v46  ;;  %6858 = vmatprep.subr.bf16.mxu1 %v8578_v47  ;;  %v828_v45 = vld [vmem:[%s9795_s27 + $0xf48] sm:$0xff]  ;;  %v8751_v46 = vcombine.low %v835_v30, %v843_v31  ;;  %v8753_v47 = vcombine.low %v836_v32, %v844_v33 }
 0x29f   : > { %v8738_v51 = vcombine.high %v820_v44, %v828_v45  ;;  %v8737_v6 = vcombine.low %v820_v44, %v828_v45 }
 0x2a5   : > { %6818 = vmatpush1.bf16.xpose.msra.mxu0 %v8575_v54  ;;  %6859 = vmatpush1.bf16.xpose.msra.mxu1 %v8577_v55 }
 0x2a6   : > { %6819 = vmatprep.subr.bf16.mxu0 %v8560_v57  ;;  %6860 = vmatprep.subr.bf16.mxu1 %v8562_v58 }
 0x2ad   : > { %6820 = vmatpush1.bf16.xpose.msra.mxu0 %v8559_v0  ;;  %6861 = vmatpush1.bf16.xpose.msra.mxu1 %v8561_v1  ;;  %v804_v0 = vld [vmem:[%s9795_s27 + $0xe88] sm:$0xff] }
 0x2ae   : > { %6821 = vmatprep.subr.bf16.mxu0 %v8544_v2  ;;  %6862 = vmatprep.subr.bf16.mxu1 %v8546_v4  ;;  %v812_v1 = vld [vmem:[%s9795_s27 + $0xec8] sm:$0xff]  ;;  %v8735_v4 = vcombine.low %v819_v41, %v827_v43 }
 0x2af   : > { %v8721_v15 = vcombine.low %v804_v0, %v812_v1 }
 0x2b5   : > { %6822 = vmatpush1.bf16.xpose.msra.mxu0 %v8543_v8  ;;  %6863 = vmatpush1.bf16.xpose.msra.mxu1 %v8545_v9  ;;  %v787_v8 = vld [vmem:[%s9795_s27 + $0xe00] sm:$0xff] }
 0x2b6   : > { %6823 = vmatprep.subr.bf16.mxu0 %v8528_v10  ;;  %6864 = vmatprep.subr.bf16.mxu1 %v8530_v11  ;;  %v795_v9 = vld [vmem:[%s9795_s27 + $0xe40] sm:$0xff]  ;;  %v788_v10 = vld [vmem:[%s9795_s27 + $0xe08] sm:$0xff] }
 0x2b7   : > { %v796_v11 = vld [vmem:[%s9795_s27 + $0xe48] sm:$0xff]  ;;  %v8704_v18 = vcombine.high %v787_v8, %v795_v9  ;;  %v8703_v30 = vcombine.low %v787_v8, %v795_v9 }
 0x2b8   : > { %v8706_v21 = vcombine.high %v788_v10, %v796_v11  ;;  %v8705_v31 = vcombine.low %v788_v10, %v796_v11  ;;  %v693_v10 = vld [vmem:[%s9795_s27 + $0xb10] sm:$0xff] }
 0x2b9   : > { %v701_v11 = vld [vmem:[%s9795_s27 + $0xb50] sm:$0xff] }
 0x2bd   : > { %6824 = vmatpush1.bf16.xpose.msra.mxu0 %v8527_v22  ;;  %6865 = vmatpush1.bf16.xpose.msra.mxu1 %v8529_v23  ;;  %v771_v22 = vld [vmem:[%s9795_s27 + $0xd80] sm:$0xff] }
 0x2be   : > { %6825 = vmatprep.subr.bf16.mxu0 %v8512_v24  ;;  %6866 = vmatprep.subr.bf16.mxu1 %v8514_v25  ;;  %v779_v23 = vld [vmem:[%s9795_s27 + $0xdc0] sm:$0xff]  ;;  %v772_v24 = vld [vmem:[%s9795_s27 + $0xd88] sm:$0xff] }
 0x2bf   : > { %v780_v25 = vld [vmem:[%s9795_s27 + $0xdc8] sm:$0xff]  ;;  %v8688_v32 = vcombine.high %v771_v22, %v779_v23  ;;  %v8687_v41 = vcombine.low %v771_v22, %v779_v23  ;;  %v8612_v22 = vcombine.high %v693_v10, %v701_v11 }
 0x2c0   : > { %v8690_v33 = vcombine.high %v772_v24, %v780_v25  ;;  %v8689_v43 = vcombine.low %v772_v24, %v780_v25  ;;  %v677_v24 = vld [vmem:[%s9795_s27 + $0xa90] sm:$0xff] }
 0x2c1   : > { %v685_v25 = vld [vmem:[%s9795_s27 + $0xad0] sm:$0xff] }
 0x2c5   : > { %6826 = vmatpush1.bf16.xpose.msra.mxu0 %v8511_v36  ;;  %6867 = vmatpush1.bf16.xpose.msra.mxu1 %v8513_v37  ;;  %v755_v36 = vld [vmem:[%s9795_s27 + $0xd00] sm:$0xff] }
 0x2c6   : > { %6827 = vmatprep.subr.bf16.mxu0 %v8752_v39  ;;  %6868 = vmatprep.subr.bf16.mxu1 %v8754_v40  ;;  %v763_v37 = vld [vmem:[%s9795_s27 + $0xd40] sm:$0xff]  ;;  %v756_v39 = vld [vmem:[%s9795_s27 + $0xd08] sm:$0xff] }
 0x2c7   : > { %v764_v40 = vld [vmem:[%s9795_s27 + $0xd48] sm:$0xff]  ;;  %v8672_v44 = vcombine.high %v755_v36, %v763_v37 }
 0x2c8   : > { %v8674_v45 = vcombine.high %v756_v39, %v764_v40 }
 0x2cc   : > { %v6681_v52 = vpop.f32.mrf.mxu0  ;;  %v6722_v54 = vpop.f32.mrf.mxu1 }
 0x2cd   : > { %v6682_v53 = vadd.f32 %v6681_v52, %v10090_v56  ;;  %6828 = vmatpush2.bf16.xpose.msra.mxu0 %v8751_v46  ;;  %6869 = vmatpush2.bf16.xpose.msra.mxu1 %v8753_v47  ;;  %v739_v46 = vld [vmem:[%s9795_s27 + $0xc80] sm:$0xff]  ;;  %v8671_v52 = vcombine.low %v755_v36, %v763_v37  ;;  %v8596_v36 = vcombine.high %v677_v24, %v685_v25 }
 0x2ce   : > { %v6683_v55 = vpop.f32.mrf.mxu0  ;;  %6829 = vmatprep.subr.bf16.mxu0 %v8736_v50  ;;  %v6724_v59 = vpop.f32.mrf.mxu1  ;;  %6870 = vmatprep.subr.bf16.mxu1 %v8738_v51  ;;  %v747_v47 = vld [vmem:[%s9795_s27 + $0xcc0] sm:$0xff]  ;;  %v740_v50 = vld [vmem:[%s9795_s27 + $0xc88] sm:$0xff] }
 0x2cf   : > { %v10168_v57 = vadd.f32 %v6722_v54, %v6682_v53  ;;  %v6684_v58 = vadd.f32 %v6683_v55, %v10097_v62  ;;  %v8722_v62 = vcombine.high %v804_v0, %v812_v1  ;;  %v748_v51 = vld [vmem:[%s9795_s27 + $0xcc8] sm:$0xff]  ;;  %v8673_v53 = vcombine.low %v756_v39, %v764_v40  ;;  %v661_v39 = vld [vmem:[%s9795_s27 + $0xa10] sm:$0xff] }
 0x2d0   : > { %v6685_v63 = vpop.f32.mrf.mxu0  ;;  %v6726_v2 = vpop.f32.mrf.mxu1  ;;  %v8656_v54 = vcombine.high %v739_v46, %v747_v47  ;;  %v8658_v55 = vcombine.high %v740_v50, %v748_v51  ;;  %v8657_v0 = vcombine.low %v740_v50, %v748_v51  ;;  %v669_v40 = vld [vmem:[%s9795_s27 + $0xa50] sm:$0xff] }
 0x2d1   : > { %v10175_v56 = vadd.f32 %v6724_v59, %v6684_v58  ;;  %v723_v58 = vld [vmem:[%s9795_s27 + $0xc00] sm:$0xff]  ;;  %v8655_v63 = vcombine.low %v739_v46, %v747_v47  ;;  %v8642_v2 = vcombine.high %v724_v60, %v732_v61  ;;  %v8580_v46 = vcombine.high %v661_v39, %v669_v40  ;;  %v645_v50 = vld [vmem:[%s9795_s27 + $0x990] sm:$0xff] }
 0x2d2   : > { %v6686_v5 = vpop.f32.mrf.mxu0  ;;  %v6727_v3 = vpop.f32.mrf.mxu1  ;;  %v731_v59 = vld [vmem:[%s9795_s27 + $0xc40] sm:$0xff]  ;;  %v653_v51 = vld [vmem:[%s9795_s27 + $0x9d0] sm:$0xff] }
 0x2d3   : > { %v8640_v1 = vcombine.high %v723_v58, %v731_v59  ;;  %v717_v5 = vld [vmem:[%s9795_s27 + $0xbd0] sm:$0xff]  ;;  %v8639_v3 = vcombine.low %v723_v58, %v731_v59  ;;  %v8564_v58 = vcombine.high %v645_v50, %v653_v51 }
 0x2d5   : > { %6830 = vmatpush2.bf16.xpose.msra.mxu0 %v8735_v4  ;;  %6871 = vmatpush2.bf16.xpose.msra.mxu1 %v8737_v6  ;;  %v709_v4 = vld [vmem:[%s9795_s27 + $0xb90] sm:$0xff]  ;;  %v710_v6 = vld [vmem:[%s9795_s27 + $0xb98] sm:$0xff] }
 0x2d6   : > { %6831 = vmatprep.subr.bf16.mxu0 %v8720_v7  ;;  %6872 = vmatprep.subr.bf16.mxu1 %v8722_v62  ;;  %v718_v7 = vld [vmem:[%s9795_s27 + $0xbd8] sm:$0xff]  ;;  %v8641_v62 = vcombine.low %v724_v60, %v732_v61  ;;  %v8628_v8 = vcombine.high %v709_v4, %v717_v5  ;;  %v629_v60 = vld [vmem:[%s9795_s27 + $0x910] sm:$0xff] }
 0x2d7   : > { %v8630_v9 = vcombine.high %v710_v6, %v718_v7  ;;  %v637_v61 = vld [vmem:[%s9795_s27 + $0x950] sm:$0xff] }
 0x2dd   : > { %6832 = vmatpush2.bf16.xpose.msra.mxu0 %v8719_v13  ;;  %6873 = vmatpush2.bf16.xpose.msra.mxu1 %v8721_v15  ;;  %v694_v13 = vld [vmem:[%s9795_s27 + $0xb18] sm:$0xff] }
 0x2de   : > { %6833 = vmatprep.subr.bf16.mxu0 %v8704_v18  ;;  %6874 = vmatprep.subr.bf16.mxu1 %v8706_v21  ;;  %v702_v15 = vld [vmem:[%s9795_s27 + $0xb58] sm:$0xff]  ;;  %v8627_v18 = vcombine.low %v709_v4, %v717_v5  ;;  %v8629_v21 = vcombine.low %v710_v6, %v718_v7  ;;  %v8548_v4 = vcombine.high %v629_v60, %v637_v61  ;;  %v613_v6 = vld [vmem:[%s9795_s27 + $0x890] sm:$0xff] }
 0x2df   : > { %v8614_v23 = vcombine.high %v694_v13, %v702_v15  ;;  %v621_v7 = vld [vmem:[%s9795_s27 + $0x8d0] sm:$0xff] }
 0x2e5   : > { %6834 = vmatpush2.bf16.xpose.msra.mxu0 %v8703_v30  ;;  %6875 = vmatpush2.bf16.xpose.msra.mxu1 %v8705_v31  ;;  %v678_v30 = vld [vmem:[%s9795_s27 + $0xa98] sm:$0xff] }
 0x2e6   : > { %6835 = vmatprep.subr.bf16.mxu0 %v8688_v32  ;;  %6876 = vmatprep.subr.bf16.mxu1 %v8690_v33  ;;  %v686_v31 = vld [vmem:[%s9795_s27 + $0xad8] sm:$0xff]  ;;  %v8611_v32 = vcombine.low %v693_v10, %v701_v11  ;;  %v8613_v33 = vcombine.low %v694_v13, %v702_v15  ;;  %v8532_v10 = vcombine.high %v613_v6, %v621_v7  ;;  %v597_v13 = vld [vmem:[%s9795_s27 + $0x810] sm:$0xff] }
 0x2e7   : > { %v8598_v37 = vcombine.high %v678_v30, %v686_v31  ;;  %v605_v15 = vld [vmem:[%s9795_s27 + $0x850] sm:$0xff] }
 0x2ed   : > { %6836 = vmatpush2.bf16.xpose.msra.mxu0 %v8687_v41  ;;  %6877 = vmatpush2.bf16.xpose.msra.mxu1 %v8689_v43  ;;  %v662_v41 = vld [vmem:[%s9795_s27 + $0xa18] sm:$0xff] }
 0x2ee   : > { %6837 = vmatprep.subr.bf16.mxu0 %v8672_v44  ;;  %6878 = vmatprep.subr.bf16.mxu1 %v8674_v45  ;;  %v670_v43 = vld [vmem:[%s9795_s27 + $0xa58] sm:$0xff]  ;;  %v8595_v44 = vcombine.low %v677_v24, %v685_v25  ;;  %v8597_v45 = vcombine.low %v678_v30, %v686_v31  ;;  %v8516_v24 = vcombine.high %v597_v13, %v605_v15  ;;  %v837_v30 = vld [vmem:[%s9795_s27 + $0xf90] sm:$0xff] }
 0x2ef   : > { %v8582_v47 = vcombine.high %v662_v41, %v670_v43  ;;  %v845_v31 = vld [vmem:[%s9795_s27 + $0xfd0] sm:$0xff] }
 0x2f5   : > { %6838 = vmatpush2.bf16.xpose.msra.mxu0 %v8671_v52  ;;  %6879 = vmatpush2.bf16.xpose.msra.mxu1 %v8673_v53  ;;  %v646_v52 = vld [vmem:[%s9795_s27 + $0x998] sm:$0xff] }
 0x2f6   : > { %6839 = vmatprep.subr.bf16.mxu0 %v8656_v54  ;;  %6880 = vmatprep.subr.bf16.mxu1 %v8658_v55  ;;  %v654_v53 = vld [vmem:[%s9795_s27 + $0x9d8] sm:$0xff]  ;;  %v8579_v54 = vcombine.low %v661_v39, %v669_v40  ;;  %v8581_v55 = vcombine.low %v662_v41, %v670_v43  ;;  %v8756_v39 = vcombine.high %v837_v30, %v845_v31  ;;  %v821_v41 = vld [vmem:[%s9795_s27 + $0xf10] sm:$0xff] }
 0x2f7   : > { %v8566_v59 = vcombine.high %v646_v52, %v654_v53  ;;  %v829_v43 = vld [vmem:[%s9795_s27 + $0xf50] sm:$0xff] }
 0x2fd   : > { %6840 = vmatpush2.bf16.xpose.msra.mxu0 %v8655_v63  ;;  %6881 = vmatpush2.bf16.xpose.msra.mxu1 %v8657_v0  ;;  %v630_v63 = vld [vmem:[%s9795_s27 + $0x918] sm:$0xff] }
 0x2fe   : > { %6841 = vmatprep.subr.bf16.mxu0 %v8640_v1  ;;  %6882 = vmatprep.subr.bf16.mxu1 %v8642_v2  ;;  %v638_v0 = vld [vmem:[%s9795_s27 + $0x958] sm:$0xff]  ;;  %v8563_v1 = vcombine.low %v645_v50, %v653_v51  ;;  %v8565_v2 = vcombine.low %v646_v52, %v654_v53  ;;  %v8740_v50 = vcombine.high %v821_v41, %v829_v43 }
 0x2ff   : > { %v8550_v5 = vcombine.high %v630_v63, %v638_v0 }
 0x305   : > { %6842 = vmatpush2.bf16.xpose.msra.mxu0 %v8639_v3  ;;  %6883 = vmatpush2.bf16.xpose.msra.mxu1 %v8641_v62  ;;  %v614_v3 = vld [vmem:[%s9795_s27 + $0x898] sm:$0xff] }
 0x306   : > { %6893 = vmatprep.subr.bf16.mxu0 %v8628_v8  ;;  %6934 = vmatprep.subr.bf16.mxu1 %v8630_v9  ;;  %v622_v62 = vld [vmem:[%s9795_s27 + $0x8d8] sm:$0xff]  ;;  %v8547_v8 = vcombine.low %v629_v60, %v637_v61  ;;  %v8549_v9 = vcombine.low %v630_v63, %v638_v0  ;;  %v805_v61 = vld [vmem:[%s9795_s27 + $0xe90] sm:$0xff] }
 0x307   : > { %v8534_v11 = vcombine.high %v614_v3, %v622_v62  ;;  %v813_v63 = vld [vmem:[%s9795_s27 + $0xed0] sm:$0xff] }
 0x30c   : > { %6844 = vmatmul.mubr.bf16.vlgmr.msra.gmra.mxu0 %v9887_v16  ;;  %6885 = vmatmul.mubr.bf16.vlgmr.msra.gmra.mxu1 %v9891_v20 }
 0x30d   : > { %6894 = vmatpush1.bf16.xpose.msra.mxu0 %v8627_v18  ;;  %6935 = vmatpush1.bf16.xpose.msra.mxu1 %v8629_v21  ;;  %v598_v18 = vld [vmem:[%s9795_s27 + $0x818] sm:$0xff] }
 0x30e   : > { %6895 = vmatprep.subr.bf16.mxu0 %v8612_v22  ;;  %6936 = vmatprep.subr.bf16.mxu1 %v8614_v23  ;;  %v606_v21 = vld [vmem:[%s9795_s27 + $0x858] sm:$0xff]  ;;  %v8531_v22 = vcombine.low %v613_v6, %v621_v7  ;;  %v8533_v23 = vcombine.low %v614_v3, %v622_v62  ;;  %v8739_v7 = vcombine.low %v821_v41, %v829_v43 }
 0x30f   : > { %6925 = vmatprep.mubr.bf16.mxu0 %v9893_v26  ;;  %6966 = vmatprep.mubr.bf16.mxu1 %v9896_v27  ;;  %v8518_v25 = vcombine.high %v598_v18, %v606_v21  ;;  %v8724_v62 = vcombine.high %v805_v61, %v813_v63 }
 0x315   : > { %6896 = vmatpush1.bf16.xpose.msra.mxu0 %v8611_v32  ;;  %6937 = vmatpush1.bf16.xpose.msra.mxu1 %v8613_v33  ;;  %v838_v32 = vld [vmem:[%s9795_s27 + $0xf98] sm:$0xff] }
 0x316   : > { %6897 = vmatprep.subr.bf16.mxu0 %v8596_v36  ;;  %6938 = vmatprep.subr.bf16.mxu1 %v8598_v37  ;;  %v846_v33 = vld [vmem:[%s9795_s27 + $0xfd8] sm:$0xff]  ;;  %v8515_v36 = vcombine.low %v597_v13, %v605_v15  ;;  %v8517_v37 = vcombine.low %v598_v18, %v606_v21  ;;  %v789_v21 = vld [vmem:[%s9795_s27 + $0xe10] sm:$0xff] }
 0x317   : > { %v8758_v40 = vcombine.high %v838_v32, %v846_v33 }
 0x31d   : > { %6898 = vmatpush1.bf16.xpose.msra.mxu0 %v8595_v44  ;;  %6939 = vmatpush1.bf16.xpose.msra.mxu1 %v8597_v45  ;;  %v822_v44 = vld [vmem:[%s9795_s27 + $0xf18] sm:$0xff] }
 0x31e   : > { %6899 = vmatprep.subr.bf16.mxu0 %v8580_v46  ;;  %6940 = vmatprep.subr.bf16.mxu1 %v8582_v47  ;;  %v830_v45 = vld [vmem:[%s9795_s27 + $0xf58] sm:$0xff]  ;;  %v8755_v46 = vcombine.low %v837_v30, %v845_v31  ;;  %v8757_v47 = vcombine.low %v838_v32, %v846_v33  ;;  %v8723_v31 = vcombine.low %v805_v61, %v813_v63 }
 0x31f   : > { %v8742_v51 = vcombine.high %v822_v44, %v830_v45  ;;  %v8741_v3 = vcombine.low %v822_v44, %v830_v45  ;;  %v773_v45 = vld [vmem:[%s9795_s27 + $0xd90] sm:$0xff] }
 0x325   : > { %6900 = vmatpush1.bf16.xpose.msra.mxu0 %v8579_v54  ;;  %6941 = vmatpush1.bf16.xpose.msra.mxu1 %v8581_v55 }
 0x326   : > { %6901 = vmatprep.subr.bf16.mxu0 %v8564_v58  ;;  %6942 = vmatprep.subr.bf16.mxu1 %v8566_v59 }
 0x32d   : > { %6902 = vmatpush1.bf16.xpose.msra.mxu0 %v8563_v1  ;;  %6943 = vmatpush1.bf16.xpose.msra.mxu1 %v8565_v2  ;;  %v806_v1 = vld [vmem:[%s9795_s27 + $0xe98] sm:$0xff] }
 0x32e   : > { %6903 = vmatprep.subr.bf16.mxu0 %v8548_v4  ;;  %6944 = vmatprep.subr.bf16.mxu1 %v8550_v5  ;;  %v814_v2 = vld [vmem:[%s9795_s27 + $0xed8] sm:$0xff] }
 0x32f   : > { %v8725_v32 = vcombine.low %v806_v1, %v814_v2 }
 0x335   : > { %6904 = vmatpush1.bf16.xpose.msra.mxu0 %v8547_v8  ;;  %6945 = vmatpush1.bf16.xpose.msra.mxu1 %v8549_v9 }
 0x336   : > { %6905 = vmatprep.subr.bf16.mxu0 %v8532_v10  ;;  %6946 = vmatprep.subr.bf16.mxu1 %v8534_v11  ;;  %v8726_v10 = vcombine.high %v806_v1, %v814_v2  ;;  %v757_v2 = vld [vmem:[%s9795_s27 + $0xd10] sm:$0xff] }
 0x33d   : > { %6906 = vmatpush1.bf16.xpose.msra.mxu0 %v8531_v22  ;;  %6947 = vmatpush1.bf16.xpose.msra.mxu1 %v8533_v23  ;;  %v797_v22 = vld [vmem:[%s9795_s27 + $0xe50] sm:$0xff]  ;;  %v790_v23 = vld [vmem:[%s9795_s27 + $0xe18] sm:$0xff] }
 0x33e   : > { %6907 = vmatprep.subr.bf16.mxu0 %v8516_v24  ;;  %6948 = vmatprep.subr.bf16.mxu1 %v8518_v25  ;;  %v798_v24 = vld [vmem:[%s9795_s27 + $0xe58] sm:$0xff]  ;;  %v8708_v33 = vcombine.high %v789_v21, %v797_v22 }
 0x345   : > { %6908 = vmatpush1.bf16.xpose.msra.mxu0 %v8515_v36  ;;  %6949 = vmatpush1.bf16.xpose.msra.mxu1 %v8517_v37 }
 0x346   : > { %6909 = vmatprep.subr.bf16.mxu0 %v8756_v39  ;;  %6950 = vmatprep.subr.bf16.mxu1 %v8758_v40  ;;  %v8710_v39 = vcombine.high %v790_v23, %v798_v24 }
 0x34c   : > { %v6763_v52 = vpop.f32.mrf.mxu0  ;;  %v6804_v54 = vpop.f32.mrf.mxu1 }
 0x34d   : > { %v6764_v53 = vadd.f32 %v6763_v52, %v10168_v57  ;;  %6910 = vmatpush2.bf16.xpose.msra.mxu0 %v8755_v46  ;;  %6951 = vmatpush2.bf16.xpose.msra.mxu1 %v8757_v47  ;;  %v781_v46 = vld [vmem:[%s9795_s27 + $0xdd0] sm:$0xff]  ;;  %v774_v47 = vld [vmem:[%s9795_s27 + $0xd98] sm:$0xff] }
 0x34e   : > { %v6765_v55 = vpop.f32.mrf.mxu0  ;;  %6911 = vmatprep.subr.bf16.mxu0 %v8740_v50  ;;  %v6806_v60 = vpop.f32.mrf.mxu1  ;;  %6952 = vmatprep.subr.bf16.mxu1 %v8742_v51  ;;  %v782_v50 = vld [vmem:[%s9795_s27 + $0xdd8] sm:$0xff] }
 0x34f   : > { %v6805_v58 = vadd.f32 %v6804_v54, %v6764_v53  ;;  %v6766_v59 = vadd.f32 %v6765_v55, %v10175_v56  ;;  %v8707_v53 = vcombine.low %v789_v21, %v797_v22  ;;  %v8709_v54 = vcombine.low %v790_v23, %v798_v24  ;;  %v741_v21 = vld [vmem:[%s9795_s27 + $0xc90] sm:$0xff]  ;;  %v742_v23 = vld [vmem:[%s9795_s27 + $0xc98] sm:$0xff] }
 0x350   : > { %v6767_v0 = vpop.f32.mrf.mxu0  ;;  %v6808_v6 = vpop.f32.mrf.mxu1  ;;  %v8692_v55 = vcombine.high %v773_v45, %v781_v46  ;;  %v749_v22 = vld [vmem:[%s9795_s27 + $0xcd0] sm:$0xff]  ;;  %v750_v24 = vld [vmem:[%s9795_s27 + $0xcd8] sm:$0xff] }
 0x351   : > { %v7795_v4 = vrot.slane %v6805_v58, 4  ;;  %v6807_v5 = vadd.f32 %v6806_v60, %v6766_v59  ;;  %v8694_v60 = vcombine.high %v774_v47, %v782_v50  ;;  %v766_v6 = vld [vmem:[%s9795_s27 + $0xd58] sm:$0xff] }
 0x352   : > { %v6768_v57 = vpop.f32.mrf.mxu0  ;;  %v6809_v9 = vpop.f32.mrf.mxu1 }
 0x353   : > { %v7796_v8 = vadd.f32 %v7795_v4, %v6805_v58  ;;  %v7801_v56 = vrot.slane %v6807_v5, 4  ;;  %v765_v4 = vld [vmem:[%s9795_s27 + $0xd50] sm:$0xff] }
 0x355   : > { %v7797_v11 = vrot.slane %v7796_v8, 2  ;;  %v7802_v13 = vadd.f32 %v7801_v56, %v6807_v5  ;;  %6912 = vmatpush2.bf16.xpose.msra.mxu0 %v8739_v7  ;;  %6953 = vmatpush2.bf16.xpose.msra.mxu1 %v8741_v3  ;;  %v8691_v3 = vcombine.low %v773_v45, %v781_v46  ;;  %v726_v45 = vld [vmem:[%s9795_s27 + $0xc18] sm:$0xff] }
 0x356   : > { %6913 = vmatprep.subr.bf16.mxu0 %v8724_v62  ;;  %6954 = vmatprep.subr.bf16.mxu1 %v8726_v10  ;;  %v8693_v62 = vcombine.low %v774_v47, %v782_v50  ;;  %v734_v46 = vld [vmem:[%s9795_s27 + $0xc58] sm:$0xff]  ;;  %v8659_v50 = vcombine.low %v741_v21, %v749_v22 }
 0x357   : > { %v7798_v15 = vadd.f32 %v7797_v11, %v7796_v8  ;;  %v7803_v18 = vrot.slane %v7802_v13, 2  ;;  %v8676_v8 = vcombine.high %v757_v2, %v765_v4 }
 0x359   : > { %v7799_v25 = vrot.slane %v7798_v15, 1  ;;  %v7804_v30 = vadd.f32 %v7803_v18, %v7802_v13 }
 0x35b   : > { %v7800_v36 = vadd.f32 %v7799_v25, %v7798_v15  ;;  %v7805_v37 = vrot.slane %v7804_v30, 1 }
 0x35d   : > { %v7843_v40 = vmul.f32 0.125, %v7800_v36  ;;  %v7806_v41 = vadd.f32 %v7805_v37, %v7804_v30  ;;  %6914 = vmatpush2.bf16.xpose.msra.mxu0 %v8723_v31  ;;  %6955 = vmatpush2.bf16.xpose.msra.mxu1 %v8725_v32  ;;  %v7941_v30 = vlaneseq  ;;  %v8675_v32 = vcombine.low %v757_v2, %v765_v4  ;;  %v712_v2 = vld [vmem:[%s9795_s27 + $0xba8] sm:$0xff] }
 0x35e   : > { %6915 = vmatprep.subr.bf16.mxu0 %v8708_v33  ;;  %6956 = vmatprep.subr.bf16.mxu1 %v8710_v39  ;;  %v8660_v36 = vcombine.high %v741_v21, %v749_v22  ;;  %v8662_v39 = vcombine.high %v742_v23, %v750_v24  ;;  %v720_v4 = vld [vmem:[%s9795_s27 + $0xbe8] sm:$0xff]  ;;  %v695_v21 = vld [vmem:[%s9795_s27 + $0xb20] sm:$0xff] }
 0x35f   : > { %v10251_v43 = vsub.f32 %v6805_v58, %v7843_v40  ;;  %v7844_v44 = vmul.f32 0.125, %v7806_v41  ;;  %v10271_v40 = vshrl.u32 %v7941_v30, 7  ;;  %v725_v41 = vld [vmem:[%s9795_s27 + $0xc10] sm:$0xff]  ;;  %v703_v22 = vld [vmem:[%s9795_s27 + $0xb60] sm:$0xff] }
 0x361   : > { %v7859_v51 = vmul.f32 %v10251_v43, %v10251_v43  ;;  %v10259_v52 = vsub.f32 %v6807_v5, %v7844_v44  ;;  %v758_v5 = vld [vmem:[%s9795_s27 + $0xd18] sm:$0xff]  ;;  %v733_v44 = vld [vmem:[%s9795_s27 + $0xc50] sm:$0xff]  ;;  %v10278_v47 = vsub.s32 0, %v10271_v40 }
 0x362   : > { %v8678_v10 = vcombine.high %v758_v5, %v766_v6  ;;  %v8677_v33 = vcombine.low %v758_v5, %v766_v6  ;;  %v8643_v6 = vcombine.low %v725_v41, %v733_v44 }
 0x363   : > { %v7867_v58 = vrot.slane %v7859_v51, 4  ;;  %v7860_v59 = vmul.f32 %v10259_v52, %v10259_v52 }
 0x365   : > { %v7868_v61 = vadd.f32 %v7867_v58, %v7859_v51  ;;  %v7873_v63 = vrot.slane %v7860_v59, 4  ;;  %6916 = vmatpush2.bf16.xpose.msra.mxu0 %v8707_v53  ;;  %6957 = vmatpush2.bf16.xpose.msra.mxu1 %v8709_v54  ;;  %v7939_v51 = vld [vmem:[%s9802_s23] sm:$0xff]  ;;  %v8661_v53 = vcombine.low %v742_v23, %v750_v24  ;;  %v8644_v54 = vcombine.high %v725_v41, %v733_v44 }
 0x366   : > { %6917 = vmatprep.subr.bf16.mxu0 %v8692_v55  ;;  %6958 = vmatprep.subr.bf16.mxu1 %v8694_v60  ;;  %v7947_v55 = vsub.s32 1, %v10271_v40  ;;  %v8646_v58 = vcombine.high %v726_v45, %v734_v46  ;;  %v696_v23 = vld [vmem:[%s9795_s27 + $0xb28] sm:$0xff]  ;;  %v8615_v44 = vcombine.low %v695_v21, %v703_v22 }
 0x367   : > { %v7869_v0 = vrot.slane %v7868_v61, 2  ;;  %v7874_v1 = vadd.f32 %v7873_v63, %v7860_v59  ;;  %v7944_v59 = vrot.slane %v7939_v51, %v10278_v47  ;;  %v719_v63 = vld [vmem:[%s9795_s27 + $0xbe0] sm:$0xff]  ;;  %v704_v24 = vld [vmem:[%s9795_s27 + $0xb68] sm:$0xff] }
 0x368   : > { %v7948_v60 = vrot.slane %v7939_v51, %v7947_v55  ;;  %v688_v41 = vld [vmem:[%s9795_s27 + $0xae8] sm:$0xff]  ;;  %v663_v51 = vld [vmem:[%s9795_s27 + $0xa20] sm:$0xff] }
 0x369   : > { %v7870_v7 = vadd.f32 %v7869_v0, %v7868_v61  ;;  %v7875_v57 = vrot.slane %v7874_v1, 2  ;;  %v711_v61 = vld [vmem:[%s9795_s27 + $0xba0] sm:$0xff] }
 0x36b   : > { %v7871_v56 = vrot.slane %v7870_v7, 1  ;;  %v7876_v9 = vadd.f32 %v7875_v57, %v7874_v1  ;;  %v8029_v1 = vld [vmem:[%s9805_s12] sm:$0xff]  ;;  %v8645_v57 = vcombine.low %v726_v45, %v734_v46  ;;  %v8617_v45 = vcombine.low %v696_v23, %v704_v24 }
 0x36d   : > { %v7872_v11 = vadd.f32 %v7871_v56, %v7870_v7  ;;  %v7877_v13 = vrot.slane %v7876_v9, 1  ;;  %6918 = vmatpush2.bf16.xpose.msra.mxu0 %v8691_v3  ;;  %6959 = vmatpush2.bf16.xpose.msra.mxu1 %v8693_v62  ;;  %v8632_v3 = vcombine.high %v711_v61, %v719_v63 }
 0x36e   : > { %6919 = vmatprep.subr.bf16.mxu0 %v8676_v8  ;;  %6960 = vmatprep.subr.bf16.mxu1 %v8678_v10  ;;  %v8034_v8 = vrot.slane %v8029_v1, %v10278_v47 }
 0x36f   : > { %v7915_v15 = vmul.f32 0.125, %v7872_v11  ;;  %v7878_v18 = vadd.f32 %v7877_v13, %v7876_v9  ;;  %v8634_v9 = vcombine.high %v712_v2, %v720_v4  ;;  %v8038_v13 = vrot.slane %v8029_v1, %v7947_v55  ;;  %v672_v55 = vld [vmem:[%s9795_s27 + $0xa68] sm:$0xff] }
 0x370   : > { %v648_v1 = vld [vmem:[%s9795_s27 + $0x9a8] sm:$0xff] }
 0x371   : > { %v7923_v25 = vadd.f32 1e-05, %v7915_v15  ;;  %v7916_v31 = vmul.f32 0.125, %v7878_v18 }
 0x373   : > { %9358 = vrsqrt.f32 %v7923_v25  ;;  %v7924_v37 = vadd.f32 1e-05, %v7916_v31  ;;  %v8631_v31 = vcombine.low %v711_v61, %v719_v63  ;;  %v647_v63 = vld [vmem:[%s9795_s27 + $0x9a0] sm:$0xff] }
 0x375   : > { %9360 = vrsqrt.f32 %v7924_v37  ;;  %6920 = vmatpush2.bf16.xpose.msra.mxu0 %v8675_v32  ;;  %6961 = vmatpush2.bf16.xpose.msra.mxu1 %v8677_v33  ;;  %v8616_v32 = vcombine.high %v695_v21, %v703_v22  ;;  %v8618_v33 = vcombine.high %v696_v23, %v704_v24  ;;  %v687_v37 = vld [vmem:[%s9795_s27 + $0xae0] sm:$0xff]  ;;  %v624_v21 = vld [vmem:[%s9795_s27 + $0x8e8] sm:$0xff] }
 0x376   : > { %6921 = vmatprep.subr.bf16.mxu0 %v8660_v36  ;;  %6962 = vmatprep.subr.bf16.mxu1 %v8662_v39  ;;  %v679_v36 = vld [vmem:[%s9795_s27 + $0xaa0] sm:$0xff]  ;;  %v680_v39 = vld [vmem:[%s9795_s27 + $0xaa8] sm:$0xff] }
 0x377   : > { %v8600_v46 = vcombine.high %v679_v36, %v687_v37 }
 0x37d   : > { %6922 = vmatpush2.bf16.xpose.msra.mxu0 %v8659_v50  ;;  %6963 = vmatpush2.bf16.xpose.msra.mxu1 %v8661_v53  ;;  %v8602_v50 = vcombine.high %v680_v39, %v688_v41  ;;  %v671_v53 = vld [vmem:[%s9795_s27 + $0xa60] sm:$0xff] }
 0x37e   : > { %6923 = vmatprep.subr.bf16.mxu0 %v8644_v54  ;;  %6964 = vmatprep.subr.bf16.mxu1 %v8646_v58  ;;  %v664_v54 = vld [vmem:[%s9795_s27 + $0xa28] sm:$0xff]  ;;  %v8599_v58 = vcombine.low %v679_v36, %v687_v37 }
 0x37f   : > { %v8586_v61 = vcombine.high %v664_v54, %v672_v55 }
 0x380   : > { %v9359_v0 = vpop.eup %9358 }
 0x381   : > { %v7981_v5 = vmul.f32 %v9359_v0, %v7944_v59  ;;  %v8601_v59 = vcombine.low %v680_v39, %v688_v41  ;;  %v655_v0 = vld [vmem:[%s9795_s27 + $0x9e0] sm:$0xff] }
 0x382   : > { %v9361_v7 = vpop.eup %9360  ;;  %v839_v39 = vld [vmem:[%s9795_s27 + $0xfa0] sm:$0xff] }
 0x383   : > { %v7992_v62 = vrot.slane %v7981_v5, %v10278_v47  ;;  %v7982_v56 = vmul.f32 %v9361_v7, %v7948_v60  ;;  %v8584_v60 = vcombine.high %v663_v51, %v671_v53  ;;  %v8585_v5 = vcombine.low %v664_v54, %v672_v55  ;;  %v847_v41 = vld [vmem:[%s9795_s27 + $0xfe0] sm:$0xff] }
 0x384   : > { %v823_v54 = vld [vmem:[%s9795_s27 + $0xf20] sm:$0xff] }
 0x385   : > { %v8021_v10 = vmul.f32 %v7992_v62, %v10251_v43  ;;  %v7996_v11 = vrot.slane %v7982_v56, %v10278_v47  ;;  %6924 = vmatpush2.bf16.xpose.msra.mxu0 %v8643_v6  ;;  %6965 = vmatpush2.bf16.xpose.msra.mxu1 %v8645_v57  ;;  %v8633_v43 = vcombine.low %v712_v2, %v720_v4  ;;  %v656_v2 = vld [vmem:[%s9795_s27 + $0x9e8] sm:$0xff]  ;;  %v631_v57 = vld [vmem:[%s9795_s27 + $0x920] sm:$0xff] }
 0x386   : > { %6975 = vmatprep.subr.bf16.mxu0 %v8632_v3  ;;  %7016 = vmatprep.subr.bf16.mxu1 %v8634_v9  ;;  %v8583_v4 = vcombine.low %v663_v51, %v671_v53  ;;  %v8568_v6 = vcombine.high %v647_v63, %v655_v0  ;;  %v8570_v7 = vcombine.high %v648_v1, %v656_v2  ;;  %v639_v3 = vld [vmem:[%s9795_s27 + $0x960] sm:$0xff]  ;;  %v632_v62 = vld [vmem:[%s9795_s27 + $0x928] sm:$0xff] }
 0x387   : > { %v8071_v15 = vadd.f32 %v8034_v8, %v8021_v10  ;;  %v8022_v18 = vmul.f32 %v7996_v11, %v10259_v52  ;;  %v640_v8 = vld [vmem:[%s9795_s27 + $0x968] sm:$0xff]  ;;  %v8567_v56 = vcombine.low %v647_v63, %v655_v0  ;;  %v8569_v9 = vcombine.low %v648_v1, %v656_v2  ;;  %v831_v55 = vld [vmem:[%s9795_s27 + $0xf60] sm:$0xff] }
 0x388   : > { %v8552_v10 = vcombine.high %v631_v57, %v639_v3  ;;  %v8554_v11 = vcombine.high %v632_v62, %v640_v8  ;;  %v8551_v22 = vcombine.low %v631_v57, %v639_v3  ;;  %v8553_v23 = vcombine.low %v632_v62, %v640_v8  ;;  %v815_v57 = vld [vmem:[%s9795_s27 + $0xee0] sm:$0xff]  ;;  %v808_v8 = vld [vmem:[%s9795_s27 + $0xea8] sm:$0xff] }
 0x389   : > { %v8079_v25 = vmax.f32 %v8071_v15, 0.0  ;;  %v8072_v30 = vadd.f32 %v8038_v13, %v8022_v18  ;;  %v615_v13 = vld [vmem:[%s9795_s27 + $0x8a0] sm:$0xff]  ;;  %v616_v18 = vld [vmem:[%s9795_s27 + $0x8a8] sm:$0xff]  ;;  %v8760_v51 = vcombine.high %v839_v39, %v847_v41  ;;  %v8744_v63 = vcombine.high %v823_v54, %v831_v55 }
 0x38a   : > { %v623_v15 = vld [vmem:[%s9795_s27 + $0x8e0] sm:$0xff] }
 0x38b   : > { %8087 = vst [vmem:[%s10298_s20] sm:$0xff] %v8079_v25  ;;  %v8080_v52 = vmax.f32 %v8072_v30, 0.0  ;;  %v8536_v24 = vcombine.high %v615_v13, %v623_v15  ;;  %v8538_v25 = vcombine.high %v616_v18, %v624_v21  ;;  %v599_v30 = vld [vmem:[%s9795_s27 + $0x820] sm:$0xff] }
 0x38c   : > { %6926 = vmatmul.mubr.bf16.vlgmr.msra.gmra.mxu0 %v9963_v38  ;;  %6967 = vmatmul.mubr.bf16.vlgmr.msra.gmra.mxu1 %v9967_v42 }
 0x38d   : > { %8088 = vst [vmem:[%s10298_s20 + $0x8] sm:$0xff] %v8080_v52  ;;  %6976 = vmatpush1.bf16.xpose.msra.mxu0 %v8631_v31  ;;  %7017 = vmatpush1.bf16.xpose.msra.mxu1 %v8633_v43  ;;  %v607_v31 = vld [vmem:[%s9795_s27 + $0x860] sm:$0xff]  ;;  %v600_v43 = vld [vmem:[%s9795_s27 + $0x828] sm:$0xff]  ;;  %v8535_v52 = vcombine.low %v615_v13, %v623_v15 }
 0x38e   : > { %6977 = vmatprep.subr.bf16.mxu0 %v8616_v32  ;;  %7018 = vmatprep.subr.bf16.mxu1 %v8618_v33  ;;  %v608_v32 = vld [vmem:[%s9795_s27 + $0x868] sm:$0xff]  ;;  %v8537_v33 = vcombine.low %v616_v18, %v624_v21  ;;  %v8520_v36 = vcombine.high %v599_v30, %v607_v31 }
 0x38f   : > { %7007 = vmatprep.mubr.bf16.mxu0 %v9969_v48  ;;  %7048 = vmatprep.mubr.bf16.mxu1 %v9972_v49  ;;  %v8522_v37 = vcombine.high %v600_v43, %v608_v32 }
 0x395   : > { %6978 = vmatpush1.bf16.xpose.msra.mxu0 %v8615_v44  ;;  %7019 = vmatpush1.bf16.xpose.msra.mxu1 %v8617_v45  ;;  %v840_v44 = vld [vmem:[%s9795_s27 + $0xfa8] sm:$0xff] }
 0x396   : > { %6979 = vmatprep.subr.bf16.mxu0 %v8600_v46  ;;  %7020 = vmatprep.subr.bf16.mxu1 %v8602_v50  ;;  %v848_v45 = vld [vmem:[%s9795_s27 + $0xfe8] sm:$0xff]  ;;  %v8519_v46 = vcombine.low %v599_v30, %v607_v31  ;;  %v8521_v50 = vcombine.low %v600_v43, %v608_v32 }
 0x397   : > { %v8762_v53 = vcombine.high %v840_v44, %v848_v45 }
 0x39d   : > { %6980 = vmatpush1.bf16.xpose.msra.mxu0 %v8599_v58  ;;  %7021 = vmatpush1.bf16.xpose.msra.mxu1 %v8601_v59  ;;  %v824_v58 = vld [vmem:[%s9795_s27 + $0xf28] sm:$0xff] }
 0x39e   : > { %6981 = vmatprep.subr.bf16.mxu0 %v8584_v60  ;;  %7022 = vmatprep.subr.bf16.mxu1 %v8586_v61  ;;  %v832_v59 = vld [vmem:[%s9795_s27 + $0xf68] sm:$0xff]  ;;  %v8759_v60 = vcombine.low %v839_v39, %v847_v41  ;;  %v8761_v61 = vcombine.low %v840_v44, %v848_v45 }
 0x39f   : > { %v8746_v0 = vcombine.high %v824_v58, %v832_v59  ;;  %v8745_v13 = vcombine.low %v824_v58, %v832_v59 }
 0x3a5   : > { %6982 = vmatpush1.bf16.xpose.msra.mxu0 %v8583_v4  ;;  %7023 = vmatpush1.bf16.xpose.msra.mxu1 %v8585_v5 }
 0x3a6   : > { %6983 = vmatprep.subr.bf16.mxu0 %v8568_v6  ;;  %7024 = vmatprep.subr.bf16.mxu1 %v8570_v7  ;;  %v807_v7 = vld [vmem:[%s9795_s27 + $0xea0] sm:$0xff] }
 0x3a7   : > { %v8728_v15 = vcombine.high %v807_v7, %v815_v57  ;;  %v8727_v30 = vcombine.low %v807_v7, %v815_v57  ;;  %v727_v7 = vld [vmem:[%s9795_s27 + $0xc20] sm:$0xff] }
 0x3a8   : > { %v735_v57 = vld [vmem:[%s9795_s27 + $0xc60] sm:$0xff] }
 0x3ad   : > { %6984 = vmatpush1.bf16.xpose.msra.mxu0 %v8567_v56  ;;  %7025 = vmatpush1.bf16.xpose.msra.mxu1 %v8569_v9  ;;  %v816_v56 = vld [vmem:[%s9795_s27 + $0xee8] sm:$0xff] }
 0x3ae   : > { %6985 = vmatprep.subr.bf16.mxu0 %v8552_v10  ;;  %7026 = vmatprep.subr.bf16.mxu1 %v8554_v11  ;;  %v8743_v10 = vcombine.low %v823_v54, %v831_v55  ;;  %v8730_v21 = vcombine.high %v808_v8, %v816_v56  ;;  %v8729_v31 = vcombine.low %v808_v8, %v816_v56  ;;  %v736_v8 = vld [vmem:[%s9795_s27 + $0xc68] sm:$0xff] }
 0x3b5   : > { %6986 = vmatpush1.bf16.xpose.msra.mxu0 %v8551_v22  ;;  %7027 = vmatpush1.bf16.xpose.msra.mxu1 %v8553_v23  ;;  %v791_v22 = vld [vmem:[%s9795_s27 + $0xe20] sm:$0xff] }
 0x3b6   : > { %6987 = vmatprep.subr.bf16.mxu0 %v8536_v24  ;;  %7028 = vmatprep.subr.bf16.mxu1 %v8538_v25  ;;  %v799_v23 = vld [vmem:[%s9795_s27 + $0xe60] sm:$0xff]  ;;  %v792_v24 = vld [vmem:[%s9795_s27 + $0xe28] sm:$0xff] }
 0x3b7   : > { %v800_v25 = vld [vmem:[%s9795_s27 + $0xe68] sm:$0xff]  ;;  %v8712_v43 = vcombine.high %v791_v22, %v799_v23  ;;  %v8711_v39 = vcombine.low %v791_v22, %v799_v23  ;;  %v8647_v22 = vcombine.low %v727_v7, %v735_v57 }
 0x3b8   : > { %v8714_v32 = vcombine.high %v792_v24, %v800_v25  ;;  %v8713_v41 = vcombine.low %v792_v24, %v800_v25 }
 0x3bd   : > { %6988 = vmatpush1.bf16.xpose.msra.mxu0 %v8535_v52  ;;  %7029 = vmatpush1.bf16.xpose.msra.mxu1 %v8537_v33  ;;  %v775_v52 = vld [vmem:[%s9795_s27 + $0xda0] sm:$0xff] }
 0x3be   : > { %6989 = vmatprep.subr.bf16.mxu0 %v8520_v36  ;;  %7030 = vmatprep.subr.bf16.mxu1 %v8522_v37  ;;  %v783_v33 = vld [vmem:[%s9795_s27 + $0xde0] sm:$0xff]  ;;  %v776_v36 = vld [vmem:[%s9795_s27 + $0xda8] sm:$0xff] }
 0x3bf   : > { %v784_v37 = vld [vmem:[%s9795_s27 + $0xde8] sm:$0xff]  ;;  %v8696_v44 = vcombine.high %v775_v52, %v783_v33  ;;  %v8695_v54 = vcombine.low %v775_v52, %v783_v33 }
 0x3c0   : > { %v8698_v45 = vcombine.high %v776_v36, %v784_v37  ;;  %v8697_v55 = vcombine.low %v776_v36, %v784_v37 }
 0x3c5   : > { %6990 = vmatpush1.bf16.xpose.msra.mxu0 %v8519_v46  ;;  %7031 = vmatpush1.bf16.xpose.msra.mxu1 %v8521_v50  ;;  %v759_v46 = vld [vmem:[%s9795_s27 + $0xd20] sm:$0xff] }
 0x3c6   : > { %6991 = vmatprep.subr.bf16.mxu0 %v8760_v51  ;;  %7032 = vmatprep.subr.bf16.mxu1 %v8762_v53  ;;  %v767_v50 = vld [vmem:[%s9795_s27 + $0xd60] sm:$0xff]  ;;  %v760_v51 = vld [vmem:[%s9795_s27 + $0xd28] sm:$0xff] }
 0x3c7   : > { %v768_v53 = vld [vmem:[%s9795_s27 + $0xd68] sm:$0xff]  ;;  %v8680_v58 = vcombine.high %v759_v46, %v767_v50 }
 0x3c8   : > { %v8682_v59 = vcombine.high %v760_v51, %v768_v53 }
 0x3cc   : > { %v6845_v1 = vpop.f32.mrf.mxu0  ;;  %v6886_v2 = vpop.f32.mrf.mxu1 }
 0x3cd   : > { %6992 = vmatpush2.bf16.xpose.msra.mxu0 %v8759_v60  ;;  %v10338_v4 = vadd.f32 %v6886_v2, %v6845_v1  ;;  %7033 = vmatpush2.bf16.xpose.msra.mxu1 %v8761_v61  ;;  %v743_v60 = vld [vmem:[%s9795_s27 + $0xca0] sm:$0xff]  ;;  %v8679_v1 = vcombine.low %v759_v46, %v767_v50  ;;  %v8681_v2 = vcombine.low %v760_v51, %v768_v53 }
 0x3ce   : > { %v6847_v5 = vpop.f32.mrf.mxu0  ;;  %6993 = vmatprep.subr.bf16.mxu0 %v8744_v63  ;;  %v6888_v6 = vpop.f32.mrf.mxu1  ;;  %7034 = vmatprep.subr.bf16.mxu1 %v8746_v0  ;;  %v751_v61 = vld [vmem:[%s9795_s27 + $0xce0] sm:$0xff]  ;;  %v744_v63 = vld [vmem:[%s9795_s27 + $0xca8] sm:$0xff] }
 0x3cf   : > { %v10342_v3 = vadd.f32 %v6888_v6, %v6847_v5  ;;  %v752_v0 = vld [vmem:[%s9795_s27 + $0xce8] sm:$0xff]  ;;  %v8664_v5 = vcombine.high %v743_v60, %v751_v61  ;;  %v8663_v56 = vcombine.low %v743_v60, %v751_v61 }
 0x3d0   : > { %v6849_v62 = vpop.f32.mrf.mxu0  ;;  %v6890_v9 = vpop.f32.mrf.mxu1  ;;  %v8666_v6 = vcombine.high %v744_v63, %v752_v0 }
 0x3d1   : > { %v728_v62 = vld [vmem:[%s9795_s27 + $0xc28] sm:$0xff]  ;;  %v8665_v9 = vcombine.low %v744_v63, %v752_v0 }
 0x3d2   : > { %v6850_v11 = vpop.f32.mrf.mxu0  ;;  %v6891_v18 = vpop.f32.mrf.mxu1  ;;  %v8649_v23 = vcombine.low %v728_v62, %v736_v8 }
 0x3d3   : > { %v8650_v11 = vcombine.high %v728_v62, %v736_v8  ;;  %v714_v18 = vld [vmem:[%s9795_s27 + $0xbb8] sm:$0xff] }
 0x3d5   : > { %6994 = vmatpush2.bf16.xpose.msra.mxu0 %v8743_v10  ;;  %7035 = vmatpush2.bf16.xpose.msra.mxu1 %v8745_v13  ;;  %v8648_v10 = vcombine.high %v727_v7, %v735_v57  ;;  %v713_v13 = vld [vmem:[%s9795_s27 + $0xbb0] sm:$0xff] }
 0x3d6   : > { %6995 = vmatprep.subr.bf16.mxu0 %v8728_v15  ;;  %7036 = vmatprep.subr.bf16.mxu1 %v8730_v21  ;;  %v721_v15 = vld [vmem:[%s9795_s27 + $0xbf0] sm:$0xff]  ;;  %v722_v21 = vld [vmem:[%s9795_s27 + $0xbf8] sm:$0xff] }
 0x3d7   : > { %v8636_v24 = vcombine.high %v713_v13, %v721_v15  ;;  %v8638_v25 = vcombine.high %v714_v18, %v722_v21  ;;  %v8635_v52 = vcombine.low %v713_v13, %v721_v15  ;;  %v8637_v33 = vcombine.low %v714_v18, %v722_v21 }
 0x3dd   : > { %6996 = vmatpush2.bf16.xpose.msra.mxu0 %v8727_v30  ;;  %7037 = vmatpush2.bf16.xpose.msra.mxu1 %v8729_v31  ;;  %v697_v30 = vld [vmem:[%s9795_s27 + $0xb30] sm:$0xff] }
 0x3de   : > { %6997 = vmatprep.subr.bf16.mxu0 %v8712_v43  ;;  %7038 = vmatprep.subr.bf16.mxu1 %v8714_v32  ;;  %v705_v31 = vld [vmem:[%s9795_s27 + $0xb70] sm:$0xff]  ;;  %v698_v43 = vld [vmem:[%s9795_s27 + $0xb38] sm:$0xff] }
 0x3df   : > { %v706_v32 = vld [vmem:[%s9795_s27 + $0xb78] sm:$0xff]  ;;  %v8620_v36 = vcombine.high %v697_v30, %v705_v31  ;;  %v8619_v46 = vcombine.low %v697_v30, %v705_v31 }
 0x3e0   : > { %v8622_v37 = vcombine.high %v698_v43, %v706_v32  ;;  %v8621_v50 = vcombine.low %v698_v43, %v706_v32 }
 0x3e5   : > { %6998 = vmatpush2.bf16.xpose.msra.mxu0 %v8711_v39  ;;  %7039 = vmatpush2.bf16.xpose.msra.mxu1 %v8713_v41  ;;  %v681_v39 = vld [vmem:[%s9795_s27 + $0xab0] sm:$0xff] }
 0x3e6   : > { %6999 = vmatprep.subr.bf16.mxu0 %v8696_v44  ;;  %7040 = vmatprep.subr.bf16.mxu1 %v8698_v45  ;;  %v689_v41 = vld [vmem:[%s9795_s27 + $0xaf0] sm:$0xff]  ;;  %v682_v44 = vld [vmem:[%s9795_s27 + $0xab8] sm:$0xff] }
 0x3e7   : > { %v690_v45 = vld [vmem:[%s9795_s27 + $0xaf8] sm:$0xff]  ;;  %v8604_v51 = vcombine.high %v681_v39, %v689_v41  ;;  %v8603_v60 = vcombine.low %v681_v39, %v689_v41 }
 0x3e8   : > { %v8606_v53 = vcombine.high %v682_v44, %v690_v45  ;;  %v8605_v61 = vcombine.low %v682_v44, %v690_v45 }
 0x3ed   : > { %7000 = vmatpush2.bf16.xpose.msra.mxu0 %v8695_v54  ;;  %7041 = vmatpush2.bf16.xpose.msra.mxu1 %v8697_v55  ;;  %v665_v54 = vld [vmem:[%s9795_s27 + $0xa30] sm:$0xff] }
 0x3ee   : > { %7001 = vmatprep.subr.bf16.mxu0 %v8680_v58  ;;  %7042 = vmatprep.subr.bf16.mxu1 %v8682_v59  ;;  %v673_v55 = vld [vmem:[%s9795_s27 + $0xa70] sm:$0xff]  ;;  %v666_v58 = vld [vmem:[%s9795_s27 + $0xa38] sm:$0xff] }
 0x3ef   : > { %v674_v59 = vld [vmem:[%s9795_s27 + $0xa78] sm:$0xff]  ;;  %v8588_v63 = vcombine.high %v665_v54, %v673_v55  ;;  %v8587_v7 = vcombine.low %v665_v54, %v673_v55 }
 0x3f0   : > { %v8590_v0 = vcombine.high %v666_v58, %v674_v59  ;;  %v8589_v57 = vcombine.low %v666_v58, %v674_v59 }
 0x3f5   : > { %7002 = vmatpush2.bf16.xpose.msra.mxu0 %v8679_v1  ;;  %7043 = vmatpush2.bf16.xpose.msra.mxu1 %v8681_v2  ;;  %v649_v1 = vld [vmem:[%s9795_s27 + $0x9b0] sm:$0xff] }
 0x3f6   : > { %7003 = vmatprep.subr.bf16.mxu0 %v8664_v5  ;;  %7044 = vmatprep.subr.bf16.mxu1 %v8666_v6  ;;  %v657_v2 = vld [vmem:[%s9795_s27 + $0x9f0] sm:$0xff]  ;;  %v650_v5 = vld [vmem:[%s9795_s27 + $0x9b8] sm:$0xff] }
 0x3f7   : > { %v658_v6 = vld [vmem:[%s9795_s27 + $0x9f8] sm:$0xff]  ;;  %v8572_v62 = vcombine.high %v649_v1, %v657_v2  ;;  %v8571_v13 = vcombine.low %v649_v1, %v657_v2 }
 0x3f8   : > { %v8574_v8 = vcombine.high %v650_v5, %v658_v6  ;;  %v8573_v15 = vcombine.low %v650_v5, %v658_v6 }
 0x3fd   : > { %7004 = vmatpush2.bf16.xpose.msra.mxu0 %v8663_v56  ;;  %7045 = vmatpush2.bf16.xpose.msra.mxu1 %v8665_v9  ;;  %v633_v56 = vld [vmem:[%s9795_s27 + $0x930] sm:$0xff] }
 0x3fe   : > { %7005 = vmatprep.subr.bf16.mxu0 %v8648_v10  ;;  %7046 = vmatprep.subr.bf16.mxu1 %v8650_v11  ;;  %v641_v9 = vld [vmem:[%s9795_s27 + $0x970] sm:$0xff]  ;;  %v634_v10 = vld [vmem:[%s9795_s27 + $0x938] sm:$0xff] }
 0x3ff   : > { %v642_v11 = vld [vmem:[%s9795_s27 + $0x978] sm:$0xff]  ;;  %v8556_v18 = vcombine.high %v633_v56, %v641_v9  ;;  %v8555_v30 = vcombine.low %v633_v56, %v641_v9 }
 0x400   : > { %v8558_v21 = vcombine.high %v634_v10, %v642_v11  ;;  %v8557_v31 = vcombine.low %v634_v10, %v642_v11  ;;  %v809_v11 = vld [vmem:[%s9795_s27 + $0xeb0] sm:$0xff] }
 0x405   : > { %7006 = vmatpush2.bf16.xpose.msra.mxu0 %v8647_v22  ;;  %7047 = vmatpush2.bf16.xpose.msra.mxu1 %v8649_v23  ;;  %v617_v22 = vld [vmem:[%s9795_s27 + $0x8b0] sm:$0xff] }
 0x406   : > { %7057 = vmatprep.subr.bf16.mxu0 %v8636_v24  ;;  %7098 = vmatprep.subr.bf16.mxu1 %v8638_v25  ;;  %v625_v23 = vld [vmem:[%s9795_s27 + $0x8f0] sm:$0xff]  ;;  %v618_v24 = vld [vmem:[%s9795_s27 + $0x8b8] sm:$0xff] }
 0x407   : > { %v626_v25 = vld [vmem:[%s9795_s27 + $0x8f8] sm:$0xff]  ;;  %v8540_v43 = vcombine.high %v617_v22, %v625_v23  ;;  %v8539_v39 = vcombine.low %v617_v22, %v625_v23 }
 0x408   : > { %v8542_v32 = vcombine.high %v618_v24, %v626_v25  ;;  %v8541_v41 = vcombine.low %v618_v24, %v626_v25 }
 0x40c   : > { %7008 = vmatmul.mubr.bf16.vlgmr.msra.gmra.mxu0 %v10043_v14  ;;  %7049 = vmatmul.mubr.bf16.vlgmr.msra.gmra.mxu1 %v10047_v19 }
 0x40d   : > { %7058 = vmatpush1.bf16.xpose.msra.mxu0 %v8635_v52  ;;  %7099 = vmatpush1.bf16.xpose.msra.mxu1 %v8637_v33  ;;  %v601_v52 = vld [vmem:[%s9795_s27 + $0x830] sm:$0xff] }
 0x40e   : > { %7059 = vmatprep.subr.bf16.mxu0 %v8620_v36  ;;  %7100 = vmatprep.subr.bf16.mxu1 %v8622_v37  ;;  %v609_v33 = vld [vmem:[%s9795_s27 + $0x870] sm:$0xff]  ;;  %v602_v36 = vld [vmem:[%s9795_s27 + $0x838] sm:$0xff] }
 0x40f   : > { %7089 = vmatprep.mubr.bf16.mxu0 %v10049_v28  ;;  %7130 = vmatprep.mubr.bf16.mxu1 %v10052_v29  ;;  %v610_v37 = vld [vmem:[%s9795_s27 + $0x878] sm:$0xff]  ;;  %v8524_v44 = vcombine.high %v601_v52, %v609_v33  ;;  %v8523_v54 = vcombine.low %v601_v52, %v609_v33 }
 0x410   : > { %v8526_v45 = vcombine.high %v602_v36, %v610_v37  ;;  %v8525_v55 = vcombine.low %v602_v36, %v610_v37  ;;  %v794_v52 = vld [vmem:[%s9795_s27 + $0xe38] sm:$0xff] }
 0x411   : > { %v802_v33 = vld [vmem:[%s9795_s27 + $0xe78] sm:$0xff] }
 0x415   : > { %7060 = vmatpush1.bf16.xpose.msra.mxu0 %v8619_v46  ;;  %7101 = vmatpush1.bf16.xpose.msra.mxu1 %v8621_v50  ;;  %v841_v46 = vld [vmem:[%s9795_s27 + $0xfb0] sm:$0xff] }
 0x416   : > { %7061 = vmatprep.subr.bf16.mxu0 %v8604_v51  ;;  %7102 = vmatprep.subr.bf16.mxu1 %v8606_v53  ;;  %v849_v50 = vld [vmem:[%s9795_s27 + $0xff0] sm:$0xff]  ;;  %v842_v51 = vld [vmem:[%s9795_s27 + $0xfb8] sm:$0xff] }
 0x417   : > { %v850_v53 = vld [vmem:[%s9795_s27 + $0xff8] sm:$0xff]  ;;  %v8764_v58 = vcombine.high %v841_v46, %v849_v50  ;;  %v8763_v1 = vcombine.low %v841_v46, %v849_v50 }
 0x418   : > { %v8766_v59 = vcombine.high %v842_v51, %v850_v53  ;;  %v8765_v2 = vcombine.low %v842_v51, %v850_v53  ;;  %v778_v46 = vld [vmem:[%s9795_s27 + $0xdb8] sm:$0xff]  ;;  %v8717_v53 = vcombine.low %v794_v52, %v802_v33 }
 0x419   : > { %v786_v50 = vld [vmem:[%s9795_s27 + $0xdf8] sm:$0xff] }
 0x41d   : > { %7062 = vmatpush1.bf16.xpose.msra.mxu0 %v8603_v60  ;;  %7103 = vmatpush1.bf16.xpose.msra.mxu1 %v8605_v61  ;;  %v825_v60 = vld [vmem:[%s9795_s27 + $0xf30] sm:$0xff] }
 0x41e   : > { %7063 = vmatprep.subr.bf16.mxu0 %v8588_v63  ;;  %7104 = vmatprep.subr.bf16.mxu1 %v8590_v0  ;;  %v833_v61 = vld [vmem:[%s9795_s27 + $0xf70] sm:$0xff]  ;;  %v826_v63 = vld [vmem:[%s9795_s27 + $0xf38] sm:$0xff] }
 0x41f   : > { %v834_v0 = vld [vmem:[%s9795_s27 + $0xf78] sm:$0xff]  ;;  %v8748_v5 = vcombine.high %v825_v60, %v833_v61  ;;  %v8747_v23 = vcombine.low %v825_v60, %v833_v61 }
 0x420   : > { %v8750_v6 = vcombine.high %v826_v63, %v834_v0  ;;  %v8749_v25 = vcombine.low %v826_v63, %v834_v0  ;;  %v762_v60 = vld [vmem:[%s9795_s27 + $0xd38] sm:$0xff]  ;;  %v8701_v0 = vcombine.low %v778_v46, %v786_v50 }
 0x421   : > { %v770_v61 = vld [vmem:[%s9795_s27 + $0xd78] sm:$0xff] }
 0x425   : > { %7064 = vmatpush1.bf16.xpose.msra.mxu0 %v8587_v7  ;;  %7105 = vmatpush1.bf16.xpose.msra.mxu1 %v8589_v57 }
 0x426   : > { %7065 = vmatprep.subr.bf16.mxu0 %v8572_v62  ;;  %7106 = vmatprep.subr.bf16.mxu1 %v8574_v8 }
 0x42d   : > { %7066 = vmatpush1.bf16.xpose.msra.mxu0 %v8571_v13  ;;  %7107 = vmatpush1.bf16.xpose.msra.mxu1 %v8573_v15  ;;  %v817_v13 = vld [vmem:[%s9795_s27 + $0xef0] sm:$0xff] }
 0x42e   : > { %7067 = vmatprep.subr.bf16.mxu0 %v8556_v18  ;;  %7108 = vmatprep.subr.bf16.mxu1 %v8558_v21  ;;  %v810_v18 = vld [vmem:[%s9795_s27 + $0xeb8] sm:$0xff]  ;;  %v8731_v36 = vcombine.low %v809_v11, %v817_v13 }
 0x42f   : > { %v818_v21 = vld [vmem:[%s9795_s27 + $0xef8] sm:$0xff] }
 0x430   : > { %v8733_v37 = vcombine.low %v810_v18, %v818_v21 }
 0x435   : > { %7068 = vmatpush1.bf16.xpose.msra.mxu0 %v8555_v30  ;;  %7109 = vmatpush1.bf16.xpose.msra.mxu1 %v8557_v31  ;;  %v8732_v30 = vcombine.high %v809_v11, %v817_v13  ;;  %v729_v11 = vld [vmem:[%s9795_s27 + $0xc30] sm:$0xff] }
 0x436   : > { %7069 = vmatprep.subr.bf16.mxu0 %v8540_v43  ;;  %7110 = vmatprep.subr.bf16.mxu1 %v8542_v32  ;;  %v793_v43 = vld [vmem:[%s9795_s27 + $0xe30] sm:$0xff] }
 0x437   : > { %v801_v32 = vld [vmem:[%s9795_s27 + $0xe70] sm:$0xff] }
 0x438   : > { %v8715_v51 = vcombine.low %v793_v43, %v801_v32  ;;  %v737_v13 = vld [vmem:[%s9795_s27 + $0xc70] sm:$0xff] }
 0x43d   : > { %7070 = vmatpush1.bf16.xpose.msra.mxu0 %v8539_v39  ;;  %7111 = vmatpush1.bf16.xpose.msra.mxu1 %v8541_v41  ;;  %v8716_v39 = vcombine.high %v793_v43, %v801_v32  ;;  %v8718_v41 = vcombine.high %v794_v52, %v802_v33  ;;  %v8651_v43 = vcombine.low %v729_v11, %v737_v13 }
 0x43e   : > { %7071 = vmatprep.subr.bf16.mxu0 %v8524_v44  ;;  %7112 = vmatprep.subr.bf16.mxu1 %v8526_v45  ;;  %v777_v44 = vld [vmem:[%s9795_s27 + $0xdb0] sm:$0xff] }
 0x43f   : > { %v785_v45 = vld [vmem:[%s9795_s27 + $0xdf0] sm:$0xff] }
 0x440   : > { %v8699_v63 = vcombine.low %v777_v44, %v785_v45 }
 0x445   : > { %7072 = vmatpush1.bf16.xpose.msra.mxu0 %v8523_v54  ;;  %7113 = vmatpush1.bf16.xpose.msra.mxu1 %v8525_v55  ;;  %v8700_v54 = vcombine.high %v777_v44, %v785_v45  ;;  %v8702_v55 = vcombine.high %v778_v46, %v786_v50 }
 0x446   : > { %7073 = vmatprep.subr.bf16.mxu0 %v8764_v58  ;;  %7114 = vmatprep.subr.bf16.mxu1 %v8766_v59  ;;  %v761_v58 = vld [vmem:[%s9795_s27 + $0xd30] sm:$0xff] }
 0x447   : > { %v769_v59 = vld [vmem:[%s9795_s27 + $0xd70] sm:$0xff] }
 0x44c   : > { %v6927_v7 = vpop.f32.mrf.mxu0  ;;  %v6968_v62 = vpop.f32.mrf.mxu1 }
 0x44d   : > { %v6928_v57 = vadd.f32 %v6927_v7, %v10338_v4  ;;  %7074 = vmatpush2.bf16.xpose.msra.mxu0 %v8763_v1  ;;  %7115 = vmatpush2.bf16.xpose.msra.mxu1 %v8765_v2  ;;  %v8684_v1 = vcombine.high %v761_v58, %v769_v59  ;;  %v8686_v2 = vcombine.high %v762_v60, %v770_v61  ;;  %v746_v7 = vld [vmem:[%s9795_s27 + $0xcb8] sm:$0xff] }
 0x44e   : > { %v6929_v8 = vpop.f32.mrf.mxu0  ;;  %7075 = vmatprep.subr.bf16.mxu0 %v8748_v5  ;;  %v6970_v10 = vpop.f32.mrf.mxu1  ;;  %7116 = vmatprep.subr.bf16.mxu1 %v8750_v6  ;;  %v745_v5 = vld [vmem:[%s9795_s27 + $0xcb0] sm:$0xff] }
 0x44f   : > { %v10411_v56 = vadd.f32 %v6968_v62, %v6928_v57  ;;  %v6930_v9 = vadd.f32 %v6929_v8, %v10342_v3  ;;  %v8734_v3 = vcombine.high %v810_v18, %v818_v21  ;;  %v753_v6 = vld [vmem:[%s9795_s27 + $0xcf0] sm:$0xff]  ;;  %v754_v57 = vld [vmem:[%s9795_s27 + $0xcf8] sm:$0xff]  ;;  %v8683_v62 = vcombine.low %v761_v58, %v769_v59 }
 0x450   : > { %v6931_v15 = vpop.f32.mrf.mxu0  ;;  %v6972_v22 = vpop.f32.mrf.mxu1  ;;  %v8685_v8 = vcombine.low %v762_v60, %v770_v61  ;;  %v738_v18 = vld [vmem:[%s9795_s27 + $0xc78] sm:$0xff]  ;;  %v8667_v21 = vcombine.low %v745_v5, %v753_v6 }
 0x451   : > { %v10418_v4 = vadd.f32 %v6970_v10, %v6930_v9  ;;  %v8668_v9 = vcombine.high %v745_v5, %v753_v6  ;;  %v8670_v10 = vcombine.high %v746_v7, %v754_v57  ;;  %v730_v15 = vld [vmem:[%s9795_s27 + $0xc38] sm:$0xff]  ;;  %v8669_v22 = vcombine.low %v746_v7, %v754_v57 }
 0x452   : > { %v6932_v24 = vpop.f32.mrf.mxu0  ;;  %v6973_v31 = vpop.f32.mrf.mxu1  ;;  %v8653_v32 = vcombine.low %v730_v15, %v738_v18 }
 0x453   : > { %v8654_v24 = vcombine.high %v730_v15, %v738_v18  ;;  %v964_v31 = vld [vmem:[%s9795_s27 + $0x1388] sm:$0xff] }
 0x455   : > { %7076 = vmatpush2.bf16.xpose.msra.mxu0 %v8747_v23  ;;  %7117 = vmatpush2.bf16.xpose.msra.mxu1 %v8749_v25  ;;  %v8652_v23 = vcombine.high %v729_v11, %v737_v13  ;;  %v963_v25 = vld [vmem:[%s9795_s27 + $0x1380] sm:$0xff] }
 0x456   : > { %7077 = vmatprep.subr.bf16.mxu0 %v8732_v30  ;;  %7118 = vmatprep.subr.bf16.mxu1 %v8734_v3  ;;  %v971_v30 = vld [vmem:[%s9795_s27 + $0x13c0] sm:$0xff]  ;;  %v972_v3 = vld [vmem:[%s9795_s27 + $0x13c8] sm:$0xff] }
 0x457   : > { %v8880_v52 = vcombine.high %v963_v25, %v971_v30  ;;  %v8882_v33 = vcombine.high %v964_v31, %v972_v3  ;;  %v8879_v44 = vcombine.low %v963_v25, %v971_v30  ;;  %v8881_v45 = vcombine.low %v964_v31, %v972_v3 }
 0x45d   : > { %7078 = vmatpush2.bf16.xpose.msra.mxu0 %v8731_v36  ;;  %7119 = vmatpush2.bf16.xpose.msra.mxu1 %v8733_v37  ;;  %v947_v36 = vld [vmem:[%s9795_s27 + $0x1300] sm:$0xff] }
 0x45e   : > { %7079 = vmatprep.subr.bf16.mxu0 %v8716_v39  ;;  %7120 = vmatprep.subr.bf16.mxu1 %v8718_v41  ;;  %v955_v37 = vld [vmem:[%s9795_s27 + $0x1340] sm:$0xff]  ;;  %v948_v39 = vld [vmem:[%s9795_s27 + $0x1308] sm:$0xff] }
 0x45f   : > { %v956_v41 = vld [vmem:[%s9795_s27 + $0x1348] sm:$0xff]  ;;  %v8864_v46 = vcombine.high %v947_v36, %v955_v37  ;;  %v8863_v58 = vcombine.low %v947_v36, %v955_v37 }
 0x460   : > { %v8866_v50 = vcombine.high %v948_v39, %v956_v41  ;;  %v8865_v59 = vcombine.low %v948_v39, %v956_v41 }
 0x465   : > { %7080 = vmatpush2.bf16.xpose.msra.mxu0 %v8715_v51  ;;  %7121 = vmatpush2.bf16.xpose.msra.mxu1 %v8717_v53  ;;  %v931_v51 = vld [vmem:[%s9795_s27 + $0x1280] sm:$0xff] }
 0x466   : > { %7081 = vmatprep.subr.bf16.mxu0 %v8700_v54  ;;  %7122 = vmatprep.subr.bf16.mxu1 %v8702_v55  ;;  %v939_v53 = vld [vmem:[%s9795_s27 + $0x12c0] sm:$0xff]  ;;  %v932_v54 = vld [vmem:[%s9795_s27 + $0x1288] sm:$0xff] }
 0x467   : > { %v940_v55 = vld [vmem:[%s9795_s27 + $0x12c8] sm:$0xff]  ;;  %v8848_v60 = vcombine.high %v931_v51, %v939_v53  ;;  %v8847_v5 = vcombine.low %v931_v51, %v939_v53 }
 0x468   : > { %v8850_v61 = vcombine.high %v932_v54, %v940_v55  ;;  %v8849_v6 = vcombine.low %v932_v54, %v940_v55 }
 0x46d   : > { %7082 = vmatpush2.bf16.xpose.msra.mxu0 %v8699_v63  ;;  %7123 = vmatpush2.bf16.xpose.msra.mxu1 %v8701_v0  ;;  %v915_v63 = vld [vmem:[%s9795_s27 + $0x1200] sm:$0xff] }
 0x46e   : > { %7083 = vmatprep.subr.bf16.mxu0 %v8684_v1  ;;  %7124 = vmatprep.subr.bf16.mxu1 %v8686_v2  ;;  %v923_v0 = vld [vmem:[%s9795_s27 + $0x1240] sm:$0xff]  ;;  %v916_v1 = vld [vmem:[%s9795_s27 + $0x1208] sm:$0xff] }
 0x46f   : > { %v924_v2 = vld [vmem:[%s9795_s27 + $0x1248] sm:$0xff]  ;;  %v8832_v7 = vcombine.high %v915_v63, %v923_v0  ;;  %v8831_v11 = vcombine.low %v915_v63, %v923_v0 }
 0x470   : > { %v8834_v57 = vcombine.high %v916_v1, %v924_v2  ;;  %v8833_v13 = vcombine.low %v916_v1, %v924_v2 }
 0x475   : > { %7084 = vmatpush2.bf16.xpose.msra.mxu0 %v8683_v62  ;;  %7125 = vmatpush2.bf16.xpose.msra.mxu1 %v8685_v8  ;;  %v899_v62 = vld [vmem:[%s9795_s27 + $0x1180] sm:$0xff] }
 0x476   : > { %7085 = vmatprep.subr.bf16.mxu0 %v8668_v9  ;;  %7126 = vmatprep.subr.bf16.mxu1 %v8670_v10  ;;  %v907_v8 = vld [vmem:[%s9795_s27 + $0x11c0] sm:$0xff]  ;;  %v900_v9 = vld [vmem:[%s9795_s27 + $0x1188] sm:$0xff] }
 0x477   : > { %v908_v10 = vld [vmem:[%s9795_s27 + $0x11c8] sm:$0xff]  ;;  %v8816_v15 = vcombine.high %v899_v62, %v907_v8  ;;  %v8815_v25 = vcombine.low %v899_v62, %v907_v8 }
 0x478   : > { %v8818_v18 = vcombine.high %v900_v9, %v908_v10  ;;  %v8817_v30 = vcombine.low %v900_v9, %v908_v10 }
 0x47d   : > { %7086 = vmatpush2.bf16.xpose.msra.mxu0 %v8667_v21  ;;  %7127 = vmatpush2.bf16.xpose.msra.mxu1 %v8669_v22  ;;  %v883_v21 = vld [vmem:[%s9795_s27 + $0x1100] sm:$0xff] }
 0x47e   : > { %7087 = vmatprep.subr.bf16.mxu0 %v8652_v23  ;;  %7128 = vmatprep.subr.bf16.mxu1 %v8654_v24  ;;  %v891_v22 = vld [vmem:[%s9795_s27 + $0x1140] sm:$0xff]  ;;  %v884_v23 = vld [vmem:[%s9795_s27 + $0x1108] sm:$0xff] }
 0x47f   : > { %v892_v24 = vld [vmem:[%s9795_s27 + $0x1148] sm:$0xff]  ;;  %v8800_v31 = vcombine.high %v883_v21, %v891_v22  ;;  %v8799_v36 = vcombine.low %v883_v21, %v891_v22 }
 0x480   : > { %v8802_v3 = vcombine.high %v884_v23, %v892_v24  ;;  %v8801_v37 = vcombine.low %v884_v23, %v892_v24  ;;  %v1059_v24 = vld [vmem:[%s9795_s27 + $0x1680] sm:$0xff] }
 0x485   : > { %7088 = vmatpush2.bf16.xpose.msra.mxu0 %v8651_v43  ;;  %7129 = vmatpush2.bf16.xpose.msra.mxu1 %v8653_v32  ;;  %v867_v43 = vld [vmem:[%s9795_s27 + $0x1080] sm:$0xff] }
 0x486   : > { %7139 = vmatprep.subr.bf16.mxu0 %v8880_v52  ;;  %7180 = vmatprep.subr.bf16.mxu1 %v8882_v33  ;;  %v875_v32 = vld [vmem:[%s9795_s27 + $0x10c0] sm:$0xff]  ;;  %v868_v52 = vld [vmem:[%s9795_s27 + $0x1088] sm:$0xff] }
 0x487   : > { %v876_v33 = vld [vmem:[%s9795_s27 + $0x10c8] sm:$0xff]  ;;  %v8784_v39 = vcombine.high %v867_v43, %v875_v32  ;;  %v8783_v51 = vcombine.low %v867_v43, %v875_v32 }
 0x488   : > { %v8786_v41 = vcombine.high %v868_v52, %v876_v33  ;;  %v8785_v53 = vcombine.low %v868_v52, %v876_v33 }
 0x48c   : > { %7090 = vmatmul.mubr.bf16.vlgmr.msra.gmra.mxu0 %v10125_v12  ;;  %7131 = vmatmul.mubr.bf16.vlgmr.msra.gmra.mxu1 %v10129_v17 }
 0x48d   : > { %7140 = vmatpush1.bf16.xpose.msra.mxu0 %v8879_v44  ;;  %7181 = vmatpush1.bf16.xpose.msra.mxu1 %v8881_v45  ;;  %v851_v44 = vld [vmem:[%s9795_s27 + $0x1000] sm:$0xff] }
 0x48e   : > { %7141 = vmatprep.subr.bf16.mxu0 %v8864_v46  ;;  %7182 = vmatprep.subr.bf16.mxu1 %v8866_v50  ;;  %v859_v45 = vld [vmem:[%s9795_s27 + $0x1040] sm:$0xff]  ;;  %v852_v46 = vld [vmem:[%s9795_s27 + $0x1008] sm:$0xff] }
 0x48f   : > { %7171 = vmatprep.mubr.bf16.mxu0 %v9829_v34  ;;  %7212 = vmatprep.mubr.bf16.mxu1 %v9831_v35  ;;  %v860_v50 = vld [vmem:[%s9795_s27 + $0x1048] sm:$0xff]  ;;  %v8768_v54 = vcombine.high %v851_v44, %v859_v45  ;;  %v8767_v63 = vcombine.low %v851_v44, %v859_v45 }
 0x490   : > { %v8770_v55 = vcombine.high %v852_v46, %v860_v50  ;;  %v8769_v0 = vcombine.low %v852_v46, %v860_v50  ;;  %v1044_v44 = vld [vmem:[%s9795_s27 + $0x1608] sm:$0xff] }
 0x491   : > { %v1052_v45 = vld [vmem:[%s9795_s27 + $0x1648] sm:$0xff] }
 0x495   : > { %7142 = vmatpush1.bf16.xpose.msra.mxu0 %v8863_v58  ;;  %7183 = vmatpush1.bf16.xpose.msra.mxu1 %v8865_v59  ;;  %v1091_v58 = vld [vmem:[%s9795_s27 + $0x1780] sm:$0xff] }
 0x496   : > { %7143 = vmatprep.subr.bf16.mxu0 %v8848_v60  ;;  %7184 = vmatprep.subr.bf16.mxu1 %v8850_v61  ;;  %v1099_v59 = vld [vmem:[%s9795_s27 + $0x17c0] sm:$0xff]  ;;  %v1092_v60 = vld [vmem:[%s9795_s27 + $0x1788] sm:$0xff] }
 0x497   : > { %v1100_v61 = vld [vmem:[%s9795_s27 + $0x17c8] sm:$0xff]  ;;  %v9008_v1 = vcombine.high %v1091_v58, %v1099_v59  ;;  %v9007_v62 = vcombine.low %v1091_v58, %v1099_v59 }
 0x498   : > { %v9010_v2 = vcombine.high %v1092_v60, %v1100_v61  ;;  %v9009_v8 = vcombine.low %v1092_v60, %v1100_v61  ;;  %v1028_v58 = vld [vmem:[%s9795_s27 + $0x1588] sm:$0xff]  ;;  %v8961_v61 = vcombine.low %v1044_v44, %v1052_v45 }
 0x499   : > { %v1036_v59 = vld [vmem:[%s9795_s27 + $0x15c8] sm:$0xff] }
 0x49d   : > { %7144 = vmatpush1.bf16.xpose.msra.mxu0 %v8847_v5  ;;  %7185 = vmatpush1.bf16.xpose.msra.mxu1 %v8849_v6  ;;  %v1075_v5 = vld [vmem:[%s9795_s27 + $0x1700] sm:$0xff] }
 0x49e   : > { %7145 = vmatprep.subr.bf16.mxu0 %v8832_v7  ;;  %7186 = vmatprep.subr.bf16.mxu1 %v8834_v57  ;;  %v1083_v6 = vld [vmem:[%s9795_s27 + $0x1740] sm:$0xff]  ;;  %v1076_v7 = vld [vmem:[%s9795_s27 + $0x1708] sm:$0xff] }
 0x49f   : > { %v1084_v57 = vld [vmem:[%s9795_s27 + $0x1748] sm:$0xff]  ;;  %v8992_v9 = vcombine.high %v1075_v5, %v1083_v6  ;;  %v8991_v32 = vcombine.low %v1075_v5, %v1083_v6 }
 0x4a0   : > { %v8994_v10 = vcombine.high %v1076_v7, %v1084_v57  ;;  %v8993_v33 = vcombine.low %v1076_v7, %v1084_v57  ;;  %v1012_v5 = vld [vmem:[%s9795_s27 + $0x1508] sm:$0xff]  ;;  %v8945_v57 = vcombine.low %v1028_v58, %v1036_v59 }
 0x4a1   : > { %v1020_v6 = vld [vmem:[%s9795_s27 + $0x1548] sm:$0xff] }
 0x4a5   : > { %7146 = vmatpush1.bf16.xpose.msra.mxu0 %v8831_v11  ;;  %7187 = vmatpush1.bf16.xpose.msra.mxu1 %v8833_v13 }
 0x4a6   : > { %7147 = vmatprep.subr.bf16.mxu0 %v8816_v15  ;;  %7188 = vmatprep.subr.bf16.mxu1 %v8818_v18 }
 0x4ad   : > { %7148 = vmatpush1.bf16.xpose.msra.mxu0 %v8815_v25  ;;  %7189 = vmatpush1.bf16.xpose.msra.mxu1 %v8817_v30  ;;  %v1067_v25 = vld [vmem:[%s9795_s27 + $0x16c0] sm:$0xff] }
 0x4ae   : > { %7149 = vmatprep.subr.bf16.mxu0 %v8800_v31  ;;  %7190 = vmatprep.subr.bf16.mxu1 %v8802_v3  ;;  %v1060_v31 = vld [vmem:[%s9795_s27 + $0x1688] sm:$0xff]  ;;  %v8975_v46 = vcombine.low %v1059_v24, %v1067_v25 }
 0x4af   : > { %v1068_v3 = vld [vmem:[%s9795_s27 + $0x16c8] sm:$0xff] }
 0x4b0   : > { %v8977_v50 = vcombine.low %v1060_v31, %v1068_v3 }
 0x4b5   : > { %7150 = vmatpush1.bf16.xpose.msra.mxu0 %v8799_v36  ;;  %7191 = vmatpush1.bf16.xpose.msra.mxu1 %v8801_v37  ;;  %v8976_v36 = vcombine.high %v1059_v24, %v1067_v25  ;;  %v979_v24 = vld [vmem:[%s9795_s27 + $0x1400] sm:$0xff] }
 0x4b6   : > { %7151 = vmatprep.subr.bf16.mxu0 %v8784_v39  ;;  %7192 = vmatprep.subr.bf16.mxu1 %v8786_v41  ;;  %v1043_v39 = vld [vmem:[%s9795_s27 + $0x1600] sm:$0xff] }
 0x4b7   : > { %v1051_v41 = vld [vmem:[%s9795_s27 + $0x1640] sm:$0xff] }
 0x4b8   : > { %v8959_v60 = vcombine.low %v1043_v39, %v1051_v41  ;;  %v987_v25 = vld [vmem:[%s9795_s27 + $0x1440] sm:$0xff] }
 0x4bd   : > { %7152 = vmatpush1.bf16.xpose.msra.mxu0 %v8783_v51  ;;  %7193 = vmatpush1.bf16.xpose.msra.mxu1 %v8785_v53  ;;  %v8960_v51 = vcombine.high %v1043_v39, %v1051_v41  ;;  %v8962_v53 = vcombine.high %v1044_v44, %v1052_v45  ;;  %v8895_v39 = vcombine.low %v979_v24, %v987_v25 }
 0x4be   : > { %7153 = vmatprep.subr.bf16.mxu0 %v8768_v54  ;;  %7194 = vmatprep.subr.bf16.mxu1 %v8770_v55  ;;  %v1027_v54 = vld [vmem:[%s9795_s27 + $0x1580] sm:$0xff] }
 0x4bf   : > { %v1035_v55 = vld [vmem:[%s9795_s27 + $0x15c0] sm:$0xff] }
 0x4c0   : > { %v8943_v7 = vcombine.low %v1027_v54, %v1035_v55 }
 0x4c5   : > { %7154 = vmatpush1.bf16.xpose.msra.mxu0 %v8767_v63  ;;  %7195 = vmatpush1.bf16.xpose.msra.mxu1 %v8769_v0  ;;  %v8944_v63 = vcombine.high %v1027_v54, %v1035_v55  ;;  %v8946_v0 = vcombine.high %v1028_v58, %v1036_v59 }
 0x4c6   : > { %7155 = vmatprep.subr.bf16.mxu0 %v9008_v1  ;;  %7196 = vmatprep.subr.bf16.mxu1 %v9010_v2  ;;  %v1011_v1 = vld [vmem:[%s9795_s27 + $0x1500] sm:$0xff] }
 0x4c7   : > { %v1019_v2 = vld [vmem:[%s9795_s27 + $0x1540] sm:$0xff] }
 0x4cc   : > { %v7009_v11 = vpop.f32.mrf.mxu0  ;;  %v7050_v15 = vpop.f32.mrf.mxu1 }
 0x4cd   : > { %v7010_v13 = vadd.f32 %v7009_v11, %v10411_v56  ;;  %7156 = vmatpush2.bf16.xpose.msra.mxu0 %v9007_v62  ;;  %7197 = vmatpush2.bf16.xpose.msra.mxu1 %v9009_v8  ;;  %v8928_v62 = vcombine.high %v1011_v1, %v1019_v2  ;;  %v8930_v8 = vcombine.high %v1012_v5, %v1020_v6  ;;  %v996_v11 = vld [vmem:[%s9795_s27 + $0x1488] sm:$0xff] }
 0x4ce   : > { %v7011_v18 = vpop.f32.mrf.mxu0  ;;  %7157 = vmatprep.subr.bf16.mxu0 %v8992_v9  ;;  %v7052_v23 = vpop.f32.mrf.mxu1  ;;  %7198 = vmatprep.subr.bf16.mxu1 %v8994_v10  ;;  %v995_v9 = vld [vmem:[%s9795_s27 + $0x1480] sm:$0xff] }
 0x4cf   : > { %v10485_v21 = vadd.f32 %v7050_v15, %v7010_v13  ;;  %v7012_v22 = vadd.f32 %v7011_v18, %v10418_v4  ;;  %v8978_v4 = vcombine.high %v1060_v31, %v1068_v3  ;;  %v1003_v10 = vld [vmem:[%s9795_s27 + $0x14c0] sm:$0xff]  ;;  %v1004_v13 = vld [vmem:[%s9795_s27 + $0x14c8] sm:$0xff]  ;;  %v8927_v15 = vcombine.low %v1011_v1, %v1019_v2 }
 0x4d0   : > { %v7013_v30 = vpop.f32.mrf.mxu0  ;;  %v7054_v43 = vpop.f32.mrf.mxu1  ;;  %v8929_v18 = vcombine.low %v1012_v5, %v1020_v6  ;;  %v988_v31 = vld [vmem:[%s9795_s27 + $0x1448] sm:$0xff]  ;;  %v8911_v3 = vcombine.low %v995_v9, %v1003_v10 }
 0x4d1   : > { %v10492_v56 = vadd.f32 %v7052_v23, %v7012_v22  ;;  %v8912_v22 = vcombine.high %v995_v9, %v1003_v10  ;;  %v8914_v23 = vcombine.high %v996_v11, %v1004_v13  ;;  %v980_v30 = vld [vmem:[%s9795_s27 + $0x1408] sm:$0xff]  ;;  %v8913_v43 = vcombine.low %v996_v11, %v1004_v13 }
 0x4d2   : > { %v7014_v52 = vpop.f32.mrf.mxu0  ;;  %v7055_v37 = vpop.f32.mrf.mxu1  ;;  %v8897_v41 = vcombine.low %v980_v30, %v988_v31 }
 0x4d3   : > { %v8898_v52 = vcombine.high %v980_v30, %v988_v31  ;;  %v966_v37 = vld [vmem:[%s9795_s27 + $0x1398] sm:$0xff] }
 0x4d5   : > { %7158 = vmatpush2.bf16.xpose.msra.mxu0 %v8991_v32  ;;  %7199 = vmatpush2.bf16.xpose.msra.mxu1 %v8993_v33  ;;  %v8896_v32 = vcombine.high %v979_v24, %v987_v25  ;;  %v965_v33 = vld [vmem:[%s9795_s27 + $0x1390] sm:$0xff] }
 0x4d6   : > { %7159 = vmatprep.subr.bf16.mxu0 %v8976_v36  ;;  %7200 = vmatprep.subr.bf16.mxu1 %v8978_v4  ;;  %v973_v36 = vld [vmem:[%s9795_s27 + $0x13d0] sm:$0xff]  ;;  %v974_v4 = vld [vmem:[%s9795_s27 + $0x13d8] sm:$0xff] }
 0x4d7   : > { %v8884_v44 = vcombine.high %v965_v33, %v973_v36  ;;  %v8886_v45 = vcombine.high %v966_v37, %v974_v4  ;;  %v8883_v54 = vcombine.low %v965_v33, %v973_v36  ;;  %v8885_v55 = vcombine.low %v966_v37, %v974_v4 }
 0x4dd   : > { %7160 = vmatpush2.bf16.xpose.msra.mxu0 %v8975_v46  ;;  %7201 = vmatpush2.bf16.xpose.msra.mxu1 %v8977_v50  ;;  %v949_v46 = vld [vmem:[%s9795_s27 + $0x1310] sm:$0xff] }
 0x4de   : > { %7161 = vmatprep.subr.bf16.mxu0 %v8960_v51  ;;  %7202 = vmatprep.subr.bf16.mxu1 %v8962_v53  ;;  %v957_v50 = vld [vmem:[%s9795_s27 + $0x1350] sm:$0xff]  ;;  %v950_v51 = vld [vmem:[%s9795_s27 + $0x1318] sm:$0xff] }
 0x4df   : > { %v958_v53 = vld [vmem:[%s9795_s27 + $0x1358] sm:$0xff]  ;;  %v8868_v58 = vcombine.high %v949_v46, %v957_v50  ;;  %v8867_v1 = vcombine.low %v949_v46, %v957_v50 }
 0x4e0   : > { %v8870_v59 = vcombine.high %v950_v51, %v958_v53  ;;  %v8869_v2 = vcombine.low %v950_v51, %v958_v53 }
 0x4e5   : > { %7162 = vmatpush2.bf16.xpose.msra.mxu0 %v8959_v60  ;;  %7203 = vmatpush2.bf16.xpose.msra.mxu1 %v8961_v61  ;;  %v933_v60 = vld [vmem:[%s9795_s27 + $0x1290] sm:$0xff] }
 0x4e6   : > { %7163 = vmatprep.subr.bf16.mxu0 %v8944_v63  ;;  %7204 = vmatprep.subr.bf16.mxu1 %v8946_v0  ;;  %v941_v61 = vld [vmem:[%s9795_s27 + $0x12d0] sm:$0xff]  ;;  %v934_v63 = vld [vmem:[%s9795_s27 + $0x1298] sm:$0xff] }
 0x4e7   : > { %v942_v0 = vld [vmem:[%s9795_s27 + $0x12d8] sm:$0xff]  ;;  %v8852_v5 = vcombine.high %v933_v60, %v941_v61  ;;  %v8851_v9 = vcombine.low %v933_v60, %v941_v61 }
 0x4e8   : > { %v8854_v6 = vcombine.high %v934_v63, %v942_v0  ;;  %v8853_v10 = vcombine.low %v934_v63, %v942_v0 }
 0x4ed   : > { %7164 = vmatpush2.bf16.xpose.msra.mxu0 %v8943_v7  ;;  %7205 = vmatpush2.bf16.xpose.msra.mxu1 %v8945_v57  ;;  %v917_v7 = vld [vmem:[%s9795_s27 + $0x1210] sm:$0xff] }
 0x4ee   : > { %7165 = vmatprep.subr.bf16.mxu0 %v8928_v62  ;;  %7206 = vmatprep.subr.bf16.mxu1 %v8930_v8  ;;  %v925_v57 = vld [vmem:[%s9795_s27 + $0x1250] sm:$0xff]  ;;  %v918_v62 = vld [vmem:[%s9795_s27 + $0x1218] sm:$0xff] }
 0x4ef   : > { %v926_v8 = vld [vmem:[%s9795_s27 + $0x1258] sm:$0xff]  ;;  %v8836_v11 = vcombine.high %v917_v7, %v925_v57  ;;  %v8835_v24 = vcombine.low %v917_v7, %v925_v57 }
 0x4f0   : > { %v8838_v13 = vcombine.high %v918_v62, %v926_v8  ;;  %v8837_v25 = vcombine.low %v918_v62, %v926_v8 }
 0x4f5   : > { %7166 = vmatpush2.bf16.xpose.msra.mxu0 %v8927_v15  ;;  %7207 = vmatpush2.bf16.xpose.msra.mxu1 %v8929_v18  ;;  %v901_v15 = vld [vmem:[%s9795_s27 + $0x1190] sm:$0xff] }
 0x4f6   : > { %7167 = vmatprep.subr.bf16.mxu0 %v8912_v22  ;;  %7208 = vmatprep.subr.bf16.mxu1 %v8914_v23  ;;  %v909_v18 = vld [vmem:[%s9795_s27 + $0x11d0] sm:$0xff]  ;;  %v902_v22 = vld [vmem:[%s9795_s27 + $0x1198] sm:$0xff] }
 0x4f7   : > { %v910_v23 = vld [vmem:[%s9795_s27 + $0x11d8] sm:$0xff]  ;;  %v8820_v30 = vcombine.high %v901_v15, %v909_v18  ;;  %v8819_v33 = vcombine.low %v901_v15, %v909_v18 }
 0x4f8   : > { %v8822_v31 = vcombine.high %v902_v22, %v910_v23  ;;  %v8821_v36 = vcombine.low %v902_v22, %v910_v23 }
 0x4fd   : > { %7168 = vmatpush2.bf16.xpose.msra.mxu0 %v8911_v3  ;;  %7209 = vmatpush2.bf16.xpose.msra.mxu1 %v8913_v43  ;;  %v885_v3 = vld [vmem:[%s9795_s27 + $0x1110] sm:$0xff] }
 0x4fe   : > { %7169 = vmatprep.subr.bf16.mxu0 %v8896_v32  ;;  %7210 = vmatprep.subr.bf16.mxu1 %v8898_v52  ;;  %v893_v43 = vld [vmem:[%s9795_s27 + $0x1150] sm:$0xff]  ;;  %v886_v32 = vld [vmem:[%s9795_s27 + $0x1118] sm:$0xff] }
 0x4ff   : > { %v894_v52 = vld [vmem:[%s9795_s27 + $0x1158] sm:$0xff]  ;;  %v8804_v37 = vcombine.high %v885_v3, %v893_v43  ;;  %v8803_v46 = vcombine.low %v885_v3, %v893_v43 }
 0x500   : > { %v8806_v4 = vcombine.high %v886_v32, %v894_v52  ;;  %v8805_v50 = vcombine.low %v886_v32, %v894_v52  ;;  %v1061_v52 = vld [vmem:[%s9795_s27 + $0x1690] sm:$0xff] }
 0x505   : > { %7170 = vmatpush2.bf16.xpose.msra.mxu0 %v8895_v39  ;;  %7211 = vmatpush2.bf16.xpose.msra.mxu1 %v8897_v41  ;;  %v869_v39 = vld [vmem:[%s9795_s27 + $0x1090] sm:$0xff] }
 0x506   : > { %7221 = vmatprep.subr.bf16.mxu0 %v8884_v44  ;;  %7262 = vmatprep.subr.bf16.mxu1 %v8886_v45  ;;  %v877_v41 = vld [vmem:[%s9795_s27 + $0x10d0] sm:$0xff]  ;;  %v870_v44 = vld [vmem:[%s9795_s27 + $0x1098] sm:$0xff] }
 0x507   : > { %v878_v45 = vld [vmem:[%s9795_s27 + $0x10d8] sm:$0xff]  ;;  %v8788_v51 = vcombine.high %v869_v39, %v877_v41  ;;  %v8787_v60 = vcombine.low %v869_v39, %v877_v41 }
 0x508   : > { %v8790_v53 = vcombine.high %v870_v44, %v878_v45  ;;  %v8789_v61 = vcombine.low %v870_v44, %v878_v45 }
 0x50c   : > { %7172 = vmatmul.mubr.bf16.vlgmr.msra.gmra.mxu0 %v9887_v16  ;;  %7213 = vmatmul.mubr.bf16.vlgmr.msra.gmra.mxu1 %v9891_v20 }
 0x50d   : > { %7222 = vmatpush1.bf16.xpose.msra.mxu0 %v8883_v54  ;;  %7263 = vmatpush1.bf16.xpose.msra.mxu1 %v8885_v55  ;;  %v853_v54 = vld [vmem:[%s9795_s27 + $0x1010] sm:$0xff] }
 0x50e   : > { %7223 = vmatprep.subr.bf16.mxu0 %v8868_v58  ;;  %7264 = vmatprep.subr.bf16.mxu1 %v8870_v59  ;;  %v861_v55 = vld [vmem:[%s9795_s27 + $0x1050] sm:$0xff]  ;;  %v854_v58 = vld [vmem:[%s9795_s27 + $0x1018] sm:$0xff] }
 0x50f   : > { %7253 = vmatprep.mubr.bf16.mxu0 %v9893_v26  ;;  %7294 = vmatprep.mubr.bf16.mxu1 %v9896_v27  ;;  %v862_v59 = vld [vmem:[%s9795_s27 + $0x1058] sm:$0xff]  ;;  %v8772_v63 = vcombine.high %v853_v54, %v861_v55  ;;  %v8771_v7 = vcombine.low %v853_v54, %v861_v55 }
 0x510   : > { %v8774_v0 = vcombine.high %v854_v58, %v862_v59  ;;  %v8773_v57 = vcombine.low %v854_v58, %v862_v59 }
 0x515   : > { %7224 = vmatpush1.bf16.xpose.msra.mxu0 %v8867_v1  ;;  %7265 = vmatpush1.bf16.xpose.msra.mxu1 %v8869_v2  ;;  %v1093_v1 = vld [vmem:[%s9795_s27 + $0x1790] sm:$0xff] }
 0x516   : > { %7225 = vmatprep.subr.bf16.mxu0 %v8852_v5  ;;  %7266 = vmatprep.subr.bf16.mxu1 %v8854_v6  ;;  %v1101_v2 = vld [vmem:[%s9795_s27 + $0x17d0] sm:$0xff]  ;;  %v1094_v5 = vld [vmem:[%s9795_s27 + $0x1798] sm:$0xff] }
 0x517   : > { %v1102_v6 = vld [vmem:[%s9795_s27 + $0x17d8] sm:$0xff]  ;;  %v9012_v62 = vcombine.high %v1093_v1, %v1101_v2  ;;  %v9011_v15 = vcombine.low %v1093_v1, %v1101_v2 }
 0x518   : > { %v9014_v8 = vcombine.high %v1094_v5, %v1102_v6  ;;  %v9013_v18 = vcombine.low %v1094_v5, %v1102_v6  ;;  %v1054_v1 = vld [vmem:[%s9795_s27 + $0x1658] sm:$0xff] }
 0x51d   : > { %7226 = vmatpush1.bf16.xpose.msra.mxu0 %v8851_v9  ;;  %7267 = vmatpush1.bf16.xpose.msra.mxu1 %v8853_v10  ;;  %v1077_v9 = vld [vmem:[%s9795_s27 + $0x1710] sm:$0xff] }
 0x51e   : > { %7227 = vmatprep.subr.bf16.mxu0 %v8836_v11  ;;  %7268 = vmatprep.subr.bf16.mxu1 %v8838_v13  ;;  %v1085_v10 = vld [vmem:[%s9795_s27 + $0x1750] sm:$0xff]  ;;  %v1078_v11 = vld [vmem:[%s9795_s27 + $0x1718] sm:$0xff] }
 0x51f   : > { %v1086_v13 = vld [vmem:[%s9795_s27 + $0x1758] sm:$0xff]  ;;  %v8996_v22 = vcombine.high %v1077_v9, %v1085_v10  ;;  %v8995_v45 = vcombine.low %v1077_v9, %v1085_v10 }
 0x520   : > { %v8998_v23 = vcombine.high %v1078_v11, %v1086_v13 }
 0x525   : > { %7228 = vmatpush1.bf16.xpose.msra.mxu0 %v8835_v24  ;;  %7269 = vmatpush1.bf16.xpose.msra.mxu1 %v8837_v25 }
 0x526   : > { %7229 = vmatprep.subr.bf16.mxu0 %v8820_v30  ;;  %7270 = vmatprep.subr.bf16.mxu1 %v8822_v31 }
 0x52d   : > { %7230 = vmatpush1.bf16.xpose.msra.mxu0 %v8819_v33  ;;  %7271 = vmatpush1.bf16.xpose.msra.mxu1 %v8821_v36  ;;  %v1069_v33 = vld [vmem:[%s9795_s27 + $0x16d0] sm:$0xff] }
 0x52e   : > { %7231 = vmatprep.subr.bf16.mxu0 %v8804_v37  ;;  %7272 = vmatprep.subr.bf16.mxu1 %v8806_v4  ;;  %v1062_v37 = vld [vmem:[%s9795_s27 + $0x1698] sm:$0xff]  ;;  %v8979_v6 = vcombine.low %v1061_v52, %v1069_v33 }
 0x52f   : > { %v1070_v4 = vld [vmem:[%s9795_s27 + $0x16d8] sm:$0xff] }
 0x530   : > { %v8982_v54 = vcombine.high %v1062_v37, %v1070_v4 }
 0x535   : > { %7232 = vmatpush1.bf16.xpose.msra.mxu0 %v8803_v46  ;;  %7273 = vmatpush1.bf16.xpose.msra.mxu1 %v8805_v50  ;;  %v8997_v46 = vcombine.low %v1078_v11, %v1086_v13  ;;  %v8980_v50 = vcombine.high %v1061_v52, %v1069_v33 }
 0x536   : > { %7233 = vmatprep.subr.bf16.mxu0 %v8788_v51  ;;  %7274 = vmatprep.subr.bf16.mxu1 %v8790_v53 }
 0x53d   : > { %7234 = vmatpush1.bf16.xpose.msra.mxu0 %v8787_v60  ;;  %7275 = vmatpush1.bf16.xpose.msra.mxu1 %v8789_v61  ;;  %v1045_v61 = vld [vmem:[%s9795_s27 + $0x1610] sm:$0xff] }
 0x53e   : > { %7235 = vmatprep.subr.bf16.mxu0 %v8772_v63  ;;  %7276 = vmatprep.subr.bf16.mxu1 %v8774_v0  ;;  %v1053_v63 = vld [vmem:[%s9795_s27 + $0x1650] sm:$0xff]  ;;  %v1046_v0 = vld [vmem:[%s9795_s27 + $0x1618] sm:$0xff] }
 0x53f   : > { %v8966_v9 = vcombine.high %v1046_v0, %v1054_v1 }
 0x545   : > { %7236 = vmatpush1.bf16.xpose.msra.mxu0 %v8771_v7  ;;  %7277 = vmatpush1.bf16.xpose.msra.mxu1 %v8773_v57  ;;  %v8981_v7 = vcombine.low %v1062_v37, %v1070_v4  ;;  %v8964_v57 = vcombine.high %v1045_v61, %v1053_v63 }
 0x546   : > { %7237 = vmatprep.subr.bf16.mxu0 %v9012_v62  ;;  %7278 = vmatprep.subr.bf16.mxu1 %v9014_v8 }
 0x54c   : > { %v7091_v24 = vpop.f32.mrf.mxu0  ;;  %v7132_v30 = vpop.f32.mrf.mxu1 }
 0x54d   : > { %v7092_v25 = vadd.f32 %v7091_v24, %v10485_v21  ;;  %7238 = vmatpush2.bf16.xpose.msra.mxu0 %v9011_v15  ;;  %7279 = vmatpush2.bf16.xpose.msra.mxu1 %v9013_v18  ;;  %v1029_v18 = vld [vmem:[%s9795_s27 + $0x1590] sm:$0xff]  ;;  %v1038_v24 = vld [vmem:[%s9795_s27 + $0x15d8] sm:$0xff] }
 0x54e   : > { %v7093_v31 = vpop.f32.mrf.mxu0  ;;  %7239 = vmatprep.subr.bf16.mxu0 %v8996_v22  ;;  %v7134_v32 = vpop.f32.mrf.mxu1  ;;  %7280 = vmatprep.subr.bf16.mxu1 %v8998_v23  ;;  %v1037_v22 = vld [vmem:[%s9795_s27 + $0x15d0] sm:$0xff]  ;;  %v1030_v23 = vld [vmem:[%s9795_s27 + $0x1598] sm:$0xff] }
 0x54f   : > { %v7133_v3 = vadd.f32 %v7132_v30, %v7092_v25  ;;  %v7094_v43 = vadd.f32 %v7093_v31, %v10492_v56  ;;  %v8963_v31 = vcombine.low %v1045_v61, %v1053_v63  ;;  %v8950_v33 = vcombine.high %v1030_v23, %v1038_v24 }
 0x550   : > { %v7095_v36 = vpop.f32.mrf.mxu0  ;;  %v7136_v44 = vpop.f32.mrf.mxu1 }
 0x551   : > { %v7807_v39 = vrot.slane %v7133_v3, 4  ;;  %v7135_v41 = vadd.f32 %v7134_v32, %v7094_v43  ;;  %v8965_v43 = vcombine.low %v1046_v0, %v1054_v1  ;;  %v8948_v32 = vcombine.high %v1029_v18, %v1037_v22  ;;  %v1021_v44 = vld [vmem:[%s9795_s27 + $0x1550] sm:$0xff] }
 0x552   : > { %v7096_v21 = vpop.f32.mrf.mxu0  ;;  %v7137_v53 = vpop.f32.mrf.mxu1  ;;  %v997_v0 = vld [vmem:[%s9795_s27 + $0x1490] sm:$0xff] }
 0x553   : > { %v7808_v51 = vadd.f32 %v7807_v39, %v7133_v3  ;;  %v7813_v56 = vrot.slane %v7135_v41, 4  ;;  %v1022_v21 = vld [vmem:[%s9795_s27 + $0x1558] sm:$0xff]  ;;  %v1005_v1 = vld [vmem:[%s9795_s27 + $0x14d0] sm:$0xff] }
 0x555   : > { %v7809_v55 = vrot.slane %v7808_v51, 2  ;;  %v7814_v58 = vadd.f32 %v7813_v56, %v7135_v41  ;;  %7240 = vmatpush2.bf16.xpose.msra.mxu0 %v8995_v45  ;;  %7281 = vmatpush2.bf16.xpose.msra.mxu1 %v8997_v46  ;;  %v1014_v45 = vld [vmem:[%s9795_s27 + $0x1518] sm:$0xff]  ;;  %v8949_v56 = vcombine.low %v1030_v23, %v1038_v24  ;;  %v7951_v23 = vsub.s32 2, %v10271_v40 }
 0x556   : > { %7241 = vmatprep.subr.bf16.mxu0 %v8980_v50  ;;  %7282 = vmatprep.subr.bf16.mxu1 %v8982_v54  ;;  %v8915_v24 = vcombine.low %v997_v0, %v1005_v1 }
 0x557   : > { %v7810_v59 = vadd.f32 %v7809_v55, %v7808_v51  ;;  %v7815_v60 = vrot.slane %v7814_v58, 2  ;;  %v8947_v51 = vcombine.low %v1029_v18, %v1037_v22  ;;  %v982_v18 = vld [vmem:[%s9795_s27 + $0x1418] sm:$0xff] }
 0x558   : > { %v990_v22 = vld [vmem:[%s9795_s27 + $0x1458] sm:$0xff] }
 0x559   : > { %v7811_v2 = vrot.slane %v7810_v59, 1  ;;  %v7816_v5 = vadd.f32 %v7815_v60, %v7814_v58  ;;  %v8934_v58 = vcombine.high %v1014_v45, %v1022_v21 }
 0x55b   : > { %v7812_v62 = vadd.f32 %v7811_v2, %v7810_v59  ;;  %v7817_v8 = vrot.slane %v7816_v5, 1  ;;  %v998_v2 = vld [vmem:[%s9795_s27 + $0x1498] sm:$0xff] }
 0x55d   : > { %v7845_v10 = vmul.f32 0.125, %v7812_v62  ;;  %v7818_v11 = vadd.f32 %v7817_v8, %v7816_v5  ;;  %7242 = vmatpush2.bf16.xpose.msra.mxu0 %v8979_v6  ;;  %7283 = vmatpush2.bf16.xpose.msra.mxu1 %v8981_v7  ;;  %v1006_v5 = vld [vmem:[%s9795_s27 + $0x14d8] sm:$0xff]  ;;  %v8933_v62 = vcombine.low %v1014_v45, %v1022_v21  ;;  %v8916_v8 = vcombine.high %v997_v0, %v1005_v1  ;;  %v951_v0 = vld [vmem:[%s9795_s27 + $0x1320] sm:$0xff] }
 0x55e   : > { %7243 = vmatprep.subr.bf16.mxu0 %v8964_v57  ;;  %7284 = vmatprep.subr.bf16.mxu1 %v8966_v9  ;;  %v959_v1 = vld [vmem:[%s9795_s27 + $0x1360] sm:$0xff] }
 0x55f   : > { %v10568_v13 = vsub.f32 %v7133_v3, %v7845_v10  ;;  %v7846_v15 = vmul.f32 0.125, %v7818_v11  ;;  %v8918_v10 = vcombine.high %v998_v2, %v1006_v5  ;;  %v981_v11 = vld [vmem:[%s9795_s27 + $0x1410] sm:$0xff] }
 0x561   : > { %v7861_v25 = vmul.f32 %v10568_v13, %v10568_v13  ;;  %v10576_v30 = vsub.f32 %v7135_v41, %v7846_v15  ;;  %v1013_v41 = vld [vmem:[%s9795_s27 + $0x1510] sm:$0xff] }
 0x562   : > { %v8932_v53 = vcombine.high %v1013_v41, %v1021_v44  ;;  %v8931_v57 = vcombine.low %v1013_v41, %v1021_v44  ;;  %v989_v15 = vld [vmem:[%s9795_s27 + $0x1450] sm:$0xff]  ;;  %v976_v41 = vld [vmem:[%s9795_s27 + $0x13e8] sm:$0xff] }
 0x563   : > { %v7879_v3 = vrot.slane %v7861_v25, 4  ;;  %v7862_v52 = vmul.f32 %v10576_v30, %v10576_v30  ;;  %v8899_v45 = vcombine.low %v981_v11, %v989_v15 }
 0x565   : > { %v7880_v36 = vadd.f32 %v7879_v3, %v7861_v25  ;;  %v7885_v37 = vrot.slane %v7862_v52, 4  ;;  %7244 = vmatpush2.bf16.xpose.msra.mxu0 %v8963_v31  ;;  %7285 = vmatpush2.bf16.xpose.msra.mxu1 %v8965_v43  ;;  %v8917_v25 = vcombine.low %v998_v2, %v1006_v5  ;;  %v8900_v31 = vcombine.high %v981_v11, %v989_v15  ;;  %v9374_v3 = vld [vmem:[%s9802_s23] sm:$0xff] }
 0x566   : > { %7245 = vmatprep.subr.bf16.mxu0 %v8948_v32  ;;  %7286 = vmatprep.subr.bf16.mxu1 %v8950_v33  ;;  %v7955_v43 = vsub.s32 3, %v10271_v40  ;;  %v8902_v32 = vcombine.high %v982_v18, %v990_v22  ;;  %v952_v2 = vld [vmem:[%s9795_s27 + $0x1328] sm:$0xff] }
 0x567   : > { %v7881_v4 = vrot.slane %v7880_v36, 2  ;;  %v7886_v39 = vadd.f32 %v7885_v37, %v7862_v52  ;;  %v7952_v52 = vrot.slane %v9374_v3, %v7951_v23  ;;  %v975_v37 = vld [vmem:[%s9795_s27 + $0x13e0] sm:$0xff]  ;;  %v960_v5 = vld [vmem:[%s9795_s27 + $0x1368] sm:$0xff] }
 0x568   : > { %v7956_v33 = vrot.slane %v9374_v3, %v7955_v43  ;;  %v936_v11 = vld [vmem:[%s9795_s27 + $0x12a8] sm:$0xff] }
 0x569   : > { %v7882_v46 = vadd.f32 %v7881_v4, %v7880_v36  ;;  %v7887_v50 = vrot.slane %v7886_v39, 2  ;;  %v967_v36 = vld [vmem:[%s9795_s27 + $0x13a0] sm:$0xff]  ;;  %v944_v15 = vld [vmem:[%s9795_s27 + $0x12e8] sm:$0xff] }
 0x56b   : > { %v7883_v54 = vrot.slane %v7882_v46, 1  ;;  %v7888_v55 = vadd.f32 %v7887_v50, %v7886_v39  ;;  %v968_v39 = vld [vmem:[%s9795_s27 + $0x13a8] sm:$0xff]  ;;  %v8888_v50 = vcombine.high %v967_v36, %v975_v37 }
 0x56d   : > { %v7884_v59 = vadd.f32 %v7883_v54, %v7882_v46  ;;  %v7889_v60 = vrot.slane %v7888_v55, 1  ;;  %7246 = vmatpush2.bf16.xpose.msra.mxu0 %v8947_v51  ;;  %7287 = vmatpush2.bf16.xpose.msra.mxu1 %v8949_v56  ;;  %v8901_v46 = vcombine.low %v982_v18, %v990_v22  ;;  %v9375_v56 = vld [vmem:[%s9805_s12] sm:$0xff]  ;;  %v8871_v18 = vcombine.low %v951_v0, %v959_v1 }
 0x56e   : > { %7247 = vmatprep.subr.bf16.mxu0 %v8932_v53  ;;  %7288 = vmatprep.subr.bf16.mxu1 %v8934_v58  ;;  %v8042_v53 = vrot.slane %v9375_v56, %v7951_v23  ;;  %v8873_v22 = vcombine.low %v952_v2, %v960_v5 }
 0x56f   : > { %v7917_v61 = vmul.f32 0.125, %v7884_v59  ;;  %v7890_v63 = vadd.f32 %v7889_v60, %v7888_v55  ;;  %v8890_v55 = vcombine.high %v968_v39, %v976_v41  ;;  %v8046_v60 = vrot.slane %v9375_v56, %v7955_v43  ;;  %v920_v43 = vld [vmem:[%s9795_s27 + $0x1228] sm:$0xff] }
 0x570   : > { %v888_v56 = vld [vmem:[%s9795_s27 + $0x1128] sm:$0xff] }
 0x571   : > { %v7925_v6 = vadd.f32 1e-05, %v7917_v61  ;;  %v7918_v7 = vmul.f32 0.125, %v7890_v63 }
 0x573   : > { %9362 = vrsqrt.f32 %v7925_v6  ;;  %v7926_v9 = vadd.f32 1e-05, %v7918_v7  ;;  %v8887_v7 = vcombine.low %v967_v36, %v975_v37  ;;  %v903_v37 = vld [vmem:[%s9795_s27 + $0x11a0] sm:$0xff] }
 0x575   : > { %9364 = vrsqrt.f32 %v7926_v9  ;;  %7248 = vmatpush2.bf16.xpose.msra.mxu0 %v8931_v57  ;;  %7289 = vmatpush2.bf16.xpose.msra.mxu1 %v8933_v62  ;;  %v8889_v57 = vcombine.low %v968_v39, %v976_v41  ;;  %v8872_v62 = vcombine.high %v951_v0, %v959_v1  ;;  %v8874_v9 = vcombine.high %v952_v2, %v960_v5  ;;  %v904_v39 = vld [vmem:[%s9795_s27 + $0x11a8] sm:$0xff] }
 0x576   : > { %7249 = vmatprep.subr.bf16.mxu0 %v8916_v8  ;;  %7290 = vmatprep.subr.bf16.mxu1 %v8918_v10  ;;  %v943_v10 = vld [vmem:[%s9795_s27 + $0x12e0] sm:$0xff]  ;;  %v912_v41 = vld [vmem:[%s9795_s27 + $0x11e8] sm:$0xff] }
 0x577   : > { %v880_v0 = vld [vmem:[%s9795_s27 + $0x10e8] sm:$0xff] }
 0x57d   : > { %7250 = vmatpush2.bf16.xpose.msra.mxu0 %v8915_v24  ;;  %7291 = vmatpush2.bf16.xpose.msra.mxu1 %v8917_v25  ;;  %v8858_v24 = vcombine.high %v936_v11, %v944_v15  ;;  %v919_v25 = vld [vmem:[%s9795_s27 + $0x1220] sm:$0xff] }
 0x57e   : > { %7251 = vmatprep.subr.bf16.mxu0 %v8900_v31  ;;  %7292 = vmatprep.subr.bf16.mxu1 %v8902_v32  ;;  %v927_v31 = vld [vmem:[%s9795_s27 + $0x1260] sm:$0xff]  ;;  %v928_v32 = vld [vmem:[%s9795_s27 + $0x1268] sm:$0xff] }
 0x57f   : > { %v8842_v36 = vcombine.high %v920_v43, %v928_v32 }
 0x580   : > { %v9363_v4 = vpop.eup %9362 }
 0x581   : > { %v7983_v44 = vmul.f32 %v9363_v4, %v7952_v52  ;;  %v8857_v52 = vcombine.low %v936_v11, %v944_v15  ;;  %v911_v4 = vld [vmem:[%s9795_s27 + $0x11e0] sm:$0xff] }
 0x582   : > { %v9365_v21 = vpop.eup %9364  ;;  %v1095_v11 = vld [vmem:[%s9795_s27 + $0x17a0] sm:$0xff] }
 0x583   : > { %v8000_v51 = vrot.slane %v7983_v44, %v10278_v47  ;;  %v7984_v54 = vmul.f32 %v9365_v21, %v7956_v33  ;;  %v8840_v33 = vcombine.high %v919_v25, %v927_v31  ;;  %v8839_v44 = vcombine.low %v919_v25, %v927_v31  ;;  %v1103_v15 = vld [vmem:[%s9795_s27 + $0x17e0] sm:$0xff] }
 0x584   : > { %v8824_v21 = vcombine.high %v903_v37, %v911_v4  ;;  %v9016_v25 = vcombine.high %v1095_v11, %v1103_v15 }
 0x585   : > { %v8023_v58 = vmul.f32 %v8000_v51, %v10568_v13  ;;  %v8004_v59 = vrot.slane %v7984_v54, %v10278_v47  ;;  %7252 = vmatpush2.bf16.xpose.msra.mxu0 %v8899_v45  ;;  %7293 = vmatpush2.bf16.xpose.msra.mxu1 %v8901_v46  ;;  %v8841_v45 = vcombine.low %v920_v43, %v928_v32  ;;  %v895_v51 = vld [vmem:[%s9795_s27 + $0x1160] sm:$0xff] }
 0x586   : > { %7303 = vmatprep.subr.bf16.mxu0 %v8888_v50  ;;  %7344 = vmatprep.subr.bf16.mxu1 %v8890_v55  ;;  %v8826_v46 = vcombine.high %v904_v39, %v912_v41  ;;  %v887_v50 = vld [vmem:[%s9795_s27 + $0x1120] sm:$0xff]  ;;  %v8823_v54 = vcombine.low %v903_v37, %v911_v4  ;;  %v8825_v55 = vcombine.low %v904_v39, %v912_v41 }
 0x587   : > { %v8073_v61 = vadd.f32 %v8042_v53, %v8023_v58  ;;  %v8024_v63 = vmul.f32 %v8004_v59, %v10576_v30  ;;  %v935_v30 = vld [vmem:[%s9795_s27 + $0x12a0] sm:$0xff]  ;;  %v896_v53 = vld [vmem:[%s9795_s27 + $0x1168] sm:$0xff]  ;;  %v8808_v58 = vcombine.high %v887_v50, %v895_v51  ;;  %v8807_v1 = vcombine.low %v887_v50, %v895_v51 }
 0x588   : > { %v8856_v23 = vcombine.high %v935_v30, %v943_v10  ;;  %v8855_v3 = vcombine.low %v935_v30, %v943_v10  ;;  %v8810_v59 = vcombine.high %v888_v56, %v896_v53  ;;  %v8809_v2 = vcombine.low %v888_v56, %v896_v53  ;;  %v1079_v43 = vld [vmem:[%s9795_s27 + $0x1720] sm:$0xff]  ;;  %v1064_v53 = vld [vmem:[%s9795_s27 + $0x16a8] sm:$0xff] }
 0x589   : > { %v8081_v6 = vmax.f32 %v8073_v61, 0.0  ;;  %v8074_v13 = vadd.f32 %v8046_v60, %v8024_v63  ;;  %v871_v60 = vld [vmem:[%s9795_s27 + $0x10a0] sm:$0xff]  ;;  %v872_v63 = vld [vmem:[%s9795_s27 + $0x10a8] sm:$0xff] }
 0x58a   : > { %v879_v61 = vld [vmem:[%s9795_s27 + $0x10e0] sm:$0xff] }
 0x58b   : > { %8089 = vst [vmem:[%s10298_s20 + $0x10] sm:$0xff] %v8081_v6  ;;  %v8082_v8 = vmax.f32 %v8074_v13, 0.0  ;;  %v8792_v5 = vcombine.high %v871_v60, %v879_v61  ;;  %v8794_v6 = vcombine.high %v872_v63, %v880_v0  ;;  %v855_v13 = vld [vmem:[%s9795_s27 + $0x1020] sm:$0xff] }
 0x58c   : > { %7254 = vmatmul.mubr.bf16.vlgmr.msra.gmra.mxu0 %v9963_v38  ;;  %7295 = vmatmul.mubr.bf16.vlgmr.msra.gmra.mxu1 %v9967_v42  ;;  %v1087_v32 = vld [vmem:[%s9795_s27 + $0x1760] sm:$0xff] }
 0x58d   : > { %8090 = vst [vmem:[%s10298_s20 + $0x18] sm:$0xff] %v8082_v8  ;;  %7304 = vmatpush1.bf16.xpose.msra.mxu0 %v8887_v7  ;;  %7345 = vmatpush1.bf16.xpose.msra.mxu1 %v8889_v57  ;;  %v863_v7 = vld [vmem:[%s9795_s27 + $0x1060] sm:$0xff]  ;;  %v856_v57 = vld [vmem:[%s9795_s27 + $0x1028] sm:$0xff]  ;;  %v8791_v8 = vcombine.low %v871_v60, %v879_v61  ;;  %v9000_v37 = vcombine.high %v1079_v43, %v1087_v32 }
 0x58e   : > { %7305 = vmatprep.subr.bf16.mxu0 %v8872_v62  ;;  %7346 = vmatprep.subr.bf16.mxu1 %v8874_v9  ;;  %v864_v62 = vld [vmem:[%s9795_s27 + $0x1068] sm:$0xff]  ;;  %v8793_v9 = vcombine.low %v872_v63, %v880_v0  ;;  %v8776_v30 = vcombine.high %v855_v13, %v863_v7  ;;  %v1071_v50 = vld [vmem:[%s9795_s27 + $0x16e0] sm:$0xff] }
 0x58f   : > { %7335 = vmatprep.mubr.bf16.mxu0 %v9969_v48  ;;  %7376 = vmatprep.mubr.bf16.mxu1 %v9972_v49  ;;  %v8778_v10 = vcombine.high %v856_v57, %v864_v62 }
 0x595   : > { %7306 = vmatpush1.bf16.xpose.msra.mxu0 %v8871_v18  ;;  %7347 = vmatpush1.bf16.xpose.msra.mxu1 %v8873_v22  ;;  %v1096_v18 = vld [vmem:[%s9795_s27 + $0x17a8] sm:$0xff] }
 0x596   : > { %7307 = vmatprep.subr.bf16.mxu0 %v8856_v23  ;;  %7348 = vmatprep.subr.bf16.mxu1 %v8858_v24  ;;  %v1104_v22 = vld [vmem:[%s9795_s27 + $0x17e8] sm:$0xff]  ;;  %v8775_v23 = vcombine.low %v855_v13, %v863_v7  ;;  %v8777_v24 = vcombine.low %v856_v57, %v864_v62 }
 0x597   : > { %v9018_v31 = vcombine.high %v1096_v18, %v1104_v22 }
 0x59d   : > { %7308 = vmatpush1.bf16.xpose.msra.mxu0 %v8855_v3  ;;  %7349 = vmatpush1.bf16.xpose.msra.mxu1 %v8857_v52  ;;  %v1080_v3 = vld [vmem:[%s9795_s27 + $0x1728] sm:$0xff] }
 0x59e   : > { %7309 = vmatprep.subr.bf16.mxu0 %v8840_v33  ;;  %7350 = vmatprep.subr.bf16.mxu1 %v8842_v36  ;;  %v1088_v52 = vld [vmem:[%s9795_s27 + $0x1768] sm:$0xff]  ;;  %v9015_v33 = vcombine.low %v1095_v11, %v1103_v15  ;;  %v9017_v36 = vcombine.low %v1096_v18, %v1104_v22 }
 0x59f   : > { %v9002_v4 = vcombine.high %v1080_v3, %v1088_v52  ;;  %v9001_v60 = vcombine.low %v1080_v3, %v1088_v52 }
 0x5a5   : > { %7310 = vmatpush1.bf16.xpose.msra.mxu0 %v8839_v44  ;;  %7351 = vmatpush1.bf16.xpose.msra.mxu1 %v8841_v45 }
 0x5a6   : > { %7311 = vmatprep.subr.bf16.mxu0 %v8824_v21  ;;  %7352 = vmatprep.subr.bf16.mxu1 %v8826_v46  ;;  %v1063_v46 = vld [vmem:[%s9795_s27 + $0x16a0] sm:$0xff] }
 0x5a7   : > { %v8984_v61 = vcombine.high %v1063_v46, %v1071_v50  ;;  %v8983_v13 = vcombine.low %v1063_v46, %v1071_v50  ;;  %v983_v46 = vld [vmem:[%s9795_s27 + $0x1420] sm:$0xff] }
 0x5a8   : > { %v991_v50 = vld [vmem:[%s9795_s27 + $0x1460] sm:$0xff] }
 0x5ad   : > { %7312 = vmatpush1.bf16.xpose.msra.mxu0 %v8823_v54  ;;  %7353 = vmatpush1.bf16.xpose.msra.mxu1 %v8825_v55  ;;  %v1072_v54 = vld [vmem:[%s9795_s27 + $0x16e8] sm:$0xff] }
 0x5ae   : > { %7313 = vmatprep.subr.bf16.mxu0 %v8808_v58  ;;  %7354 = vmatprep.subr.bf16.mxu1 %v8810_v59  ;;  %v8999_v58 = vcombine.low %v1079_v43, %v1087_v32  ;;  %v8986_v0 = vcombine.high %v1064_v53, %v1072_v54  ;;  %v8985_v7 = vcombine.low %v1064_v53, %v1072_v54  ;;  %v992_v53 = vld [vmem:[%s9795_s27 + $0x1468] sm:$0xff] }
 0x5b5   : > { %7314 = vmatpush1.bf16.xpose.msra.mxu0 %v8807_v1  ;;  %7355 = vmatpush1.bf16.xpose.msra.mxu1 %v8809_v2  ;;  %v1047_v1 = vld [vmem:[%s9795_s27 + $0x1620] sm:$0xff] }
 0x5b6   : > { %7315 = vmatprep.subr.bf16.mxu0 %v8792_v5  ;;  %7356 = vmatprep.subr.bf16.mxu1 %v8794_v6  ;;  %v1055_v2 = vld [vmem:[%s9795_s27 + $0x1660] sm:$0xff]  ;;  %v1048_v5 = vld [vmem:[%s9795_s27 + $0x1628] sm:$0xff] }
 0x5b7   : > { %v1056_v6 = vld [vmem:[%s9795_s27 + $0x1668] sm:$0xff]  ;;  %v8968_v57 = vcombine.high %v1047_v1, %v1055_v2  ;;  %v8967_v11 = vcombine.low %v1047_v1, %v1055_v2  ;;  %v8903_v1 = vcombine.low %v983_v46, %v991_v50 }
 0x5b8   : > { %v8970_v62 = vcombine.high %v1048_v5, %v1056_v6  ;;  %v8969_v15 = vcombine.low %v1048_v5, %v1056_v6 }
 0x5bd   : > { %7316 = vmatpush1.bf16.xpose.msra.mxu0 %v8791_v8  ;;  %7357 = vmatpush1.bf16.xpose.msra.mxu1 %v8793_v9  ;;  %v1031_v8 = vld [vmem:[%s9795_s27 + $0x15a0] sm:$0xff] }
 0x5be   : > { %7317 = vmatprep.subr.bf16.mxu0 %v8776_v30  ;;  %7358 = vmatprep.subr.bf16.mxu1 %v8778_v10  ;;  %v1039_v9 = vld [vmem:[%s9795_s27 + $0x15e0] sm:$0xff]  ;;  %v1032_v30 = vld [vmem:[%s9795_s27 + $0x15a8] sm:$0xff] }
 0x5bf   : > { %v1040_v10 = vld [vmem:[%s9795_s27 + $0x15e8] sm:$0xff]  ;;  %v8952_v18 = vcombine.high %v1031_v8, %v1039_v9  ;;  %v8951_v43 = vcombine.low %v1031_v8, %v1039_v9 }
 0x5c0   : > { %v8954_v22 = vcombine.high %v1032_v30, %v1040_v10  ;;  %v8953_v32 = vcombine.low %v1032_v30, %v1040_v10 }
 0x5c5   : > { %7318 = vmatpush1.bf16.xpose.msra.mxu0 %v8775_v23  ;;  %7359 = vmatpush1.bf16.xpose.msra.mxu1 %v8777_v24  ;;  %v1015_v23 = vld [vmem:[%s9795_s27 + $0x1520] sm:$0xff] }
 0x5c6   : > { %7319 = vmatprep.subr.bf16.mxu0 %v9016_v25  ;;  %7360 = vmatprep.subr.bf16.mxu1 %v9018_v31  ;;  %v1023_v24 = vld [vmem:[%s9795_s27 + $0x1560] sm:$0xff]  ;;  %v1016_v25 = vld [vmem:[%s9795_s27 + $0x1528] sm:$0xff] }
 0x5c7   : > { %v1024_v31 = vld [vmem:[%s9795_s27 + $0x1568] sm:$0xff]  ;;  %v8936_v3 = vcombine.high %v1015_v23, %v1023_v24 }
 0x5c8   : > { %v8938_v52 = vcombine.high %v1016_v25, %v1024_v31 }
 0x5cc   : > { %v7173_v39 = vpop.f32.mrf.mxu0  ;;  %v7214_v41 = vpop.f32.mrf.mxu1 }
 0x5cd   : > { %7320 = vmatpush2.bf16.xpose.msra.mxu0 %v9015_v33  ;;  %v10646_v44 = vadd.f32 %v7214_v41, %v7173_v39  ;;  %7361 = vmatpush2.bf16.xpose.msra.mxu1 %v9017_v36  ;;  %v999_v33 = vld [vmem:[%s9795_s27 + $0x14a0] sm:$0xff]  ;;  %v8935_v39 = vcombine.low %v1015_v23, %v1023_v24  ;;  %v8937_v41 = vcombine.low %v1016_v25, %v1024_v31 }
 0x5ce   : > { %v7175_v45 = vpop.f32.mrf.mxu0  ;;  %7321 = vmatprep.subr.bf16.mxu0 %v9000_v37  ;;  %v7216_v21 = vpop.f32.mrf.mxu1  ;;  %7362 = vmatprep.subr.bf16.mxu1 %v9002_v4  ;;  %v1007_v36 = vld [vmem:[%s9795_s27 + $0x14e0] sm:$0xff]  ;;  %v1000_v37 = vld [vmem:[%s9795_s27 + $0x14a8] sm:$0xff] }
 0x5cf   : > { %v10650_v51 = vadd.f32 %v7216_v21, %v7175_v45  ;;  %v1008_v4 = vld [vmem:[%s9795_s27 + $0x14e8] sm:$0xff]  ;;  %v8920_v45 = vcombine.high %v999_v33, %v1007_v36  ;;  %v8919_v54 = vcombine.low %v999_v33, %v1007_v36 }
 0x5d0   : > { %v7177_v56 = vpop.f32.mrf.mxu0  ;;  %v7218_v55 = vpop.f32.mrf.mxu1  ;;  %v8922_v21 = vcombine.high %v1000_v37, %v1008_v4 }
 0x5d1   : > { %v984_v56 = vld [vmem:[%s9795_s27 + $0x1428] sm:$0xff]  ;;  %v8921_v55 = vcombine.low %v1000_v37, %v1008_v4 }
 0x5d2   : > { %v7178_v59 = vpop.f32.mrf.mxu0  ;;  %v7219_v63 = vpop.f32.mrf.mxu1  ;;  %v8905_v2 = vcombine.low %v984_v56, %v992_v53 }
 0x5d3   : > { %v8906_v59 = vcombine.high %v984_v56, %v992_v53  ;;  %v970_v63 = vld [vmem:[%s9795_s27 + $0x13b8] sm:$0xff] }
 0x5d5   : > { %7322 = vmatpush2.bf16.xpose.msra.mxu0 %v8999_v58  ;;  %7363 = vmatpush2.bf16.xpose.msra.mxu1 %v9001_v60  ;;  %v8904_v58 = vcombine.high %v983_v46, %v991_v50  ;;  %v969_v60 = vld [vmem:[%s9795_s27 + $0x13b0] sm:$0xff] }
 0x5d6   : > { %7323 = vmatprep.subr.bf16.mxu0 %v8984_v61  ;;  %7364 = vmatprep.subr.bf16.mxu1 %v8986_v0  ;;  %v977_v61 = vld [vmem:[%s9795_s27 + $0x13f0] sm:$0xff]  ;;  %v978_v0 = vld [vmem:[%s9795_s27 + $0x13f8] sm:$0xff] }
 0x5d7   : > { %v8892_v5 = vcombine.high %v969_v60, %v977_v61  ;;  %v8894_v6 = vcombine.high %v970_v63, %v978_v0  ;;  %v8891_v8 = vcombine.low %v969_v60, %v977_v61  ;;  %v8893_v9 = vcombine.low %v970_v63, %v978_v0 }
 0x5dd   : > { %7324 = vmatpush2.bf16.xpose.msra.mxu0 %v8983_v13  ;;  %7365 = vmatpush2.bf16.xpose.msra.mxu1 %v8985_v7  ;;  %v953_v13 = vld [vmem:[%s9795_s27 + $0x1330] sm:$0xff] }
 0x5de   : > { %7325 = vmatprep.subr.bf16.mxu0 %v8968_v57  ;;  %7366 = vmatprep.subr.bf16.mxu1 %v8970_v62  ;;  %v961_v7 = vld [vmem:[%s9795_s27 + $0x1370] sm:$0xff]  ;;  %v954_v57 = vld [vmem:[%s9795_s27 + $0x1338] sm:$0xff] }
 0x5df   : > { %v962_v62 = vld [vmem:[%s9795_s27 + $0x1378] sm:$0xff]  ;;  %v8876_v30 = vcombine.high %v953_v13, %v961_v7  ;;  %v8875_v23 = vcombine.low %v953_v13, %v961_v7 }
 0x5e0   : > { %v8878_v10 = vcombine.high %v954_v57, %v962_v62  ;;  %v8877_v24 = vcombine.low %v954_v57, %v962_v62 }
 0x5e5   : > { %7326 = vmatpush2.bf16.xpose.msra.mxu0 %v8967_v11  ;;  %7367 = vmatpush2.bf16.xpose.msra.mxu1 %v8969_v15  ;;  %v937_v11 = vld [vmem:[%s9795_s27 + $0x12b0] sm:$0xff] }
 0x5e6   : > { %7327 = vmatprep.subr.bf16.mxu0 %v8952_v18  ;;  %7368 = vmatprep.subr.bf16.mxu1 %v8954_v22  ;;  %v945_v15 = vld [vmem:[%s9795_s27 + $0x12f0] sm:$0xff]  ;;  %v938_v18 = vld [vmem:[%s9795_s27 + $0x12b8] sm:$0xff] }
 0x5e7   : > { %v946_v22 = vld [vmem:[%s9795_s27 + $0x12f8] sm:$0xff]  ;;  %v8860_v25 = vcombine.high %v937_v11, %v945_v15  ;;  %v8859_v33 = vcombine.low %v937_v11, %v945_v15 }
 0x5e8   : > { %v8862_v31 = vcombine.high %v938_v18, %v946_v22  ;;  %v8861_v36 = vcombine.low %v938_v18, %v946_v22 }
 0x5ed   : > { %7328 = vmatpush2.bf16.xpose.msra.mxu0 %v8951_v43  ;;  %7369 = vmatpush2.bf16.xpose.msra.mxu1 %v8953_v32  ;;  %v921_v43 = vld [vmem:[%s9795_s27 + $0x1230] sm:$0xff] }
 0x5ee   : > { %7329 = vmatprep.subr.bf16.mxu0 %v8936_v3  ;;  %7370 = vmatprep.subr.bf16.mxu1 %v8938_v52  ;;  %v929_v32 = vld [vmem:[%s9795_s27 + $0x1270] sm:$0xff]  ;;  %v922_v3 = vld [vmem:[%s9795_s27 + $0x1238] sm:$0xff] }
 0x5ef   : > { %v930_v52 = vld [vmem:[%s9795_s27 + $0x1278] sm:$0xff]  ;;  %v8844_v37 = vcombine.high %v921_v43, %v929_v32  ;;  %v8843_v46 = vcombine.low %v921_v43, %v929_v32 }
 0x5f0   : > { %v8846_v4 = vcombine.high %v922_v3, %v930_v52  ;;  %v8845_v50 = vcombine.low %v922_v3, %v930_v52 }
 0x5f5   : > { %7330 = vmatpush2.bf16.xpose.msra.mxu0 %v8935_v39  ;;  %7371 = vmatpush2.bf16.xpose.msra.mxu1 %v8937_v41  ;;  %v905_v39 = vld [vmem:[%s9795_s27 + $0x11b0] sm:$0xff] }
 0x5f6   : > { %7331 = vmatprep.subr.bf16.mxu0 %v8920_v45  ;;  %7372 = vmatprep.subr.bf16.mxu1 %v8922_v21  ;;  %v913_v41 = vld [vmem:[%s9795_s27 + $0x11f0] sm:$0xff]  ;;  %v906_v45 = vld [vmem:[%s9795_s27 + $0x11b8] sm:$0xff] }
 0x5f7   : > { %v914_v21 = vld [vmem:[%s9795_s27 + $0x11f8] sm:$0xff]  ;;  %v8828_v56 = vcombine.high %v905_v39, %v913_v41  ;;  %v8827_v60 = vcombine.low %v905_v39, %v913_v41 }
 0x5f8   : > { %v8830_v53 = vcombine.high %v906_v45, %v914_v21  ;;  %v8829_v61 = vcombine.low %v906_v45, %v914_v21 }
 0x5fd   : > { %7332 = vmatpush2.bf16.xpose.msra.mxu0 %v8919_v54  ;;  %7373 = vmatpush2.bf16.xpose.msra.mxu1 %v8921_v55  ;;  %v889_v54 = vld [vmem:[%s9795_s27 + $0x1130] sm:$0xff] }
 0x5fe   : > { %7333 = vmatprep.subr.bf16.mxu0 %v8904_v58  ;;  %7374 = vmatprep.subr.bf16.mxu1 %v8906_v59  ;;  %v897_v55 = vld [vmem:[%s9795_s27 + $0x1170] sm:$0xff]  ;;  %v890_v58 = vld [vmem:[%s9795_s27 + $0x1138] sm:$0xff] }
 0x5ff   : > { %v898_v59 = vld [vmem:[%s9795_s27 + $0x1178] sm:$0xff]  ;;  %v8812_v63 = vcombine.high %v889_v54, %v897_v55  ;;  %v8811_v13 = vcombine.low %v889_v54, %v897_v55 }
 0x600   : > { %v8814_v0 = vcombine.high %v890_v58, %v898_v59  ;;  %v8813_v7 = vcombine.low %v890_v58, %v898_v59  ;;  %v1065_v59 = vld [vmem:[%s9795_s27 + $0x16b0] sm:$0xff] }
 0x605   : > { %7334 = vmatpush2.bf16.xpose.msra.mxu0 %v8903_v1  ;;  %7375 = vmatpush2.bf16.xpose.msra.mxu1 %v8905_v2  ;;  %v873_v1 = vld [vmem:[%s9795_s27 + $0x10b0] sm:$0xff] }
 0x606   : > { %7385 = vmatprep.subr.bf16.mxu0 %v8892_v5  ;;  %7426 = vmatprep.subr.bf16.mxu1 %v8894_v6  ;;  %v881_v2 = vld [vmem:[%s9795_s27 + $0x10f0] sm:$0xff]  ;;  %v874_v5 = vld [vmem:[%s9795_s27 + $0x10b8] sm:$0xff] }
 0x607   : > { %v882_v6 = vld [vmem:[%s9795_s27 + $0x10f8] sm:$0xff]  ;;  %v8796_v57 = vcombine.high %v873_v1, %v881_v2  ;;  %v8795_v11 = vcombine.low %v873_v1, %v881_v2 }
 0x608   : > { %v8798_v62 = vcombine.high %v874_v5, %v882_v6  ;;  %v8797_v15 = vcombine.low %v874_v5, %v882_v6 }
 0x60c   : > { %7336 = vmatmul.mubr.bf16.vlgmr.msra.gmra.mxu0 %v10043_v14  ;;  %7377 = vmatmul.mubr.bf16.vlgmr.msra.gmra.mxu1 %v10047_v19 }
 0x60d   : > { %7386 = vmatpush1.bf16.xpose.msra.mxu0 %v8891_v8  ;;  %7427 = vmatpush1.bf16.xpose.msra.mxu1 %v8893_v9  ;;  %v857_v8 = vld [vmem:[%s9795_s27 + $0x1030] sm:$0xff] }
 0x60e   : > { %7387 = vmatprep.subr.bf16.mxu0 %v8876_v30  ;;  %7428 = vmatprep.subr.bf16.mxu1 %v8878_v10  ;;  %v865_v9 = vld [vmem:[%s9795_s27 + $0x1070] sm:$0xff]  ;;  %v858_v30 = vld [vmem:[%s9795_s27 + $0x1038] sm:$0xff] }
 0x60f   : > { %7417 = vmatprep.mubr.bf16.mxu0 %v10049_v28  ;;  %7458 = vmatprep.mubr.bf16.mxu1 %v10052_v29  ;;  %v866_v10 = vld [vmem:[%s9795_s27 + $0x1078] sm:$0xff]  ;;  %v8780_v18 = vcombine.high %v857_v8, %v865_v9  ;;  %v8779_v43 = vcombine.low %v857_v8, %v865_v9 }
 0x610   : > { %v8782_v22 = vcombine.high %v858_v30, %v866_v10  ;;  %v8781_v32 = vcombine.low %v858_v30, %v866_v10  ;;  %v1050_v8 = vld [vmem:[%s9795_s27 + $0x1638] sm:$0xff] }
 0x611   : > { %v1058_v9 = vld [vmem:[%s9795_s27 + $0x1678] sm:$0xff] }
 0x615   : > { %7388 = vmatpush1.bf16.xpose.msra.mxu0 %v8875_v23  ;;  %7429 = vmatpush1.bf16.xpose.msra.mxu1 %v8877_v24  ;;  %v1097_v23 = vld [vmem:[%s9795_s27 + $0x17b0] sm:$0xff] }
 0x616   : > { %7389 = vmatprep.subr.bf16.mxu0 %v8860_v25  ;;  %7430 = vmatprep.subr.bf16.mxu1 %v8862_v31  ;;  %v1105_v24 = vld [vmem:[%s9795_s27 + $0x17f0] sm:$0xff]  ;;  %v1098_v25 = vld [vmem:[%s9795_s27 + $0x17b8] sm:$0xff] }
 0x617   : > { %v1106_v31 = vld [vmem:[%s9795_s27 + $0x17f8] sm:$0xff]  ;;  %v9020_v3 = vcombine.high %v1097_v23, %v1105_v24  ;;  %v9019_v39 = vcombine.low %v1097_v23, %v1105_v24 }
 0x618   : > { %v9022_v52 = vcombine.high %v1098_v25, %v1106_v31  ;;  %v9021_v41 = vcombine.low %v1098_v25, %v1106_v31  ;;  %v1034_v23 = vld [vmem:[%s9795_s27 + $0x15b8] sm:$0xff]  ;;  %v8973_v31 = vcombine.low %v1050_v8, %v1058_v9 }
 0x619   : > { %v1042_v24 = vld [vmem:[%s9795_s27 + $0x15f8] sm:$0xff] }
 0x61d   : > { %7390 = vmatpush1.bf16.xpose.msra.mxu0 %v8859_v33  ;;  %7431 = vmatpush1.bf16.xpose.msra.mxu1 %v8861_v36  ;;  %v1081_v33 = vld [vmem:[%s9795_s27 + $0x1730] sm:$0xff] }
 0x61e   : > { %7391 = vmatprep.subr.bf16.mxu0 %v8844_v37  ;;  %7432 = vmatprep.subr.bf16.mxu1 %v8846_v4  ;;  %v1089_v36 = vld [vmem:[%s9795_s27 + $0x1770] sm:$0xff]  ;;  %v1082_v37 = vld [vmem:[%s9795_s27 + $0x1738] sm:$0xff] }
 0x61f   : > { %v1090_v4 = vld [vmem:[%s9795_s27 + $0x1778] sm:$0xff]  ;;  %v9004_v45 = vcombine.high %v1081_v33, %v1089_v36  ;;  %v9003_v2 = vcombine.low %v1081_v33, %v1089_v36 }
 0x620   : > { %v9006_v21 = vcombine.high %v1082_v37, %v1090_v4  ;;  %v9005_v6 = vcombine.low %v1082_v37, %v1090_v4  ;;  %v1018_v33 = vld [vmem:[%s9795_s27 + $0x1538] sm:$0xff]  ;;  %v8957_v4 = vcombine.low %v1034_v23, %v1042_v24 }
 0x621   : > { %v1026_v36 = vld [vmem:[%s9795_s27 + $0x1578] sm:$0xff] }
 0x625   : > { %7392 = vmatpush1.bf16.xpose.msra.mxu0 %v8843_v46  ;;  %7433 = vmatpush1.bf16.xpose.msra.mxu1 %v8845_v50 }
 0x626   : > { %7393 = vmatprep.subr.bf16.mxu0 %v8828_v56  ;;  %7434 = vmatprep.subr.bf16.mxu1 %v8830_v53 }
 0x62d   : > { %7394 = vmatpush1.bf16.xpose.msra.mxu0 %v8827_v60  ;;  %7435 = vmatpush1.bf16.xpose.msra.mxu1 %v8829_v61  ;;  %v1073_v60 = vld [vmem:[%s9795_s27 + $0x16f0] sm:$0xff] }
 0x62e   : > { %7395 = vmatprep.subr.bf16.mxu0 %v8812_v63  ;;  %7436 = vmatprep.subr.bf16.mxu1 %v8814_v0  ;;  %v1066_v63 = vld [vmem:[%s9795_s27 + $0x16b8] sm:$0xff]  ;;  %v8987_v30 = vcombine.low %v1065_v59, %v1073_v60 }
 0x62f   : > { %v1074_v0 = vld [vmem:[%s9795_s27 + $0x16f8] sm:$0xff] }
 0x630   : > { %v8989_v10 = vcombine.low %v1066_v63, %v1074_v0 }
 0x635   : > { %7396 = vmatpush1.bf16.xpose.msra.mxu0 %v8811_v13  ;;  %7437 = vmatpush1.bf16.xpose.msra.mxu1 %v8813_v7  ;;  %v8988_v13 = vcombine.high %v1065_v59, %v1073_v60  ;;  %v985_v59 = vld [vmem:[%s9795_s27 + $0x1430] sm:$0xff] }
 0x636   : > { %7397 = vmatprep.subr.bf16.mxu0 %v8796_v57  ;;  %7438 = vmatprep.subr.bf16.mxu1 %v8798_v62  ;;  %v1049_v57 = vld [vmem:[%s9795_s27 + $0x1630] sm:$0xff] }
 0x637   : > { %v1057_v62 = vld [vmem:[%s9795_s27 + $0x1670] sm:$0xff] }
 0x638   : > { %v8971_v25 = vcombine.low %v1049_v57, %v1057_v62  ;;  %v993_v60 = vld [vmem:[%s9795_s27 + $0x1470] sm:$0xff] }
 0x63d   : > { %7398 = vmatpush1.bf16.xpose.msra.mxu0 %v8795_v11  ;;  %7439 = vmatpush1.bf16.xpose.msra.mxu1 %v8797_v15  ;;  %v8972_v11 = vcombine.high %v1049_v57, %v1057_v62  ;;  %v8974_v15 = vcombine.high %v1050_v8, %v1058_v9  ;;  %v8907_v57 = vcombine.low %v985_v59, %v993_v60 }
 0x63e   : > { %7399 = vmatprep.subr.bf16.mxu0 %v8780_v18  ;;  %7440 = vmatprep.subr.bf16.mxu1 %v8782_v22  ;;  %v1033_v18 = vld [vmem:[%s9795_s27 + $0x15b0] sm:$0xff] }
 0x63f   : > { %v1041_v22 = vld [vmem:[%s9795_s27 + $0x15f0] sm:$0xff] }
 0x640   : > { %v8955_v37 = vcombine.low %v1033_v18, %v1041_v22 }
 0x645   : > { %7400 = vmatpush1.bf16.xpose.msra.mxu0 %v8779_v43  ;;  %7441 = vmatpush1.bf16.xpose.msra.mxu1 %v8781_v32  ;;  %v8956_v43 = vcombine.high %v1033_v18, %v1041_v22  ;;  %v8958_v32 = vcombine.high %v1034_v23, %v1042_v24 }
 0x646   : > { %7401 = vmatprep.subr.bf16.mxu0 %v9020_v3  ;;  %7442 = vmatprep.subr.bf16.mxu1 %v9022_v52  ;;  %v1017_v3 = vld [vmem:[%s9795_s27 + $0x1530] sm:$0xff] }
 0x647   : > { %v1025_v52 = vld [vmem:[%s9795_s27 + $0x1570] sm:$0xff] }
 0x64c   : > { %v7255_v46 = vpop.f32.mrf.mxu0  ;;  %v7296_v56 = vpop.f32.mrf.mxu1 }
 0x64d   : > { %v7256_v50 = vadd.f32 %v7255_v46, %v10646_v44  ;;  %7402 = vmatpush2.bf16.xpose.msra.mxu0 %v9019_v39  ;;  %7443 = vmatpush2.bf16.xpose.msra.mxu1 %v9021_v41  ;;  %v8940_v39 = vcombine.high %v1017_v3, %v1025_v52  ;;  %v8942_v41 = vcombine.high %v1018_v33, %v1026_v36  ;;  %v1002_v46 = vld [vmem:[%s9795_s27 + $0x14b8] sm:$0xff] }
 0x64e   : > { %v7257_v53 = vpop.f32.mrf.mxu0  ;;  %7403 = vmatprep.subr.bf16.mxu0 %v9004_v45  ;;  %v7298_v58 = vpop.f32.mrf.mxu1  ;;  %7444 = vmatprep.subr.bf16.mxu1 %v9006_v21  ;;  %v1001_v45 = vld [vmem:[%s9795_s27 + $0x14b0] sm:$0xff] }
 0x64f   : > { %v10719_v54 = vadd.f32 %v7296_v56, %v7256_v50  ;;  %v7258_v55 = vadd.f32 %v7257_v53, %v10650_v51  ;;  %v8990_v51 = vcombine.high %v1066_v63, %v1074_v0  ;;  %v1009_v21 = vld [vmem:[%s9795_s27 + $0x14f0] sm:$0xff]  ;;  %v1010_v50 = vld [vmem:[%s9795_s27 + $0x14f8] sm:$0xff]  ;;  %v8939_v56 = vcombine.low %v1017_v3, %v1025_v52 }
 0x650   : > { %v7259_v61 = vpop.f32.mrf.mxu0  ;;  %v7300_v1 = vpop.f32.mrf.mxu1  ;;  %v8941_v53 = vcombine.low %v1018_v33, %v1026_v36  ;;  %v994_v63 = vld [vmem:[%s9795_s27 + $0x1478] sm:$0xff]  ;;  %v8923_v0 = vcombine.low %v1001_v45, %v1009_v21 }
 0x651   : > { %v10726_v44 = vadd.f32 %v7298_v58, %v7258_v55  ;;  %v8924_v55 = vcombine.high %v1001_v45, %v1009_v21  ;;  %v8926_v58 = vcombine.high %v1002_v46, %v1010_v50  ;;  %v986_v61 = vld [vmem:[%s9795_s27 + $0x1438] sm:$0xff]  ;;  %v8925_v1 = vcombine.low %v1002_v46, %v1010_v50  ;;  %v1155_v46 = vld [vmem:[%s9795_s27 + $0x1980] sm:$0xff] }
 0x652   : > { %v7260_v5 = vpop.f32.mrf.mxu0  ;;  %v7301_v7 = vpop.f32.mrf.mxu1  ;;  %v8909_v62 = vcombine.low %v986_v61, %v994_v63  ;;  %v1163_v50 = vld [vmem:[%s9795_s27 + $0x19c0] sm:$0xff] }
 0x653   : > { %v8910_v5 = vcombine.high %v986_v61, %v994_v63  ;;  %v1220_v7 = vld [vmem:[%s9795_s27 + $0x1b88] sm:$0xff]  ;;  %v1139_v61 = vld [vmem:[%s9795_s27 + $0x1900] sm:$0xff] }
 0x654   : > { %v1147_v63 = vld [vmem:[%s9795_s27 + $0x1940] sm:$0xff] }
 0x655   : > { %7404 = vmatpush2.bf16.xpose.msra.mxu0 %v9003_v2  ;;  %7445 = vmatpush2.bf16.xpose.msra.mxu1 %v9005_v6  ;;  %v8908_v2 = vcombine.high %v985_v59, %v993_v60  ;;  %v1219_v6 = vld [vmem:[%s9795_s27 + $0x1b80] sm:$0xff]  ;;  %v9072_v59 = vcombine.high %v1155_v46, %v1163_v50 }
 0x656   : > { %7405 = vmatprep.subr.bf16.mxu0 %v8988_v13  ;;  %7446 = vmatprep.subr.bf16.mxu1 %v8990_v51  ;;  %v1227_v13 = vld [vmem:[%s9795_s27 + $0x1bc0] sm:$0xff]  ;;  %v1228_v51 = vld [vmem:[%s9795_s27 + $0x1bc8] sm:$0xff] }
 0x657   : > { %v9136_v8 = vcombine.high %v1219_v6, %v1227_v13  ;;  %v9138_v9 = vcombine.high %v1220_v7, %v1228_v51  ;;  %v9135_v18 = vcombine.low %v1219_v6, %v1227_v13  ;;  %v9137_v22 = vcombine.low %v1220_v7, %v1228_v51  ;;  %v1123_v7 = vld [vmem:[%s9795_s27 + $0x1880] sm:$0xff] }
 0x658   : > { %v9056_v6 = vcombine.high %v1139_v61, %v1147_v63  ;;  %v1131_v51 = vld [vmem:[%s9795_s27 + $0x18c0] sm:$0xff] }
 0x65d   : > { %7406 = vmatpush2.bf16.xpose.msra.mxu0 %v8987_v30  ;;  %7447 = vmatpush2.bf16.xpose.msra.mxu1 %v8989_v10  ;;  %v1203_v30 = vld [vmem:[%s9795_s27 + $0x1b00] sm:$0xff] }
 0x65e   : > { %7407 = vmatprep.subr.bf16.mxu0 %v8972_v11  ;;  %7448 = vmatprep.subr.bf16.mxu1 %v8974_v15  ;;  %v1211_v10 = vld [vmem:[%s9795_s27 + $0x1b40] sm:$0xff]  ;;  %v1204_v11 = vld [vmem:[%s9795_s27 + $0x1b08] sm:$0xff] }
 0x65f   : > { %v1212_v15 = vld [vmem:[%s9795_s27 + $0x1b48] sm:$0xff]  ;;  %v9120_v23 = vcombine.high %v1203_v30, %v1211_v10  ;;  %v9119_v3 = vcombine.low %v1203_v30, %v1211_v10  ;;  %v9040_v30 = vcombine.high %v1123_v7, %v1131_v51 }
 0x660   : > { %v9122_v24 = vcombine.high %v1204_v11, %v1212_v15  ;;  %v9121_v52 = vcombine.low %v1204_v11, %v1212_v15  ;;  %v1107_v11 = vld [vmem:[%s9795_s27 + $0x1800] sm:$0xff] }
 0x661   : > { %v1115_v15 = vld [vmem:[%s9795_s27 + $0x1840] sm:$0xff] }
 0x665   : > { %7408 = vmatpush2.bf16.xpose.msra.mxu0 %v8971_v25  ;;  %7449 = vmatpush2.bf16.xpose.msra.mxu1 %v8973_v31  ;;  %v1187_v25 = vld [vmem:[%s9795_s27 + $0x1a80] sm:$0xff] }
 0x666   : > { %7409 = vmatprep.subr.bf16.mxu0 %v8956_v43  ;;  %7450 = vmatprep.subr.bf16.mxu1 %v8958_v32  ;;  %v1195_v31 = vld [vmem:[%s9795_s27 + $0x1ac0] sm:$0xff]  ;;  %v1188_v43 = vld [vmem:[%s9795_s27 + $0x1a88] sm:$0xff] }
 0x667   : > { %v1196_v32 = vld [vmem:[%s9795_s27 + $0x1ac8] sm:$0xff]  ;;  %v9104_v33 = vcombine.high %v1187_v25, %v1195_v31 }
 0x668   : > { %v9106_v36 = vcombine.high %v1188_v43, %v1196_v32  ;;  %v9105_v45 = vcombine.low %v1188_v43, %v1196_v32  ;;  %v1347_v43 = vld [vmem:[%s9795_s27 + $0x1f80] sm:$0xff] }
 0x669   : > { %v1355_v32 = vld [vmem:[%s9795_s27 + $0x1fc0] sm:$0xff] }
 0x66d   : > { %7410 = vmatpush2.bf16.xpose.msra.mxu0 %v8955_v37  ;;  %7451 = vmatpush2.bf16.xpose.msra.mxu1 %v8957_v4  ;;  %v1171_v37 = vld [vmem:[%s9795_s27 + $0x1a00] sm:$0xff] }
 0x66e   : > { %7411 = vmatprep.subr.bf16.mxu0 %v8940_v39  ;;  %7452 = vmatprep.subr.bf16.mxu1 %v8942_v41  ;;  %v1179_v4 = vld [vmem:[%s9795_s27 + $0x1a40] sm:$0xff]  ;;  %v1172_v39 = vld [vmem:[%s9795_s27 + $0x1a08] sm:$0xff]  ;;  %v9103_v41 = vcombine.low %v1187_v25, %v1195_v31  ;;  %v9024_v25 = vcombine.high %v1107_v11, %v1115_v15 }
 0x66f   : > { %v9088_v21 = vcombine.high %v1171_v37, %v1179_v4 }
 0x675   : > { %7412 = vmatpush2.bf16.xpose.msra.mxu0 %v8939_v56  ;;  %7453 = vmatpush2.bf16.xpose.msra.mxu1 %v8941_v53  ;;  %v1156_v56 = vld [vmem:[%s9795_s27 + $0x1988] sm:$0xff] }
 0x676   : > { %7413 = vmatprep.subr.bf16.mxu0 %v8924_v55  ;;  %7454 = vmatprep.subr.bf16.mxu1 %v8926_v58  ;;  %v1164_v53 = vld [vmem:[%s9795_s27 + $0x19c8] sm:$0xff]  ;;  %v9087_v55 = vcombine.low %v1171_v37, %v1179_v4  ;;  %v9264_v37 = vcombine.high %v1347_v43, %v1355_v32 }
 0x677   : > { %v9074_v60 = vcombine.high %v1156_v56, %v1164_v53 }
 0x67d   : > { %7414 = vmatpush2.bf16.xpose.msra.mxu0 %v8923_v0  ;;  %7455 = vmatpush2.bf16.xpose.msra.mxu1 %v8925_v1  ;;  %v1140_v0 = vld [vmem:[%s9795_s27 + $0x1908] sm:$0xff] }
 0x67e   : > { %7415 = vmatprep.subr.bf16.mxu0 %v8908_v2  ;;  %7456 = vmatprep.subr.bf16.mxu1 %v8910_v5  ;;  %v1148_v1 = vld [vmem:[%s9795_s27 + $0x1948] sm:$0xff]  ;;  %v9071_v2 = vcombine.low %v1155_v46, %v1163_v50  ;;  %v9073_v5 = vcombine.low %v1156_v56, %v1164_v53 }
 0x67f   : > { %v9058_v13 = vcombine.high %v1140_v0, %v1148_v1 }
 0x685   : > { %7416 = vmatpush2.bf16.xpose.msra.mxu0 %v8907_v57  ;;  %7457 = vmatpush2.bf16.xpose.msra.mxu1 %v8909_v62  ;;  %v1124_v57 = vld [vmem:[%s9795_s27 + $0x1888] sm:$0xff] }
 0x686   : > { %7467 = vmatprep.subr.bf16.mxu0 %v9136_v8  ;;  %7508 = vmatprep.subr.bf16.mxu1 %v9138_v9  ;;  %v1132_v62 = vld [vmem:[%s9795_s27 + $0x18c8] sm:$0xff]  ;;  %v9055_v8 = vcombine.low %v1139_v61, %v1147_v63  ;;  %v9057_v9 = vcombine.low %v1140_v0, %v1148_v1  ;;  %v1315_v63 = vld [vmem:[%s9795_s27 + $0x1e80] sm:$0xff] }
 0x687   : > { %v9042_v10 = vcombine.high %v1124_v57, %v1132_v62  ;;  %v1323_v0 = vld [vmem:[%s9795_s27 + $0x1ec0] sm:$0xff] }
 0x68c   : > { %7418 = vmatmul.mubr.bf16.vlgmr.msra.gmra.mxu0 %v10125_v12  ;;  %7459 = vmatmul.mubr.bf16.vlgmr.msra.gmra.mxu1 %v10129_v17 }
 0x68d   : > { %7468 = vmatpush1.bf16.xpose.msra.mxu0 %v9135_v18  ;;  %7509 = vmatpush1.bf16.xpose.msra.mxu1 %v9137_v22  ;;  %v1108_v18 = vld [vmem:[%s9795_s27 + $0x1808] sm:$0xff] }
 0x68e   : > { %7469 = vmatprep.subr.bf16.mxu0 %v9120_v23  ;;  %7510 = vmatprep.subr.bf16.mxu1 %v9122_v24  ;;  %v1116_v22 = vld [vmem:[%s9795_s27 + $0x1848] sm:$0xff]  ;;  %v9039_v23 = vcombine.low %v1123_v7, %v1131_v51  ;;  %v9041_v24 = vcombine.low %v1124_v57, %v1132_v62  ;;  %v9232_v57 = vcombine.high %v1315_v63, %v1323_v0 }
 0x68f   : > { %7499 = vmatprep.mubr.bf16.mxu0 %v9829_v34  ;;  %7540 = vmatprep.mubr.bf16.mxu1 %v9831_v35  ;;  %v1180_v34 = vld [vmem:[%s9795_s27 + $0x1a48] sm:$0xff]  ;;  %v9026_v31 = vcombine.high %v1108_v18, %v1116_v22 }
 0x690   : > { %v9090_v35 = vcombine.high %v1172_v39, %v1180_v34  ;;  %v9089_v58 = vcombine.low %v1172_v39, %v1180_v34  ;;  %v1331_v39 = vld [vmem:[%s9795_s27 + $0x1f00] sm:$0xff] }
 0x691   : > { %v1339_v34 = vld [vmem:[%s9795_s27 + $0x1f40] sm:$0xff] }
 0x692   : > { %v9248_v46 = vcombine.high %v1331_v39, %v1339_v34 }
 0x695   : > { %7470 = vmatpush1.bf16.xpose.msra.mxu0 %v9119_v3  ;;  %7511 = vmatpush1.bf16.xpose.msra.mxu1 %v9121_v52  ;;  %v1348_v3 = vld [vmem:[%s9795_s27 + $0x1f88] sm:$0xff] }
 0x696   : > { %7471 = vmatprep.subr.bf16.mxu0 %v9104_v33  ;;  %7512 = vmatprep.subr.bf16.mxu1 %v9106_v36  ;;  %v1356_v52 = vld [vmem:[%s9795_s27 + $0x1fc8] sm:$0xff]  ;;  %v9023_v33 = vcombine.low %v1107_v11, %v1115_v15  ;;  %v9025_v36 = vcombine.low %v1108_v18, %v1116_v22  ;;  %v9231_v11 = vcombine.low %v1315_v63, %v1323_v0 }
 0x697   : > { %v9266_v4 = vcombine.high %v1348_v3, %v1356_v52  ;;  %v1236_v63 = vld [vmem:[%s9795_s27 + $0x1c08] sm:$0xff] }
 0x698   : > { %v1244_v0 = vld [vmem:[%s9795_s27 + $0x1c48] sm:$0xff] }
 0x69d   : > { %7472 = vmatpush1.bf16.xpose.msra.mxu0 %v9103_v41  ;;  %7513 = vmatpush1.bf16.xpose.msra.mxu1 %v9105_v45  ;;  %v1332_v41 = vld [vmem:[%s9795_s27 + $0x1f08] sm:$0xff] }
 0x69e   : > { %7473 = vmatprep.subr.bf16.mxu0 %v9088_v21  ;;  %7514 = vmatprep.subr.bf16.mxu1 %v9090_v35  ;;  %v1340_v45 = vld [vmem:[%s9795_s27 + $0x1f48] sm:$0xff]  ;;  %v9263_v21 = vcombine.low %v1347_v43, %v1355_v32  ;;  %v9265_v35 = vcombine.low %v1348_v3, %v1356_v52 }
 0x69f   : > { %v9250_v50 = vcombine.high %v1332_v41, %v1340_v45  ;;  %v9249_v51 = vcombine.low %v1332_v41, %v1340_v45 }
 0x6a5   : > { %7474 = vmatpush1.bf16.xpose.msra.mxu0 %v9087_v55  ;;  %7515 = vmatpush1.bf16.xpose.msra.mxu1 %v9089_v58 }
 0x6a6   : > { %7475 = vmatprep.subr.bf16.mxu0 %v9072_v59  ;;  %7516 = vmatprep.subr.bf16.mxu1 %v9074_v60 }
 0x6ad   : > { %7476 = vmatpush1.bf16.xpose.msra.mxu0 %v9071_v2  ;;  %7517 = vmatpush1.bf16.xpose.msra.mxu1 %v9073_v5  ;;  %v1316_v2 = vld [vmem:[%s9795_s27 + $0x1e88] sm:$0xff] }
 0x6ae   : > { %7477 = vmatprep.subr.bf16.mxu0 %v9056_v6  ;;  %7518 = vmatprep.subr.bf16.mxu1 %v9058_v13  ;;  %v1324_v5 = vld [vmem:[%s9795_s27 + $0x1ec8] sm:$0xff]  ;;  %v9247_v13 = vcombine.low %v1331_v39, %v1339_v34 }
 0x6af   : > { %v9233_v15 = vcombine.low %v1316_v2, %v1324_v5 }
 0x6b5   : > { %7478 = vmatpush1.bf16.xpose.msra.mxu0 %v9055_v8  ;;  %7519 = vmatpush1.bf16.xpose.msra.mxu1 %v9057_v9  ;;  %v1299_v8 = vld [vmem:[%s9795_s27 + $0x1e00] sm:$0xff] }
 0x6b6   : > { %7479 = vmatprep.subr.bf16.mxu0 %v9040_v30  ;;  %7520 = vmatprep.subr.bf16.mxu1 %v9042_v10  ;;  %v1307_v9 = vld [vmem:[%s9795_s27 + $0x1e40] sm:$0xff]  ;;  %v1300_v30 = vld [vmem:[%s9795_s27 + $0x1e08] sm:$0xff] }
 0x6b7   : > { %v1308_v10 = vld [vmem:[%s9795_s27 + $0x1e48] sm:$0xff]  ;;  %v9216_v18 = vcombine.high %v1299_v8, %v1307_v9  ;;  %v9215_v43 = vcombine.low %v1299_v8, %v1307_v9 }
 0x6b8   : > { %v9218_v22 = vcombine.high %v1300_v30, %v1308_v10  ;;  %v9217_v32 = vcombine.low %v1300_v30, %v1308_v10  ;;  %v1205_v30 = vld [vmem:[%s9795_s27 + $0x1b10] sm:$0xff] }
 0x6b9   : > { %v1213_v10 = vld [vmem:[%s9795_s27 + $0x1b50] sm:$0xff] }
 0x6bd   : > { %7480 = vmatpush1.bf16.xpose.msra.mxu0 %v9039_v23  ;;  %7521 = vmatpush1.bf16.xpose.msra.mxu1 %v9041_v24  ;;  %v1283_v23 = vld [vmem:[%s9795_s27 + $0x1d80] sm:$0xff] }
 0x6be   : > { %7481 = vmatprep.subr.bf16.mxu0 %v9024_v25  ;;  %7522 = vmatprep.subr.bf16.mxu1 %v9026_v31  ;;  %v1291_v24 = vld [vmem:[%s9795_s27 + $0x1dc0] sm:$0xff]  ;;  %v1284_v25 = vld [vmem:[%s9795_s27 + $0x1d88] sm:$0xff] }
 0x6bf   : > { %v1292_v31 = vld [vmem:[%s9795_s27 + $0x1dc8] sm:$0xff]  ;;  %v9200_v3 = vcombine.high %v1283_v23, %v1291_v24  ;;  %v9199_v39 = vcombine.low %v1283_v23, %v1291_v24  ;;  %v9124_v23 = vcombine.high %v1205_v30, %v1213_v10 }
 0x6c0   : > { %v9202_v52 = vcombine.high %v1284_v25, %v1292_v31  ;;  %v9201_v34 = vcombine.low %v1284_v25, %v1292_v31  ;;  %v1189_v25 = vld [vmem:[%s9795_s27 + $0x1a90] sm:$0xff] }
 0x6c1   : > { %v1197_v31 = vld [vmem:[%s9795_s27 + $0x1ad0] sm:$0xff] }
 0x6c5   : > { %7482 = vmatpush1.bf16.xpose.msra.mxu0 %v9023_v33  ;;  %7523 = vmatpush1.bf16.xpose.msra.mxu1 %v9025_v36  ;;  %v1267_v33 = vld [vmem:[%s9795_s27 + $0x1d00] sm:$0xff] }
 0x6c6   : > { %7483 = vmatprep.subr.bf16.mxu0 %v9264_v37  ;;  %7524 = vmatprep.subr.bf16.mxu1 %v9266_v4  ;;  %v1275_v36 = vld [vmem:[%s9795_s27 + $0x1d40] sm:$0xff]  ;;  %v1268_v37 = vld [vmem:[%s9795_s27 + $0x1d08] sm:$0xff] }
 0x6c7   : > { %v1276_v4 = vld [vmem:[%s9795_s27 + $0x1d48] sm:$0xff]  ;;  %v9184_v41 = vcombine.high %v1267_v33, %v1275_v36 }
 0x6c8   : > { %v9186_v45 = vcombine.high %v1268_v37, %v1276_v4 }
 0x6cc   : > { %v7337_v56 = vpop.f32.mrf.mxu0  ;;  %v7378_v55 = vpop.f32.mrf.mxu1 }
 0x6cd   : > { %v7338_v53 = vadd.f32 %v7337_v56, %v10719_v54  ;;  %7484 = vmatpush2.bf16.xpose.msra.mxu0 %v9263_v21  ;;  %7525 = vmatpush2.bf16.xpose.msra.mxu1 %v9265_v35  ;;  %v1251_v21 = vld [vmem:[%s9795_s27 + $0x1c80] sm:$0xff]  ;;  %v9183_v56 = vcombine.low %v1267_v33, %v1275_v36  ;;  %v1173_v33 = vld [vmem:[%s9795_s27 + $0x1a10] sm:$0xff] }
 0x6ce   : > { %v7339_v58 = vpop.f32.mrf.mxu0  ;;  %7485 = vmatprep.subr.bf16.mxu0 %v9248_v46  ;;  %v7380_v61 = vpop.f32.mrf.mxu1  ;;  %7526 = vmatprep.subr.bf16.mxu1 %v9250_v50  ;;  %v1259_v35 = vld [vmem:[%s9795_s27 + $0x1cc0] sm:$0xff]  ;;  %v1252_v46 = vld [vmem:[%s9795_s27 + $0x1c88] sm:$0xff]  ;;  %v1181_v36 = vld [vmem:[%s9795_s27 + $0x1a50] sm:$0xff] }
 0x6cf   : > { %v10793_v59 = vadd.f32 %v7378_v55, %v7338_v53  ;;  %v7340_v60 = vadd.f32 %v7339_v58, %v10726_v44  ;;  %v9234_v44 = vcombine.high %v1316_v2, %v1324_v5  ;;  %v1260_v50 = vld [vmem:[%s9795_s27 + $0x1cc8] sm:$0xff]  ;;  %v9185_v53 = vcombine.low %v1268_v37, %v1276_v4  ;;  %v1174_v37 = vld [vmem:[%s9795_s27 + $0x1a18] sm:$0xff] }
 0x6d0   : > { %v7341_v1 = vpop.f32.mrf.mxu0  ;;  %v7382_v6 = vpop.f32.mrf.mxu1  ;;  %v9168_v55 = vcombine.high %v1251_v21, %v1259_v35  ;;  %v9170_v58 = vcombine.high %v1252_v46, %v1260_v50  ;;  %v9169_v2 = vcombine.low %v1252_v46, %v1260_v50  ;;  %v9107_v4 = vcombine.low %v1189_v25, %v1197_v31 }
 0x6d1   : > { %v10800_v54 = vadd.f32 %v7380_v61, %v7340_v60  ;;  %v1235_v60 = vld [vmem:[%s9795_s27 + $0x1c00] sm:$0xff]  ;;  %v9167_v1 = vcombine.low %v1251_v21, %v1259_v35  ;;  %v9154_v6 = vcombine.high %v1236_v63, %v1244_v0  ;;  %v1158_v21 = vld [vmem:[%s9795_s27 + $0x1998] sm:$0xff]  ;;  %v9091_v46 = vcombine.low %v1173_v33, %v1181_v36 }
 0x6d2   : > { %v7342_v7 = vpop.f32.mrf.mxu0  ;;  %v7383_v62 = vpop.f32.mrf.mxu1  ;;  %v1243_v61 = vld [vmem:[%s9795_s27 + $0x1c40] sm:$0xff]  ;;  %v1166_v35 = vld [vmem:[%s9795_s27 + $0x19d8] sm:$0xff] }
 0x6d3   : > { %v9152_v5 = vcombine.high %v1235_v60, %v1243_v61  ;;  %v1229_v7 = vld [vmem:[%s9795_s27 + $0x1bd0] sm:$0xff]  ;;  %v9151_v62 = vcombine.low %v1235_v60, %v1243_v61  ;;  %v1142_v60 = vld [vmem:[%s9795_s27 + $0x1918] sm:$0xff] }
 0x6d4   : > { %v1150_v61 = vld [vmem:[%s9795_s27 + $0x1958] sm:$0xff] }
 0x6d5   : > { %7486 = vmatpush2.bf16.xpose.msra.mxu0 %v9247_v13  ;;  %7527 = vmatpush2.bf16.xpose.msra.mxu1 %v9249_v51  ;;  %v1221_v13 = vld [vmem:[%s9795_s27 + $0x1b90] sm:$0xff]  ;;  %v1222_v51 = vld [vmem:[%s9795_s27 + $0x1b98] sm:$0xff] }
 0x6d6   : > { %7487 = vmatprep.subr.bf16.mxu0 %v9232_v57  ;;  %7528 = vmatprep.subr.bf16.mxu1 %v9234_v44  ;;  %v1230_v57 = vld [vmem:[%s9795_s27 + $0x1bd8] sm:$0xff]  ;;  %v9153_v44 = vcombine.low %v1236_v63, %v1244_v0  ;;  %v9140_v8 = vcombine.high %v1221_v13, %v1229_v7  ;;  %v9077_v0 = vcombine.low %v1158_v21, %v1166_v35 }
 0x6d7   : > { %v9142_v9 = vcombine.high %v1222_v51, %v1230_v57 }
 0x6dd   : > { %7488 = vmatpush2.bf16.xpose.msra.mxu0 %v9231_v11  ;;  %7529 = vmatpush2.bf16.xpose.msra.mxu1 %v9233_v15  ;;  %v1206_v11 = vld [vmem:[%s9795_s27 + $0x1b18] sm:$0xff] }
 0x6de   : > { %7489 = vmatprep.subr.bf16.mxu0 %v9216_v18  ;;  %7530 = vmatprep.subr.bf16.mxu1 %v9218_v22  ;;  %v1214_v15 = vld [vmem:[%s9795_s27 + $0x1b58] sm:$0xff]  ;;  %v9139_v18 = vcombine.low %v1221_v13, %v1229_v7  ;;  %v9141_v22 = vcombine.low %v1222_v51, %v1230_v57  ;;  %v9061_v57 = vcombine.low %v1142_v60, %v1150_v61 }
 0x6df   : > { %v9126_v24 = vcombine.high %v1206_v11, %v1214_v15  ;;  %v1126_v13 = vld [vmem:[%s9795_s27 + $0x1898] sm:$0xff] }
 0x6e0   : > { %v1134_v7 = vld [vmem:[%s9795_s27 + $0x18d8] sm:$0xff] }
 0x6e5   : > { %7490 = vmatpush2.bf16.xpose.msra.mxu0 %v9215_v43  ;;  %7531 = vmatpush2.bf16.xpose.msra.mxu1 %v9217_v32  ;;  %v1190_v43 = vld [vmem:[%s9795_s27 + $0x1a98] sm:$0xff] }
 0x6e6   : > { %7491 = vmatprep.subr.bf16.mxu0 %v9200_v3  ;;  %7532 = vmatprep.subr.bf16.mxu1 %v9202_v52  ;;  %v1198_v32 = vld [vmem:[%s9795_s27 + $0x1ad8] sm:$0xff]  ;;  %v9123_v3 = vcombine.low %v1205_v30, %v1213_v10  ;;  %v9108_v52 = vcombine.high %v1189_v25, %v1197_v31 }
 0x6e7   : > { %v1110_v30 = vld [vmem:[%s9795_s27 + $0x1818] sm:$0xff] }
 0x6e8   : > { %v1118_v10 = vld [vmem:[%s9795_s27 + $0x1858] sm:$0xff] }
 0x6e9   : > { %v1350_v25 = vld [vmem:[%s9795_s27 + $0x1f98] sm:$0xff] }
 0x6ea   : > { %v1358_v31 = vld [vmem:[%s9795_s27 + $0x1fd8] sm:$0xff] }
 0x6ed   : > { %7492 = vmatpush2.bf16.xpose.msra.mxu0 %v9199_v39  ;;  %7533 = vmatpush2.bf16.xpose.msra.mxu1 %v9201_v34  ;;  %v9109_v39 = vcombine.low %v1190_v43, %v1198_v32  ;;  %v9092_v34 = vcombine.high %v1173_v33, %v1181_v36  ;;  %v1334_v33 = vld [vmem:[%s9795_s27 + $0x1f18] sm:$0xff] }
 0x6ee   : > { %7493 = vmatprep.subr.bf16.mxu0 %v9184_v41  ;;  %7534 = vmatprep.subr.bf16.mxu1 %v9186_v45  ;;  %v1157_v41 = vld [vmem:[%s9795_s27 + $0x1990] sm:$0xff]  ;;  %v1342_v36 = vld [vmem:[%s9795_s27 + $0x1f58] sm:$0xff] }
 0x6ef   : > { %v1165_v45 = vld [vmem:[%s9795_s27 + $0x19d0] sm:$0xff] }
 0x6f0   : > { %v9075_v63 = vcombine.low %v1157_v41, %v1165_v45 }
 0x6f5   : > { %7494 = vmatpush2.bf16.xpose.msra.mxu0 %v9183_v56  ;;  %7535 = vmatpush2.bf16.xpose.msra.mxu1 %v9185_v53  ;;  %v9076_v56 = vcombine.high %v1157_v41, %v1165_v45  ;;  %v9078_v53 = vcombine.high %v1158_v21, %v1166_v35 }
 0x6f6   : > { %7495 = vmatprep.subr.bf16.mxu0 %v9168_v55  ;;  %7536 = vmatprep.subr.bf16.mxu1 %v9170_v58  ;;  %v1141_v55 = vld [vmem:[%s9795_s27 + $0x1910] sm:$0xff] }
 0x6f7   : > { %v1149_v58 = vld [vmem:[%s9795_s27 + $0x1950] sm:$0xff] }
 0x6f8   : > { %v9059_v51 = vcombine.low %v1141_v55, %v1149_v58 }
 0x6fd   : > { %7496 = vmatpush2.bf16.xpose.msra.mxu0 %v9167_v1  ;;  %7537 = vmatpush2.bf16.xpose.msra.mxu1 %v9169_v2  ;;  %v9060_v1 = vcombine.high %v1141_v55, %v1149_v58  ;;  %v9062_v2 = vcombine.high %v1142_v60, %v1150_v61  ;;  %v1318_v55 = vld [vmem:[%s9795_s27 + $0x1e98] sm:$0xff] }
 0x6fe   : > { %7497 = vmatprep.subr.bf16.mxu0 %v9152_v5  ;;  %7538 = vmatprep.subr.bf16.mxu1 %v9154_v6  ;;  %v1125_v5 = vld [vmem:[%s9795_s27 + $0x1890] sm:$0xff]  ;;  %v1326_v58 = vld [vmem:[%s9795_s27 + $0x1ed8] sm:$0xff] }
 0x6ff   : > { %v1133_v6 = vld [vmem:[%s9795_s27 + $0x18d0] sm:$0xff] }
 0x705   : > { %7498 = vmatpush2.bf16.xpose.msra.mxu0 %v9151_v62  ;;  %7539 = vmatpush2.bf16.xpose.msra.mxu1 %v9153_v44  ;;  %v9044_v62 = vcombine.high %v1125_v5, %v1133_v6  ;;  %v9046_v44 = vcombine.high %v1126_v13, %v1134_v7 }
 0x706   : > { %7549 = vmatprep.subr.bf16.mxu0 %v9140_v8  ;;  %7590 = vmatprep.subr.bf16.mxu1 %v9142_v9  ;;  %v1109_v8 = vld [vmem:[%s9795_s27 + $0x1810] sm:$0xff] }
 0x707   : > { %v1117_v9 = vld [vmem:[%s9795_s27 + $0x1850] sm:$0xff] }
 0x70c   : > { %7500 = vmatmul.mubr.bf16.vlgmr.msra.gmra.mxu0 %v9887_v16  ;;  %7541 = vmatmul.mubr.bf16.vlgmr.msra.gmra.mxu1 %v9891_v20  ;;  %v9125_v16 = vcombine.low %v1206_v11, %v1214_v15  ;;  %v9110_v20 = vcombine.high %v1190_v43, %v1198_v32  ;;  %v9043_v11 = vcombine.low %v1125_v5, %v1133_v6 }
 0x70d   : > { %7550 = vmatpush1.bf16.xpose.msra.mxu0 %v9139_v18  ;;  %7591 = vmatpush1.bf16.xpose.msra.mxu1 %v9141_v22  ;;  %v9045_v15 = vcombine.low %v1126_v13, %v1134_v7  ;;  %v9028_v18 = vcombine.high %v1109_v8, %v1117_v9  ;;  %v9030_v22 = vcombine.high %v1110_v30, %v1118_v10 }
 0x70e   : > { %7551 = vmatprep.subr.bf16.mxu0 %v9124_v23  ;;  %7592 = vmatprep.subr.bf16.mxu1 %v9126_v24  ;;  %v1349_v23 = vld [vmem:[%s9795_s27 + $0x1f90] sm:$0xff]  ;;  %v9027_v43 = vcombine.low %v1109_v8, %v1117_v9  ;;  %v9029_v32 = vcombine.low %v1110_v30, %v1118_v10  ;;  %v9238_v13 = vcombine.high %v1318_v55, %v1326_v58  ;;  %v1302_v9 = vld [vmem:[%s9795_s27 + $0x1e18] sm:$0xff] }
 0x70f   : > { %7581 = vmatprep.mubr.bf16.mxu0 %v9893_v26  ;;  %7622 = vmatprep.mubr.bf16.mxu1 %v9896_v27  ;;  %v1182_v26 = vld [vmem:[%s9795_s27 + $0x1a58] sm:$0xff]  ;;  %v1357_v24 = vld [vmem:[%s9795_s27 + $0x1fd0] sm:$0xff] }
 0x710   : > { %v9094_v27 = vcombine.high %v1174_v37, %v1182_v26  ;;  %v9093_v50 = vcombine.low %v1174_v37, %v1182_v26  ;;  %v9267_v37 = vcombine.low %v1349_v23, %v1357_v24  ;;  %v9269_v26 = vcombine.low %v1350_v25, %v1358_v31  ;;  %v1309_v8 = vld [vmem:[%s9795_s27 + $0x1e50] sm:$0xff]  ;;  %v1310_v30 = vld [vmem:[%s9795_s27 + $0x1e58] sm:$0xff] }
 0x715   : > { %7552 = vmatpush1.bf16.xpose.msra.mxu0 %v9123_v3  ;;  %7593 = vmatpush1.bf16.xpose.msra.mxu1 %v9125_v16  ;;  %v9268_v3 = vcombine.high %v1349_v23, %v1357_v24  ;;  %v9270_v16 = vcombine.high %v1350_v25, %v1358_v31  ;;  %v9222_v25 = vcombine.high %v1302_v9, %v1310_v30 }
 0x716   : > { %7553 = vmatprep.subr.bf16.mxu0 %v9108_v52  ;;  %7594 = vmatprep.subr.bf16.mxu1 %v9110_v20  ;;  %v1333_v52 = vld [vmem:[%s9795_s27 + $0x1f10] sm:$0xff] }
 0x717   : > { %v1341_v20 = vld [vmem:[%s9795_s27 + $0x1f50] sm:$0xff] }
 0x71d   : > { %7554 = vmatpush1.bf16.xpose.msra.mxu0 %v9107_v4  ;;  %7595 = vmatpush1.bf16.xpose.msra.mxu1 %v9109_v39  ;;  %v9252_v4 = vcombine.high %v1333_v52, %v1341_v20  ;;  %v9254_v39 = vcombine.high %v1334_v33, %v1342_v36 }
 0x71e   : > { %7555 = vmatprep.subr.bf16.mxu0 %v9092_v34  ;;  %7596 = vmatprep.subr.bf16.mxu1 %v9094_v27 }
 0x725   : > { %7556 = vmatpush1.bf16.xpose.msra.mxu0 %v9091_v46  ;;  %7597 = vmatpush1.bf16.xpose.msra.mxu1 %v9093_v50  ;;  %v1317_v50 = vld [vmem:[%s9795_s27 + $0x1e90] sm:$0xff] }
 0x726   : > { %7557 = vmatprep.subr.bf16.mxu0 %v9076_v56  ;;  %7598 = vmatprep.subr.bf16.mxu1 %v9078_v53  ;;  %v1325_v56 = vld [vmem:[%s9795_s27 + $0x1ed0] sm:$0xff] }
 0x72d   : > { %7558 = vmatpush1.bf16.xpose.msra.mxu0 %v9075_v63  ;;  %7599 = vmatpush1.bf16.xpose.msra.mxu1 %v9077_v0  ;;  %v9251_v0 = vcombine.low %v1333_v52, %v1341_v20  ;;  %v1293_v52 = vld [vmem:[%s9795_s27 + $0x1dd0] sm:$0xff]  ;;  %v1286_v20 = vld [vmem:[%s9795_s27 + $0x1d98] sm:$0xff] }
 0x72e   : > { %7559 = vmatprep.subr.bf16.mxu0 %v9060_v1  ;;  %7600 = vmatprep.subr.bf16.mxu1 %v9062_v2  ;;  %v9253_v1 = vcombine.low %v1334_v33, %v1342_v36  ;;  %v9236_v2 = vcombine.high %v1317_v50, %v1325_v56  ;;  %v1294_v33 = vld [vmem:[%s9795_s27 + $0x1dd8] sm:$0xff] }
 0x735   : > { %7560 = vmatpush1.bf16.xpose.msra.mxu0 %v9059_v51  ;;  %7601 = vmatpush1.bf16.xpose.msra.mxu1 %v9061_v57 }
 0x736   : > { %7561 = vmatprep.subr.bf16.mxu0 %v9044_v62  ;;  %7602 = vmatprep.subr.bf16.mxu1 %v9046_v44  ;;  %v1301_v44 = vld [vmem:[%s9795_s27 + $0x1e10] sm:$0xff] }
 0x73d   : > { %7562 = vmatpush1.bf16.xpose.msra.mxu0 %v9043_v11  ;;  %7603 = vmatpush1.bf16.xpose.msra.mxu1 %v9045_v15  ;;  %v9235_v15 = vcombine.low %v1317_v50, %v1325_v56  ;;  %v1269_v50 = vld [vmem:[%s9795_s27 + $0x1d10] sm:$0xff] }
 0x73e   : > { %7563 = vmatprep.subr.bf16.mxu0 %v9028_v18  ;;  %7604 = vmatprep.subr.bf16.mxu1 %v9030_v22  ;;  %v9237_v18 = vcombine.low %v1318_v55, %v1326_v58  ;;  %v9220_v22 = vcombine.high %v1301_v44, %v1309_v8  ;;  %v1277_v56 = vld [vmem:[%s9795_s27 + $0x1d50] sm:$0xff]  ;;  %v1278_v55 = vld [vmem:[%s9795_s27 + $0x1d58] sm:$0xff] }
 0x745   : > { %7564 = vmatpush1.bf16.xpose.msra.mxu0 %v9027_v43  ;;  %7605 = vmatpush1.bf16.xpose.msra.mxu1 %v9029_v32 }
 0x746   : > { %7565 = vmatprep.subr.bf16.mxu0 %v9268_v3  ;;  %7606 = vmatprep.subr.bf16.mxu1 %v9270_v16  ;;  %v1285_v16 = vld [vmem:[%s9795_s27 + $0x1d90] sm:$0xff] }
 0x74c   : > { %v7419_v34 = vpop.f32.mrf.mxu0  ;;  %v7460_v41 = vpop.f32.mrf.mxu1 }
 0x74d   : > { %v7420_v27 = vadd.f32 %v7419_v34, %v10793_v59  ;;  %7566 = vmatpush2.bf16.xpose.msra.mxu0 %v9267_v37  ;;  %7607 = vmatpush2.bf16.xpose.msra.mxu1 %v9269_v26  ;;  %v9219_v26 = vcombine.low %v1301_v44, %v1309_v8 }
 0x74e   : > { %v7421_v45 = vpop.f32.mrf.mxu0  ;;  %7567 = vmatprep.subr.bf16.mxu0 %v9252_v4  ;;  %v7462_v46 = vpop.f32.mrf.mxu1  ;;  %7608 = vmatprep.subr.bf16.mxu1 %v9254_v39  ;;  %v9221_v4 = vcombine.low %v1302_v9, %v1310_v30  ;;  %v9204_v39 = vcombine.high %v1285_v16, %v1293_v52  ;;  %v9187_v9 = vcombine.low %v1269_v50, %v1277_v56 }
 0x74f   : > { %v7461_v21 = vadd.f32 %v7460_v41, %v7420_v27  ;;  %v7422_v35 = vadd.f32 %v7421_v45, %v10800_v54  ;;  %v9206_v41 = vcombine.high %v1286_v20, %v1294_v33 }
 0x750   : > { %v7423_v53 = vpop.f32.mrf.mxu0  ;;  %v7464_v63 = vpop.f32.mrf.mxu1 }
 0x751   : > { %v7819_v60 = vrot.slane %v7461_v21, 4  ;;  %v7463_v61 = vadd.f32 %v7462_v46, %v7422_v35  ;;  %v1270_v53 = vld [vmem:[%s9795_s27 + $0x1d18] sm:$0xff]  ;;  %v9205_v63 = vcombine.low %v1286_v20, %v1294_v33  ;;  %v10903_v20 = vld [vmem:[%s9802_s23] sm:$0xff] }
 0x752   : > { %v7424_v59 = vpop.f32.mrf.mxu0  ;;  %v7465_v6 = vpop.f32.mrf.mxu1  ;;  %v9189_v30 = vcombine.low %v1270_v53, %v1278_v55 }
 0x753   : > { %v7820_v5 = vadd.f32 %v7819_v60, %v7461_v21  ;;  %v7825_v54 = vrot.slane %v7463_v61, 4 }
 0x755   : > { %v7821_v7 = vrot.slane %v7820_v5, 2  ;;  %v7826_v51 = vadd.f32 %v7825_v54, %v7463_v61  ;;  %7568 = vmatpush2.bf16.xpose.msra.mxu0 %v9251_v0  ;;  %7609 = vmatpush2.bf16.xpose.msra.mxu1 %v9253_v1  ;;  %v9188_v0 = vcombine.high %v1269_v50, %v1277_v56  ;;  %v10913_v56 = vld [vmem:[%s9805_s12] sm:$0xff] }
 0x756   : > { %7569 = vmatprep.subr.bf16.mxu0 %v9236_v2  ;;  %7610 = vmatprep.subr.bf16.mxu1 %v9238_v13  ;;  %v9190_v2 = vcombine.high %v1270_v53, %v1278_v55 }
 0x757   : > { %v7822_v57 = vadd.f32 %v7821_v7, %v7820_v5  ;;  %v7827_v62 = vrot.slane %v7826_v51, 2  ;;  %v1253_v7 = vld [vmem:[%s9795_s27 + $0x1c90] sm:$0xff] }
 0x759   : > { %v7823_v10 = vrot.slane %v7822_v57, 1  ;;  %v7828_v11 = vadd.f32 %v7827_v62, %v7826_v51  ;;  %v1261_v51 = vld [vmem:[%s9795_s27 + $0x1cd0] sm:$0xff]  ;;  %v1262_v62 = vld [vmem:[%s9795_s27 + $0x1cd8] sm:$0xff] }
 0x75b   : > { %v7824_v23 = vadd.f32 %v7823_v10, %v7822_v57  ;;  %v7829_v24 = vrot.slane %v7828_v11, 1  ;;  %v1254_v57 = vld [vmem:[%s9795_s27 + $0x1c98] sm:$0xff]  ;;  %v9172_v10 = vcombine.high %v1253_v7, %v1261_v51 }
 0x75d   : > { %v7847_v31 = vmul.f32 0.125, %v7824_v23  ;;  %v7830_v43 = vadd.f32 %v7829_v24, %v7828_v11  ;;  %7570 = vmatpush2.bf16.xpose.msra.mxu0 %v9235_v15  ;;  %7611 = vmatpush2.bf16.xpose.msra.mxu1 %v9237_v18  ;;  %v9174_v15 = vcombine.high %v1254_v57, %v1262_v62  ;;  %v1237_v18 = vld [vmem:[%s9795_s27 + $0x1c10] sm:$0xff]  ;;  %v1238_v23 = vld [vmem:[%s9795_s27 + $0x1c18] sm:$0xff] }
 0x75e   : > { %7571 = vmatprep.subr.bf16.mxu0 %v9220_v22  ;;  %7612 = vmatprep.subr.bf16.mxu1 %v9222_v25  ;;  %v1245_v22 = vld [vmem:[%s9795_s27 + $0x1c50] sm:$0xff]  ;;  %v1246_v24 = vld [vmem:[%s9795_s27 + $0x1c58] sm:$0xff]  ;;  %v7959_v25 = vsub.s32 4, %v10271_v40 }
 0x75f   : > { %v10876_v32 = vsub.f32 %v7461_v21, %v7847_v31  ;;  %v7848_v3 = vmul.f32 0.125, %v7830_v43  ;;  %v9171_v31 = vcombine.low %v1253_v7, %v1261_v51  ;;  %v9173_v43 = vcombine.low %v1254_v57, %v1262_v62 }
 0x760   : > { %v7960_v33 = vrot.slane %v10903_v20, %v7959_v25  ;;  %v8050_v53 = vrot.slane %v10913_v56, %v7959_v25  ;;  %v1159_v25 = vld [vmem:[%s9795_s27 + $0x19a0] sm:$0xff] }
 0x761   : > { %v7863_v36 = vmul.f32 %v10876_v32, %v10876_v32  ;;  %v10884_v37 = vsub.f32 %v7463_v61, %v7848_v3  ;;  %v9203_v61 = vcombine.low %v1285_v16, %v1293_v52  ;;  %v9156_v3 = vcombine.high %v1237_v18, %v1245_v22 }
 0x762   : > { %v7963_v16 = vsub.s32 5, %v10271_v40  ;;  %v9158_v52 = vcombine.high %v1238_v23, %v1246_v24 }
 0x763   : > { %v7891_v34 = vrot.slane %v7863_v36, 4  ;;  %v7864_v27 = vmul.f32 %v10884_v37, %v10884_v37 }
 0x765   : > { %v7892_v45 = vadd.f32 %v7891_v34, %v7863_v36  ;;  %v7897_v21 = vrot.slane %v7864_v27, 4  ;;  %7572 = vmatpush2.bf16.xpose.msra.mxu0 %v9219_v26  ;;  %7613 = vmatpush2.bf16.xpose.msra.mxu1 %v9221_v4  ;;  %v7964_v36 = vrot.slane %v10903_v20, %v7963_v16  ;;  %v1223_v26 = vld [vmem:[%s9795_s27 + $0x1ba0] sm:$0xff]  ;;  %v1224_v34 = vld [vmem:[%s9795_s27 + $0x1ba8] sm:$0xff] }
 0x766   : > { %7573 = vmatprep.subr.bf16.mxu0 %v9204_v39  ;;  %7614 = vmatprep.subr.bf16.mxu1 %v9206_v41  ;;  %v1231_v4 = vld [vmem:[%s9795_s27 + $0x1be0] sm:$0xff] }
 0x767   : > { %v7893_v35 = vrot.slane %v7892_v45, 2  ;;  %v7898_v46 = vadd.f32 %v7897_v21, %v7864_v27  ;;  %v1232_v27 = vld [vmem:[%s9795_s27 + $0x1be8] sm:$0xff] }
 0x768   : > { %v9145_v7 = vcombine.low %v1224_v34, %v1232_v27 }
 0x769   : > { %v7894_v58 = vadd.f32 %v7893_v35, %v7892_v45  ;;  %v7899_v60 = vrot.slane %v7898_v46, 2  ;;  %v9155_v45 = vcombine.low %v1237_v18, %v1245_v22  ;;  %v9157_v35 = vcombine.low %v1238_v23, %v1246_v24  ;;  %v1176_v18 = vld [vmem:[%s9795_s27 + $0x1a28] sm:$0xff] }
 0x76b   : > { %v7895_v59 = vrot.slane %v7894_v58, 1  ;;  %v7900_v1 = vadd.f32 %v7899_v60, %v7898_v46  ;;  %v9144_v46 = vcombine.high %v1223_v26, %v1231_v4 }
 0x76d   : > { %v7896_v5 = vadd.f32 %v7895_v59, %v7894_v58  ;;  %v7901_v54 = vrot.slane %v7900_v1, 1  ;;  %7574 = vmatpush2.bf16.xpose.msra.mxu0 %v9203_v61  ;;  %7615 = vmatpush2.bf16.xpose.msra.mxu1 %v9205_v63  ;;  %v9146_v58 = vcombine.high %v1224_v34, %v1232_v27  ;;  %v8054_v63 = vrot.slane %v10913_v56, %v7963_v16  ;;  %v1152_v34 = vld [vmem:[%s9795_s27 + $0x1968] sm:$0xff] }
 0x76e   : > { %7575 = vmatprep.subr.bf16.mxu0 %v9188_v0  ;;  %7616 = vmatprep.subr.bf16.mxu1 %v9190_v2  ;;  %v1215_v2 = vld [vmem:[%s9795_s27 + $0x1b60] sm:$0xff] }
 0x76f   : > { %v7919_v6 = vmul.f32 0.125, %v7896_v5  ;;  %v7902_v13 = vadd.f32 %v7901_v54, %v7900_v1  ;;  %v1207_v1 = vld [vmem:[%s9795_s27 + $0x1b20] sm:$0xff]  ;;  %v1208_v5 = vld [vmem:[%s9795_s27 + $0x1b28] sm:$0xff] }
 0x770   : > { %v1216_v54 = vld [vmem:[%s9795_s27 + $0x1b68] sm:$0xff]  ;;  %v9128_v51 = vcombine.high %v1207_v1, %v1215_v2 }
 0x771   : > { %v7927_v44 = vadd.f32 1e-05, %v7919_v6  ;;  %v7920_v8 = vmul.f32 0.125, %v7902_v13  ;;  %v9143_v13 = vcombine.low %v1223_v26, %v1231_v4  ;;  %v9130_v62 = vcombine.high %v1208_v5, %v1216_v54  ;;  %v1143_v26 = vld [vmem:[%s9795_s27 + $0x1920] sm:$0xff] }
 0x772   : > { %v1151_v4 = vld [vmem:[%s9795_s27 + $0x1960] sm:$0xff] }
 0x773   : > { %9366 = vrsqrt.f32 %v7927_v44  ;;  %v7928_v11 = vadd.f32 1e-05, %v7920_v8  ;;  %v1199_v44 = vld [vmem:[%s9795_s27 + $0x1ae0] sm:$0xff]  ;;  %v1192_v8 = vld [vmem:[%s9795_s27 + $0x1aa8] sm:$0xff] }
 0x775   : > { %9368 = vrsqrt.f32 %v7928_v11  ;;  %7576 = vmatpush2.bf16.xpose.msra.mxu0 %v9187_v9  ;;  %7617 = vmatpush2.bf16.xpose.msra.mxu1 %v9189_v30  ;;  %v1200_v9 = vld [vmem:[%s9795_s27 + $0x1ae8] sm:$0xff]  ;;  %v9129_v30 = vcombine.low %v1208_v5, %v1216_v54  ;;  %v1175_v11 = vld [vmem:[%s9795_s27 + $0x1a20] sm:$0xff] }
 0x776   : > { %7577 = vmatprep.subr.bf16.mxu0 %v9172_v10  ;;  %7618 = vmatprep.subr.bf16.mxu1 %v9174_v15  ;;  %v1183_v15 = vld [vmem:[%s9795_s27 + $0x1a60] sm:$0xff]  ;;  %v9113_v23 = vcombine.low %v1192_v8, %v1200_v9 }
 0x777   : > { %v9096_v24 = vcombine.high %v1175_v11, %v1183_v15  ;;  %v9095_v16 = vcombine.low %v1175_v11, %v1183_v15 }
 0x77d   : > { %7578 = vmatpush2.bf16.xpose.msra.mxu0 %v9171_v31  ;;  %7619 = vmatpush2.bf16.xpose.msra.mxu1 %v9173_v43  ;;  %v1167_v31 = vld [vmem:[%s9795_s27 + $0x19e0] sm:$0xff]  ;;  %v1160_v43 = vld [vmem:[%s9795_s27 + $0x19a8] sm:$0xff] }
 0x77e   : > { %7579 = vmatprep.subr.bf16.mxu0 %v9156_v3  ;;  %7620 = vmatprep.subr.bf16.mxu1 %v9158_v52  ;;  %v1168_v3 = vld [vmem:[%s9795_s27 + $0x19e8] sm:$0xff]  ;;  %v9079_v27 = vcombine.low %v1159_v25, %v1167_v31 }
 0x780   : > { %v9367_v39 = vpop.eup %9366 }
 0x781   : > { %v7985_v41 = vmul.f32 %v9367_v39, %v7960_v33  ;;  %v9080_v33 = vcombine.high %v1159_v25, %v1167_v31  ;;  %v1144_v39 = vld [vmem:[%s9795_s27 + $0x1928] sm:$0xff]  ;;  %v1327_v25 = vld [vmem:[%s9795_s27 + $0x1ee0] sm:$0xff] }
 0x782   : > { %v9369_v21 = vpop.eup %9368 }
 0x783   : > { %v8008_v50 = vrot.slane %v7985_v41, %v10278_v47  ;;  %v7986_v55 = vmul.f32 %v9369_v21, %v7964_v36  ;;  %v9082_v36 = vcombine.high %v1160_v43, %v1168_v3  ;;  %v9081_v41 = vcombine.low %v1160_v43, %v1168_v3  ;;  %v1320_v3 = vld [vmem:[%s9795_s27 + $0x1ea8] sm:$0xff] }
 0x784   : > { %v9066_v21 = vcombine.high %v1144_v39, %v1152_v34 }
 0x785   : > { %v8025_v60 = vmul.f32 %v8008_v50, %v10876_v32  ;;  %v8012_v61 = vrot.slane %v7986_v55, %v10278_v47  ;;  %7580 = vmatpush2.bf16.xpose.msra.mxu0 %v9155_v45  ;;  %7621 = vmatpush2.bf16.xpose.msra.mxu1 %v9157_v35  ;;  %v9064_v45 = vcombine.high %v1143_v26, %v1151_v4  ;;  %v1127_v35 = vld [vmem:[%s9795_s27 + $0x18a0] sm:$0xff]  ;;  %v1128_v50 = vld [vmem:[%s9795_s27 + $0x18a8] sm:$0xff] }
 0x786   : > { %7631 = vmatprep.subr.bf16.mxu0 %v9144_v46  ;;  %7672 = vmatprep.subr.bf16.mxu1 %v9146_v58  ;;  %v1135_v46 = vld [vmem:[%s9795_s27 + $0x18e0] sm:$0xff]  ;;  %v9063_v55 = vcombine.low %v1143_v26, %v1151_v4  ;;  %v9065_v58 = vcombine.low %v1144_v39, %v1152_v34 }
 0x787   : > { %v8075_v0 = vadd.f32 %v8050_v53, %v8025_v60  ;;  %v8026_v59 = vmul.f32 %v8012_v61, %v10884_v37  ;;  %v1191_v37 = vld [vmem:[%s9795_s27 + $0x1aa0] sm:$0xff]  ;;  %v1136_v53 = vld [vmem:[%s9795_s27 + $0x18e8] sm:$0xff]  ;;  %v9048_v60 = vcombine.high %v1127_v35, %v1135_v46 }
 0x788   : > { %v9112_v10 = vcombine.high %v1191_v37, %v1199_v44  ;;  %v9111_v22 = vcombine.low %v1191_v37, %v1199_v44  ;;  %v9050_v61 = vcombine.high %v1128_v50, %v1136_v53  ;;  %v9049_v5 = vcombine.low %v1128_v50, %v1136_v53 }
 0x789   : > { %v8083_v6 = vmax.f32 %v8075_v0, 0.0  ;;  %v8076_v32 = vadd.f32 %v8054_v63, %v8026_v59  ;;  %v1111_v63 = vld [vmem:[%s9795_s27 + $0x1820] sm:$0xff]  ;;  %v1112_v59 = vld [vmem:[%s9795_s27 + $0x1828] sm:$0xff] }
 0x78a   : > { %v1119_v0 = vld [vmem:[%s9795_s27 + $0x1860] sm:$0xff] }
 0x78b   : > { %8091 = vst [vmem:[%s10298_s20 + $0x20] sm:$0xff] %v8083_v6  ;;  %v8084_v57 = vmax.f32 %v8076_v32, 0.0  ;;  %v9032_v54 = vcombine.high %v1111_v63, %v1119_v0  ;;  %v1351_v32 = vld [vmem:[%s9795_s27 + $0x1fa0] sm:$0xff] }
 0x78c   : > { %7582 = vmatmul.mubr.bf16.vlgmr.msra.gmra.mxu0 %v9963_v38  ;;  %7623 = vmatmul.mubr.bf16.vlgmr.msra.gmra.mxu1 %v9967_v42  ;;  %v9127_v38 = vcombine.low %v1207_v1, %v1215_v2  ;;  %v9114_v42 = vcombine.high %v1192_v8, %v1200_v9  ;;  %v1120_v1 = vld [vmem:[%s9795_s27 + $0x1868] sm:$0xff]  ;;  %v9047_v2 = vcombine.low %v1127_v35, %v1135_v46  ;;  %v1335_v8 = vld [vmem:[%s9795_s27 + $0x1f20] sm:$0xff] }
 0x78d   : > { %8092 = vst [vmem:[%s10298_s20 + $0x28] sm:$0xff] %v8084_v57  ;;  %7632 = vmatpush1.bf16.xpose.msra.mxu0 %v9143_v13  ;;  %7673 = vmatpush1.bf16.xpose.msra.mxu1 %v9145_v7  ;;  %v9034_v6 = vcombine.high %v1112_v59, %v1120_v1  ;;  %v1359_v13 = vld [vmem:[%s9795_s27 + $0x1fe0] sm:$0xff]  ;;  %v1352_v7 = vld [vmem:[%s9795_s27 + $0x1fa8] sm:$0xff]  ;;  %v9031_v57 = vcombine.low %v1111_v63, %v1119_v0 }
 0x78e   : > { %7633 = vmatprep.subr.bf16.mxu0 %v9128_v51  ;;  %7674 = vmatprep.subr.bf16.mxu1 %v9130_v62  ;;  %v1360_v51 = vld [vmem:[%s9795_s27 + $0x1fe8] sm:$0xff]  ;;  %v9033_v62 = vcombine.low %v1112_v59, %v1120_v1  ;;  %v9272_v37 = vcombine.high %v1351_v32, %v1359_v13  ;;  %v1343_v9 = vld [vmem:[%s9795_s27 + $0x1f60] sm:$0xff] }
 0x78f   : > { %7663 = vmatprep.mubr.bf16.mxu0 %v9969_v48  ;;  %7704 = vmatprep.mubr.bf16.mxu1 %v9972_v49  ;;  %v1184_v48 = vld [vmem:[%s9795_s27 + $0x1a68] sm:$0xff]  ;;  %v9274_v44 = vcombine.high %v1352_v7, %v1360_v51  ;;  %v9256_v11 = vcombine.high %v1335_v8, %v1343_v9 }
 0x790   : > { %v9098_v49 = vcombine.high %v1176_v18, %v1184_v48  ;;  %v9097_v52 = vcombine.low %v1176_v18, %v1184_v48 }
 0x795   : > { %7634 = vmatpush1.bf16.xpose.msra.mxu0 %v9127_v38  ;;  %7675 = vmatpush1.bf16.xpose.msra.mxu1 %v9129_v30  ;;  %v1336_v38 = vld [vmem:[%s9795_s27 + $0x1f28] sm:$0xff] }
 0x796   : > { %7635 = vmatprep.subr.bf16.mxu0 %v9112_v10  ;;  %7676 = vmatprep.subr.bf16.mxu1 %v9114_v42  ;;  %v1344_v30 = vld [vmem:[%s9795_s27 + $0x1f68] sm:$0xff]  ;;  %v9271_v10 = vcombine.low %v1351_v32, %v1359_v13  ;;  %v9273_v42 = vcombine.low %v1352_v7, %v1360_v51 }
 0x797   : > { %v9258_v15 = vcombine.high %v1336_v38, %v1344_v30  ;;  %v9257_v26 = vcombine.low %v1336_v38, %v1344_v30 }
 0x79d   : > { %7636 = vmatpush1.bf16.xpose.msra.mxu0 %v9111_v22  ;;  %7677 = vmatpush1.bf16.xpose.msra.mxu1 %v9113_v23 }
 0x79e   : > { %7637 = vmatprep.subr.bf16.mxu0 %v9096_v24  ;;  %7678 = vmatprep.subr.bf16.mxu1 %v9098_v49  ;;  %v1319_v49 = vld [vmem:[%s9795_s27 + $0x1ea0] sm:$0xff] }
 0x79f   : > { %v9240_v4 = vcombine.high %v1319_v49, %v1327_v25  ;;  %v9239_v35 = vcombine.low %v1319_v49, %v1327_v25  ;;  %v1225_v49 = vld [vmem:[%s9795_s27 + $0x1bb0] sm:$0xff] }
 0x7a0   : > { %v1233_v25 = vld [vmem:[%s9795_s27 + $0x1bf0] sm:$0xff] }
 0x7a5   : > { %7638 = vmatpush1.bf16.xpose.msra.mxu0 %v9095_v16  ;;  %7679 = vmatpush1.bf16.xpose.msra.mxu1 %v9097_v52  ;;  %v1328_v16 = vld [vmem:[%s9795_s27 + $0x1ee8] sm:$0xff] }
 0x7a6   : > { %7639 = vmatprep.subr.bf16.mxu0 %v9080_v33  ;;  %7680 = vmatprep.subr.bf16.mxu1 %v9082_v36  ;;  %v9255_v33 = vcombine.low %v1335_v8, %v1343_v9  ;;  %v9242_v34 = vcombine.high %v1320_v3, %v1328_v16  ;;  %v9241_v46 = vcombine.low %v1320_v3, %v1328_v16  ;;  %v1234_v3 = vld [vmem:[%s9795_s27 + $0x1bf8] sm:$0xff] }
 0x7ad   : > { %7640 = vmatpush1.bf16.xpose.msra.mxu0 %v9079_v27  ;;  %7681 = vmatpush1.bf16.xpose.msra.mxu1 %v9081_v41  ;;  %v1303_v27 = vld [vmem:[%s9795_s27 + $0x1e20] sm:$0xff] }
 0x7ae   : > { %7641 = vmatprep.subr.bf16.mxu0 %v9064_v45  ;;  %7682 = vmatprep.subr.bf16.mxu1 %v9066_v21  ;;  %v1311_v41 = vld [vmem:[%s9795_s27 + $0x1e60] sm:$0xff]  ;;  %v1304_v45 = vld [vmem:[%s9795_s27 + $0x1e28] sm:$0xff] }
 0x7af   : > { %v1312_v21 = vld [vmem:[%s9795_s27 + $0x1e68] sm:$0xff]  ;;  %v9224_v50 = vcombine.high %v1303_v27, %v1311_v41  ;;  %v9223_v63 = vcombine.low %v1303_v27, %v1311_v41  ;;  %v9147_v27 = vcombine.low %v1225_v49, %v1233_v25 }
 0x7b0   : > { %v9226_v53 = vcombine.high %v1304_v45, %v1312_v21  ;;  %v9225_v0 = vcombine.low %v1304_v45, %v1312_v21 }
 0x7b5   : > { %7642 = vmatpush1.bf16.xpose.msra.mxu0 %v9063_v55  ;;  %7683 = vmatpush1.bf16.xpose.msra.mxu1 %v9065_v58  ;;  %v1287_v55 = vld [vmem:[%s9795_s27 + $0x1da0] sm:$0xff] }
 0x7b6   : > { %7643 = vmatprep.subr.bf16.mxu0 %v9048_v60  ;;  %7684 = vmatprep.subr.bf16.mxu1 %v9050_v61  ;;  %v1295_v58 = vld [vmem:[%s9795_s27 + $0x1de0] sm:$0xff]  ;;  %v1288_v60 = vld [vmem:[%s9795_s27 + $0x1da8] sm:$0xff] }
 0x7b7   : > { %v1296_v61 = vld [vmem:[%s9795_s27 + $0x1de8] sm:$0xff]  ;;  %v9208_v59 = vcombine.high %v1287_v55, %v1295_v58  ;;  %v9207_v32 = vcombine.low %v1287_v55, %v1295_v58 }
 0x7b8   : > { %v9210_v1 = vcombine.high %v1288_v60, %v1296_v61  ;;  %v9209_v13 = vcombine.low %v1288_v60, %v1296_v61  ;;  %v1177_v60 = vld [vmem:[%s9795_s27 + $0x1a30] sm:$0xff] }
 0x7b9   : > { %v1185_v61 = vld [vmem:[%s9795_s27 + $0x1a70] sm:$0xff] }
 0x7bd   : > { %7644 = vmatpush1.bf16.xpose.msra.mxu0 %v9047_v2  ;;  %7685 = vmatpush1.bf16.xpose.msra.mxu1 %v9049_v5  ;;  %v1271_v2 = vld [vmem:[%s9795_s27 + $0x1d20] sm:$0xff] }
 0x7be   : > { %7645 = vmatprep.subr.bf16.mxu0 %v9032_v54  ;;  %7686 = vmatprep.subr.bf16.mxu1 %v9034_v6  ;;  %v1279_v5 = vld [vmem:[%s9795_s27 + $0x1d60] sm:$0xff]  ;;  %v1272_v54 = vld [vmem:[%s9795_s27 + $0x1d28] sm:$0xff] }
 0x7bf   : > { %v1280_v6 = vld [vmem:[%s9795_s27 + $0x1d68] sm:$0xff]  ;;  %v9192_v7 = vcombine.high %v1271_v2, %v1279_v5  ;;  %v9191_v8 = vcombine.low %v1271_v2, %v1279_v5  ;;  %v1161_v2 = vld [vmem:[%s9795_s27 + $0x19b0] sm:$0xff] }
 0x7c0   : > { %v9194_v51 = vcombine.high %v1272_v54, %v1280_v6  ;;  %v9193_v9 = vcombine.low %v1272_v54, %v1280_v6  ;;  %v1169_v5 = vld [vmem:[%s9795_s27 + $0x19f0] sm:$0xff]  ;;  %v1162_v54 = vld [vmem:[%s9795_s27 + $0x19b8] sm:$0xff] }
 0x7c1   : > { %v1170_v6 = vld [vmem:[%s9795_s27 + $0x19f8] sm:$0xff] }
 0x7c5   : > { %7646 = vmatpush1.bf16.xpose.msra.mxu0 %v9031_v57  ;;  %7687 = vmatpush1.bf16.xpose.msra.mxu1 %v9033_v62  ;;  %v1255_v57 = vld [vmem:[%s9795_s27 + $0x1ca0] sm:$0xff] }
 0x7c6   : > { %7647 = vmatprep.subr.bf16.mxu0 %v9272_v37  ;;  %7688 = vmatprep.subr.bf16.mxu1 %v9274_v44  ;;  %v1263_v62 = vld [vmem:[%s9795_s27 + $0x1ce0] sm:$0xff]  ;;  %v1256_v37 = vld [vmem:[%s9795_s27 + $0x1ca8] sm:$0xff] }
 0x7c7   : > { %v1264_v44 = vld [vmem:[%s9795_s27 + $0x1ce8] sm:$0xff]  ;;  %v9176_v38 = vcombine.high %v1255_v57, %v1263_v62 }
 0x7c8   : > { %v9178_v30 = vcombine.high %v1256_v37, %v1264_v44 }
 0x7cc   : > { %v7501_v18 = vpop.f32.mrf.mxu0  ;;  %v7542_v48 = vpop.f32.mrf.mxu1 }
 0x7cd   : > { %7648 = vmatpush2.bf16.xpose.msra.mxu0 %v9271_v10  ;;  %v10962_v22 = vadd.f32 %v7542_v48, %v7501_v18  ;;  %7689 = vmatpush2.bf16.xpose.msra.mxu1 %v9273_v42  ;;  %v1239_v10 = vld [vmem:[%s9795_s27 + $0x1c20] sm:$0xff]  ;;  %v9175_v18 = vcombine.low %v1255_v57, %v1263_v62  ;;  %v9177_v48 = vcombine.low %v1256_v37, %v1264_v44  ;;  %v1145_v57 = vld [vmem:[%s9795_s27 + $0x1930] sm:$0xff]  ;;  %v1146_v37 = vld [vmem:[%s9795_s27 + $0x1938] sm:$0xff] }
 0x7ce   : > { %v7503_v23 = vpop.f32.mrf.mxu0  ;;  %7649 = vmatprep.subr.bf16.mxu0 %v9256_v11  ;;  %v7544_v24 = vpop.f32.mrf.mxu1  ;;  %7690 = vmatprep.subr.bf16.mxu1 %v9258_v15  ;;  %v1247_v42 = vld [vmem:[%s9795_s27 + $0x1c60] sm:$0xff]  ;;  %v1240_v11 = vld [vmem:[%s9795_s27 + $0x1c28] sm:$0xff]  ;;  %v1153_v62 = vld [vmem:[%s9795_s27 + $0x1970] sm:$0xff] }
 0x7cf   : > { %v10966_v31 = vadd.f32 %v7544_v24, %v7503_v23  ;;  %v1248_v15 = vld [vmem:[%s9795_s27 + $0x1c68] sm:$0xff]  ;;  %v9160_v23 = vcombine.high %v1239_v10, %v1247_v42  ;;  %v9159_v16 = vcombine.low %v1239_v10, %v1247_v42  ;;  %v1154_v44 = vld [vmem:[%s9795_s27 + $0x1978] sm:$0xff]  ;;  %v1129_v10 = vld [vmem:[%s9795_s27 + $0x18b0] sm:$0xff] }
 0x7d0   : > { %v7505_v43 = vpop.f32.mrf.mxu0  ;;  %v7546_v52 = vpop.f32.mrf.mxu1  ;;  %v9162_v24 = vcombine.high %v1240_v11, %v1248_v15  ;;  %v1137_v42 = vld [vmem:[%s9795_s27 + $0x18f0] sm:$0xff] }
 0x7d1   : > { %v1226_v43 = vld [vmem:[%s9795_s27 + $0x1bb8] sm:$0xff]  ;;  %v9161_v52 = vcombine.low %v1240_v11, %v1248_v15 }
 0x7d2   : > { %v7506_v36 = vpop.f32.mrf.mxu0  ;;  %v7547_v39 = vpop.f32.mrf.mxu1  ;;  %v9149_v41 = vcombine.low %v1226_v43, %v1234_v3  ;;  %v1130_v11 = vld [vmem:[%s9795_s27 + $0x18b8] sm:$0xff] }
 0x7d3   : > { %v9150_v36 = vcombine.high %v1226_v43, %v1234_v3  ;;  %v1210_v39 = vld [vmem:[%s9795_s27 + $0x1b38] sm:$0xff] }
 0x7d4   : > { %v1138_v15 = vld [vmem:[%s9795_s27 + $0x18f8] sm:$0xff] }
 0x7d5   : > { %7650 = vmatpush2.bf16.xpose.msra.mxu0 %v9255_v33  ;;  %7691 = vmatpush2.bf16.xpose.msra.mxu1 %v9257_v26  ;;  %v9148_v33 = vcombine.high %v1225_v49, %v1233_v25  ;;  %v1209_v26 = vld [vmem:[%s9795_s27 + $0x1b30] sm:$0xff]  ;;  %v1114_v43 = vld [vmem:[%s9795_s27 + $0x1838] sm:$0xff] }
 0x7d6   : > { %7651 = vmatprep.subr.bf16.mxu0 %v9240_v4  ;;  %7692 = vmatprep.subr.bf16.mxu1 %v9242_v34  ;;  %v1217_v4 = vld [vmem:[%s9795_s27 + $0x1b70] sm:$0xff]  ;;  %v1218_v34 = vld [vmem:[%s9795_s27 + $0x1b78] sm:$0xff] }
 0x7d7   : > { %v9132_v45 = vcombine.high %v1209_v26, %v1217_v4  ;;  %v9134_v21 = vcombine.high %v1210_v39, %v1218_v34  ;;  %v9131_v55 = vcombine.low %v1209_v26, %v1217_v4  ;;  %v1113_v49 = vld [vmem:[%s9795_s27 + $0x1830] sm:$0xff]  ;;  %v1122_v3 = vld [vmem:[%s9795_s27 + $0x1878] sm:$0xff] }
 0x7d8   : > { %v1121_v25 = vld [vmem:[%s9795_s27 + $0x1870] sm:$0xff] }
 0x7d9   : > { %v1353_v26 = vld [vmem:[%s9795_s27 + $0x1fb0] sm:$0xff] }
 0x7da   : > { %v1361_v4 = vld [vmem:[%s9795_s27 + $0x1ff0] sm:$0xff] }
 0x7dd   : > { %7652 = vmatpush2.bf16.xpose.msra.mxu0 %v9239_v35  ;;  %7693 = vmatpush2.bf16.xpose.msra.mxu1 %v9241_v46  ;;  %v1193_v35 = vld [vmem:[%s9795_s27 + $0x1ab0] sm:$0xff] }
 0x7de   : > { %7653 = vmatprep.subr.bf16.mxu0 %v9224_v50  ;;  %7694 = vmatprep.subr.bf16.mxu1 %v9226_v53  ;;  %v1201_v46 = vld [vmem:[%s9795_s27 + $0x1af0] sm:$0xff]  ;;  %v1194_v50 = vld [vmem:[%s9795_s27 + $0x1ab8] sm:$0xff] }
 0x7df   : > { %v1202_v53 = vld [vmem:[%s9795_s27 + $0x1af8] sm:$0xff]  ;;  %v9116_v58 = vcombine.high %v1193_v35, %v1201_v46 }
 0x7e5   : > { %7654 = vmatpush2.bf16.xpose.msra.mxu0 %v9223_v63  ;;  %7695 = vmatpush2.bf16.xpose.msra.mxu1 %v9225_v0  ;;  %v1178_v63 = vld [vmem:[%s9795_s27 + $0x1a38] sm:$0xff]  ;;  %v9115_v0 = vcombine.low %v1193_v35, %v1201_v46  ;;  %v1337_v35 = vld [vmem:[%s9795_s27 + $0x1f30] sm:$0xff] }
 0x7e6   : > { %7655 = vmatprep.subr.bf16.mxu0 %v9208_v59  ;;  %7696 = vmatprep.subr.bf16.mxu1 %v9210_v1  ;;  %v9117_v59 = vcombine.low %v1194_v50, %v1202_v53  ;;  %v9100_v1 = vcombine.high %v1177_v60, %v1185_v61  ;;  %v1345_v46 = vld [vmem:[%s9795_s27 + $0x1f70] sm:$0xff] }
 0x7ed   : > { %7656 = vmatpush2.bf16.xpose.msra.mxu0 %v9207_v32  ;;  %7697 = vmatpush2.bf16.xpose.msra.mxu1 %v9209_v13  ;;  %v9099_v32 = vcombine.low %v1177_v60, %v1185_v61 }
 0x7ee   : > { %7657 = vmatprep.subr.bf16.mxu0 %v9192_v7  ;;  %7698 = vmatprep.subr.bf16.mxu1 %v9194_v51  ;;  %v9084_v7 = vcombine.high %v1161_v2, %v1169_v5  ;;  %v9086_v51 = vcombine.high %v1162_v54, %v1170_v6 }
 0x7f5   : > { %7658 = vmatpush2.bf16.xpose.msra.mxu0 %v9191_v8  ;;  %7699 = vmatpush2.bf16.xpose.msra.mxu1 %v9193_v9  ;;  %v9083_v8 = vcombine.low %v1161_v2, %v1169_v5  ;;  %v9085_v9 = vcombine.low %v1162_v54, %v1170_v6  ;;  %v1329_v2 = vld [vmem:[%s9795_s27 + $0x1ef0] sm:$0xff]  ;;  %v1322_v54 = vld [vmem:[%s9795_s27 + $0x1eb8] sm:$0xff] }
 0x7f6   : > { %7659 = vmatprep.subr.bf16.mxu0 %v9176_v38  ;;  %7700 = vmatprep.subr.bf16.mxu1 %v9178_v30  ;;  %v9068_v38 = vcombine.high %v1145_v57, %v1153_v62  ;;  %v9070_v30 = vcombine.high %v1146_v37, %v1154_v44  ;;  %v1330_v6 = vld [vmem:[%s9795_s27 + $0x1ef8] sm:$0xff] }
 0x7fd   : > { %7660 = vmatpush2.bf16.xpose.msra.mxu0 %v9175_v18  ;;  %7701 = vmatpush2.bf16.xpose.msra.mxu1 %v9177_v48  ;;  %v9067_v18 = vcombine.low %v1145_v57, %v1153_v62  ;;  %v9069_v48 = vcombine.low %v1146_v37, %v1154_v44  ;;  %v1305_v37 = vld [vmem:[%s9795_s27 + $0x1e30] sm:$0xff] }
 0x7fe   : > { %7661 = vmatprep.subr.bf16.mxu0 %v9160_v23  ;;  %7702 = vmatprep.subr.bf16.mxu1 %v9162_v24  ;;  %v9052_v23 = vcombine.high %v1129_v10, %v1137_v42  ;;  %v9054_v24 = vcombine.high %v1130_v11, %v1138_v15  ;;  %v1313_v44 = vld [vmem:[%s9795_s27 + $0x1e70] sm:$0xff] }
 0x805   : > { %7662 = vmatpush2.bf16.xpose.msra.mxu0 %v9159_v16  ;;  %7703 = vmatpush2.bf16.xpose.msra.mxu1 %v9161_v52  ;;  %v9051_v16 = vcombine.low %v1129_v10, %v1137_v42  ;;  %v9053_v52 = vcombine.low %v1130_v11, %v1138_v15  ;;  %v9228_v10 = vcombine.high %v1305_v37, %v1313_v44  ;;  %v1289_v11 = vld [vmem:[%s9795_s27 + $0x1db0] sm:$0xff] }
 0x806   : > { %7713 = vmatprep.subr.bf16.mxu0 %v9148_v33  ;;  %7754 = vmatprep.subr.bf16.mxu1 %v9150_v36  ;;  %v9036_v33 = vcombine.high %v1113_v49, %v1121_v25  ;;  %v9038_v36 = vcombine.high %v1114_v43, %v1122_v3  ;;  %v1297_v15 = vld [vmem:[%s9795_s27 + $0x1df0] sm:$0xff] }
 0x80c   : > { %7664 = vmatmul.mubr.bf16.vlgmr.msra.gmra.mxu0 %v10043_v14  ;;  %7705 = vmatmul.mubr.bf16.vlgmr.msra.gmra.mxu1 %v10047_v19  ;;  %v9133_v14 = vcombine.low %v1210_v39, %v1218_v34  ;;  %v9118_v19 = vcombine.high %v1194_v50, %v1202_v53  ;;  %v1354_v39 = vld [vmem:[%s9795_s27 + $0x1fb8] sm:$0xff] }
 0x80d   : > { %7714 = vmatpush1.bf16.xpose.msra.mxu0 %v9147_v27  ;;  %7755 = vmatpush1.bf16.xpose.msra.mxu1 %v9149_v41  ;;  %v1362_v34 = vld [vmem:[%s9795_s27 + $0x1ff8] sm:$0xff]  ;;  %v9035_v27 = vcombine.low %v1113_v49, %v1121_v25  ;;  %v9037_v41 = vcombine.low %v1114_v43, %v1122_v3  ;;  %v9212_v49 = vcombine.high %v1289_v11, %v1297_v15  ;;  %v1273_v43 = vld [vmem:[%s9795_s27 + $0x1d30] sm:$0xff] }
 0x80e   : > { %7715 = vmatprep.subr.bf16.mxu0 %v9132_v45  ;;  %7756 = vmatprep.subr.bf16.mxu1 %v9134_v21  ;;  %v9276_v45 = vcombine.high %v1353_v26, %v1361_v4  ;;  %v9278_v21 = vcombine.high %v1354_v39, %v1362_v34  ;;  %v1338_v50 = vld [vmem:[%s9795_s27 + $0x1f38] sm:$0xff]  ;;  %v1281_v3 = vld [vmem:[%s9795_s27 + $0x1d70] sm:$0xff] }
 0x80f   : > { %7745 = vmatprep.mubr.bf16.mxu0 %v10049_v28  ;;  %7786 = vmatprep.mubr.bf16.mxu1 %v10052_v29  ;;  %v1186_v28 = vld [vmem:[%s9795_s27 + $0x1a78] sm:$0xff] }
 0x810   : > { %v9102_v29 = vcombine.high %v1178_v63, %v1186_v28  ;;  %v9101_v13 = vcombine.low %v1178_v63, %v1186_v28  ;;  %v1346_v53 = vld [vmem:[%s9795_s27 + $0x1f78] sm:$0xff] }
 0x815   : > { %7716 = vmatpush1.bf16.xpose.msra.mxu0 %v9131_v55  ;;  %7757 = vmatpush1.bf16.xpose.msra.mxu1 %v9133_v14  ;;  %v9275_v55 = vcombine.low %v1353_v26, %v1361_v4  ;;  %v9277_v14 = vcombine.low %v1354_v39, %v1362_v34  ;;  %v9196_v26 = vcombine.high %v1273_v43, %v1281_v3  ;;  %v1257_v39 = vld [vmem:[%s9795_s27 + $0x1cb0] sm:$0xff] }
 0x816   : > { %7717 = vmatprep.subr.bf16.mxu0 %v9116_v58  ;;  %7758 = vmatprep.subr.bf16.mxu1 %v9118_v19  ;;  %v9260_v58 = vcombine.high %v1337_v35, %v1345_v46  ;;  %v9262_v19 = vcombine.high %v1338_v50, %v1346_v53  ;;  %v1265_v34 = vld [vmem:[%s9795_s27 + $0x1cf0] sm:$0xff] }
 0x81d   : > { %7718 = vmatpush1.bf16.xpose.msra.mxu0 %v9115_v0  ;;  %7759 = vmatpush1.bf16.xpose.msra.mxu1 %v9117_v59 }
 0x81e   : > { %7719 = vmatprep.subr.bf16.mxu0 %v9100_v1  ;;  %7760 = vmatprep.subr.bf16.mxu1 %v9102_v29  ;;  %v1321_v29 = vld [vmem:[%s9795_s27 + $0x1eb0] sm:$0xff] }
 0x81f   : > { %v9244_v57 = vcombine.high %v1321_v29, %v1329_v2 }
 0x825   : > { %7720 = vmatpush1.bf16.xpose.msra.mxu0 %v9099_v32  ;;  %7761 = vmatpush1.bf16.xpose.msra.mxu1 %v9101_v13  ;;  %v9259_v13 = vcombine.low %v1337_v35, %v1345_v46  ;;  %v9180_v35 = vcombine.high %v1257_v39, %v1265_v34 }
 0x826   : > { %7721 = vmatprep.subr.bf16.mxu0 %v9084_v7  ;;  %7762 = vmatprep.subr.bf16.mxu1 %v9086_v51  ;;  %v9261_v51 = vcombine.low %v1338_v50, %v1346_v53  ;;  %v1241_v50 = vld [vmem:[%s9795_s27 + $0x1c30] sm:$0xff] }
 0x827   : > { %v1249_v53 = vld [vmem:[%s9795_s27 + $0x1c70] sm:$0xff] }
 0x82d   : > { %7722 = vmatpush1.bf16.xpose.msra.mxu0 %v9083_v8  ;;  %7763 = vmatpush1.bf16.xpose.msra.mxu1 %v9085_v9  ;;  %v1306_v8 = vld [vmem:[%s9795_s27 + $0x1e38] sm:$0xff] }
 0x82e   : > { %7723 = vmatprep.subr.bf16.mxu0 %v9068_v38  ;;  %7764 = vmatprep.subr.bf16.mxu1 %v9070_v30  ;;  %v1314_v9 = vld [vmem:[%s9795_s27 + $0x1e78] sm:$0xff]  ;;  %v9243_v38 = vcombine.low %v1321_v29, %v1329_v2  ;;  %v9245_v30 = vcombine.low %v1322_v54, %v1330_v6 }
 0x82f   : > { %v9230_v42 = vcombine.high %v1306_v8, %v1314_v9 }
 0x835   : > { %7724 = vmatpush1.bf16.xpose.msra.mxu0 %v9067_v18  ;;  %7765 = vmatpush1.bf16.xpose.msra.mxu1 %v9069_v48  ;;  %v1290_v18 = vld [vmem:[%s9795_s27 + $0x1db8] sm:$0xff] }
 0x836   : > { %7725 = vmatprep.subr.bf16.mxu0 %v9052_v23  ;;  %7766 = vmatprep.subr.bf16.mxu1 %v9054_v24  ;;  %v1298_v48 = vld [vmem:[%s9795_s27 + $0x1df8] sm:$0xff]  ;;  %v9227_v23 = vcombine.low %v1305_v37, %v1313_v44  ;;  %v9229_v24 = vcombine.low %v1306_v8, %v1314_v9 }
 0x837   : > { %v9214_v25 = vcombine.high %v1290_v18, %v1298_v48 }
 0x83d   : > { %7726 = vmatpush1.bf16.xpose.msra.mxu0 %v9051_v16  ;;  %7767 = vmatpush1.bf16.xpose.msra.mxu1 %v9053_v52  ;;  %v1274_v16 = vld [vmem:[%s9795_s27 + $0x1d38] sm:$0xff] }
 0x83e   : > { %7727 = vmatprep.subr.bf16.mxu0 %v9036_v33  ;;  %7768 = vmatprep.subr.bf16.mxu1 %v9038_v36  ;;  %v1282_v52 = vld [vmem:[%s9795_s27 + $0x1d78] sm:$0xff]  ;;  %v9211_v33 = vcombine.low %v1289_v11, %v1297_v15  ;;  %v9213_v36 = vcombine.low %v1290_v18, %v1298_v48 }
 0x83f   : > { %v9198_v4 = vcombine.high %v1274_v16, %v1282_v52 }
 0x845   : > { %7728 = vmatpush1.bf16.xpose.msra.mxu0 %v9035_v27  ;;  %7769 = vmatpush1.bf16.xpose.msra.mxu1 %v9037_v41  ;;  %v1258_v27 = vld [vmem:[%s9795_s27 + $0x1cb8] sm:$0xff] }
 0x846   : > { %7729 = vmatprep.subr.bf16.mxu0 %v9276_v45  ;;  %7770 = vmatprep.subr.bf16.mxu1 %v9278_v21  ;;  %v1266_v41 = vld [vmem:[%s9795_s27 + $0x1cf8] sm:$0xff]  ;;  %v9195_v45 = vcombine.low %v1273_v43, %v1281_v3  ;;  %v9197_v21 = vcombine.low %v1274_v16, %v1282_v52 }
 0x847   : > { %v9182_v46 = vcombine.high %v1258_v27, %v1266_v41 }
 0x84c   : > { %v7583_v60 = vpop.f32.mrf.mxu0  ;;  %v7624_v63 = vpop.f32.mrf.mxu1 }
 0x84d   : > { %v7584_v61 = vadd.f32 %v7583_v60, %v10962_v22  ;;  %7730 = vmatpush2.bf16.xpose.msra.mxu0 %v9275_v55  ;;  %7771 = vmatpush2.bf16.xpose.msra.mxu1 %v9277_v14  ;;  %v1242_v55 = vld [vmem:[%s9795_s27 + $0x1c38] sm:$0xff]  ;;  %v9164_v60 = vcombine.high %v1241_v50, %v1249_v53 }
 0x84e   : > { %v7585_v28 = vpop.f32.mrf.mxu0  ;;  %7731 = vmatprep.subr.bf16.mxu0 %v9260_v58  ;;  %v7626_v1 = vpop.f32.mrf.mxu1  ;;  %7772 = vmatprep.subr.bf16.mxu1 %v9262_v19  ;;  %v1250_v14 = vld [vmem:[%s9795_s27 + $0x1c78] sm:$0xff]  ;;  %v9179_v58 = vcombine.low %v1257_v39, %v1265_v34  ;;  %v9181_v19 = vcombine.low %v1258_v27, %v1266_v41 }
 0x84f   : > { %v11035_v0 = vadd.f32 %v7624_v63, %v7584_v61  ;;  %v7586_v59 = vadd.f32 %v7585_v28, %v10966_v31  ;;  %v9246_v31 = vcombine.high %v1322_v54, %v1330_v6  ;;  %v9166_v61 = vcombine.high %v1242_v55, %v1250_v14 }
 0x850   : > { %v7587_v5 = vpop.f32.mrf.mxu0  ;;  %v7628_v32 = vpop.f32.mrf.mxu1  ;;  %v9163_v63 = vcombine.low %v1241_v50, %v1249_v53  ;;  %v9165_v28 = vcombine.low %v1242_v55, %v1250_v14 }
 0x851   : > { %v11042_v22 = vadd.f32 %v7626_v1, %v7586_v59 }
 0x852   : > { %v7588_v7 = vpop.f32.mrf.mxu0  ;;  %v7629_v62 = vpop.f32.mrf.mxu1 }
 0x855   : > { %7732 = vmatpush2.bf16.xpose.msra.mxu0 %v9259_v13  ;;  %7773 = vmatpush2.bf16.xpose.msra.mxu1 %v9261_v51 }
 0x856   : > { %7733 = vmatprep.subr.bf16.mxu0 %v9244_v57  ;;  %7774 = vmatprep.subr.bf16.mxu1 %v9246_v31 }
 0x85d   : > { %7734 = vmatpush2.bf16.xpose.msra.mxu0 %v9243_v38  ;;  %7775 = vmatpush2.bf16.xpose.msra.mxu1 %v9245_v30 }
 0x85e   : > { %7735 = vmatprep.subr.bf16.mxu0 %v9228_v10  ;;  %7776 = vmatprep.subr.bf16.mxu1 %v9230_v42 }
 0x865   : > { %7736 = vmatpush2.bf16.xpose.msra.mxu0 %v9227_v23  ;;  %7777 = vmatpush2.bf16.xpose.msra.mxu1 %v9229_v24 }
 0x866   : > { %7737 = vmatprep.subr.bf16.mxu0 %v9212_v49  ;;  %7778 = vmatprep.subr.bf16.mxu1 %v9214_v25 }
 0x86d   : > { %7738 = vmatpush2.bf16.xpose.msra.mxu0 %v9211_v33  ;;  %7779 = vmatpush2.bf16.xpose.msra.mxu1 %v9213_v36 }
 0x86e   : > { %7739 = vmatprep.subr.bf16.mxu0 %v9196_v26  ;;  %7780 = vmatprep.subr.bf16.mxu1 %v9198_v4 }
 0x875   : > { %7740 = vmatpush2.bf16.xpose.msra.mxu0 %v9195_v45  ;;  %7781 = vmatpush2.bf16.xpose.msra.mxu1 %v9197_v21 }
 0x876   : > { %7741 = vmatprep.subr.bf16.mxu0 %v9180_v35  ;;  %7782 = vmatprep.subr.bf16.mxu1 %v9182_v46 }
 0x87d   : > { %7742 = vmatpush2.bf16.xpose.msra.mxu0 %v9179_v58  ;;  %7783 = vmatpush2.bf16.xpose.msra.mxu1 %v9181_v19 }
 0x87e   : > { %7743 = vmatprep.subr.bf16.mxu0 %v9164_v60  ;;  %7784 = vmatprep.subr.bf16.mxu1 %v9166_v61 }
 0x885   : > { %7744 = vmatpush2.bf16.xpose.msra.mxu0 %v9163_v63  ;;  %7785 = vmatpush2.bf16.xpose.msra.mxu1 %v9165_v28  ;;  %v7967_v63 = vsub.s32 6, %v10271_v40  ;;  %v7971_v28 = vsub.s32 7, %v10271_v40 }
 0x887   : > { %v8062_v40 = vrot.slane %v10913_v56, %v7971_v28 }
 0x88c   : > { %7746 = vmatmul.mubr.bf16.vlgmr.msra.gmra.mxu0 %v10125_v12  ;;  %7787 = vmatmul.mubr.bf16.vlgmr.msra.gmra.mxu1 %v10129_v17 }
 0x8cc   : > { %v7665_v59 = vpop.f32.mrf.mxu0  ;;  %v7706_v29 = vpop.f32.mrf.mxu1 }
 0x8cd   : > { %v7666_v1 = vadd.f32 %v7665_v59, %v11035_v0  ;;  %v7968_v59 = vrot.slane %v10903_v20, %v7967_v63 }
 0x8ce   : > { %v7667_v2 = vpop.f32.mrf.mxu0  ;;  %v7708_v6 = vpop.f32.mrf.mxu1 }
 0x8cf   : > { %v7707_v5 = vadd.f32 %v7706_v29, %v7666_v1  ;;  %v7668_v54 = vadd.f32 %v7667_v2, %v11042_v22  ;;  %v7972_v1 = vrot.slane %v10903_v20, %v7971_v28 }
 0x8d0   : > { %v7669_v32 = vpop.f32.mrf.mxu0  ;;  %v7710_v7 = vpop.f32.mrf.mxu1 }
 0x8d1   : > { %v7709_v13 = vadd.f32 %v7708_v6, %v7668_v54  ;;  %v8058_v6 = vrot.slane %v10913_v56, %v7967_v63 }
 0x8d2   : > { %v7670_v51 = vpop.f32.mrf.mxu0  ;;  %v7711_v57 = vpop.f32.mrf.mxu1 }
 0x94c   : > { %v7747_v62 = vpop.f32.mrf.mxu0  ;;  %v7788_v37 = vpop.f32.mrf.mxu1 }
 0x94d   : > { %v7748_v31 = vadd.f32 %v7747_v62, %v7707_v5 }
 0x94e   : > { %v7749_v12 = vpop.f32.mrf.mxu0  ;;  %v7790_v8 = vpop.f32.mrf.mxu1 }
 0x94f   : > { %v7789_v44 = vadd.f32 %v7788_v37, %v7748_v31  ;;  %v7750_v17 = vadd.f32 %v7749_v12, %v7709_v13 }
 0x950   : > { %v7751_v9 = vpop.f32.mrf.mxu0  ;;  %v7792_v30 = vpop.f32.mrf.mxu1 }
 0x951   : > { %v7831_v0 = vrot.slane %v7789_v44, 4  ;;  %v7791_v38 = vadd.f32 %v7790_v8, %v7750_v17 }
 0x952   : > { %v7752_v10 = vpop.f32.mrf.mxu0  ;;  %v7793_v11 = vpop.f32.mrf.mxu1 }
 0x953   : > { %v7832_v42 = vadd.f32 %v7831_v0, %v7789_v44  ;;  %v7837_v22 = vrot.slane %v7791_v38, 4 }
 0x955   : > { %v7833_v15 = vrot.slane %v7832_v42, 2  ;;  %v7838_v18 = vadd.f32 %v7837_v22, %v7791_v38 }
 0x957   : > { %v7834_v48 = vadd.f32 %v7833_v15, %v7832_v42  ;;  %v7839_v23 = vrot.slane %v7838_v18, 2 }
 0x959   : > { %v7835_v24 = vrot.slane %v7834_v48, 1  ;;  %v7840_v49 = vadd.f32 %v7839_v23, %v7838_v18 }
 0x95b   : > { %v7836_v25 = vadd.f32 %v7835_v24, %v7834_v48  ;;  %v7841_v43 = vrot.slane %v7840_v49, 1 }
 0x95d   : > { %v7849_v3 = vmul.f32 0.125, %v7836_v25  ;;  %v7842_v16 = vadd.f32 %v7841_v43, %v7840_v49 }
 0x95f   : > { %v7857_v52 = vsub.f32 %v7789_v44, %v7849_v3  ;;  %v7850_v33 = vmul.f32 0.125, %v7842_v16 }
 0x961   : > { %v7865_v36 = vmul.f32 %v7857_v52, %v7857_v52  ;;  %v7858_v26 = vsub.f32 %v7791_v38, %v7850_v33 }
 0x963   : > { %v7903_v4 = vrot.slane %v7865_v36, 4  ;;  %v7866_v39 = vmul.f32 %v7858_v26, %v7858_v26 }
 0x965   : > { %v7904_v34 = vadd.f32 %v7903_v4, %v7865_v36  ;;  %v7909_v27 = vrot.slane %v7866_v39, 4 }
 0x967   : > { %v7905_v41 = vrot.slane %v7904_v34, 2  ;;  %v7910_v45 = vadd.f32 %v7909_v27, %v7866_v39 }
 0x969   : > { %v7906_v21 = vadd.f32 %v7905_v41, %v7904_v34  ;;  %v7911_v35 = vrot.slane %v7910_v45, 2 }
 0x96b   : > { %v7907_v46 = vrot.slane %v7906_v21, 1  ;;  %v7912_v50 = vadd.f32 %v7911_v35, %v7910_v45 }
 0x96d   : > { %v7908_v53 = vadd.f32 %v7907_v46, %v7906_v21  ;;  %v7913_v55 = vrot.slane %v7912_v50, 1 }
 0x96f   : > { %v7921_v14 = vmul.f32 0.125, %v7908_v53  ;;  %v7914_v58 = vadd.f32 %v7913_v55, %v7912_v50 }
 0x971   : > { %v7929_v19 = vadd.f32 1e-05, %v7921_v14  ;;  %v7922_v60 = vmul.f32 0.125, %v7914_v58 }
 0x973   : > { %9370 = vrsqrt.f32 %v7929_v19  ;;  %v7930_v61 = vadd.f32 1e-05, %v7922_v60 }
 0x975   : > { %9372 = vrsqrt.f32 %v7930_v61 }
 0x980   : > { %v9371_v29 = vpop.eup %9370 }
 0x981   : > { %v7987_v2 = vmul.f32 %v9371_v29, %v7968_v59 }
 0x982   : > { %v9373_v5 = vpop.eup %9372 }
 0x983   : > { %v8016_v54 = vrot.slane %v7987_v2, %v10278_v47  ;;  %v7988_v32 = vmul.f32 %v9373_v5, %v7972_v1 }
 0x985   : > { %v8027_v13 = vmul.f32 %v8016_v54, %v7857_v52  ;;  %v8020_v7 = vrot.slane %v7988_v32, %v10278_v47 }
 0x987   : > { %v8077_v51 = vadd.f32 %v8058_v6, %v8027_v13  ;;  %v8028_v57 = vmul.f32 %v8020_v7, %v7858_v26 }
 0x989   : > { %v8085_v20 = vmax.f32 %v8077_v51, 0.0  ;;  %v8078_v62 = vadd.f32 %v8062_v40, %v8028_v57 }
 0x98b   : > { %8093 = vst [vmem:[%s10298_s20 + $0x30] sm:$0xff] %v8085_v20  ;;  %v8086_v31 = vmax.f32 %v8078_v62, 0.0 }
 0x98d   : > { %8094 = vst [vmem:[%s10298_s20 + $0x38] sm:$0xff] %v8086_v31 }
 0x98e   : > { %9501 = shalt.err (!%p9498_p7)
}
 0x98f   : > { %s9502_s9 = scalar_lea.hbm %s8108_s17, 1024  ;;  %s9506_s6 = scalar_lea.hbm %s11118_s4, 2048 }
 0x990   : > { %p9503_p0 = scmp.ne.s32.totalorder %s8108_s17, %s9502_s9  ;;  %p9507_p3 = scmp.lt.s32.totalorder %s8108_s17, %s11118_s4 }
 0x991   : > { %p9508_p8 = scmp.lt.s32.totalorder %s9506_s6, %s9502_s9 }
 0x992   : > { %p9504_p10 = pnand %p9503_p0, %p11147_p4 }
 0x993   : > { %p9509_p6 = por %p9508_p8, %p9507_p3 }
 0x994   : > { %p9505_p11 = pneg %p9504_p10 }
 0x996   : > { %p9510_p2 = pnand %p9509_p6, %p9505_p11 }
 0x998   : > { %9513 = shalt.err (!%p9510_p2)
}
 0x999   : > { %9299 = dma.vmem_to_hbm [thread:$0]  (%p11147_p4), %s8111_s21, 1024, %s8108_s17, %s8096_s22  }
 0x99a PF: > { %s8122_s23 = sand.u32 1, %s9548_s15   ;;  %p11148_p13 = scmp.ne.s32.totalorder %s11137_s5, 0 }
 0x99b   : > { %p11149_p1 = scmp.ge.s32.totalorder %s9560_s18, 2  ;;  %s8123_s30 = scalar_lea.sflag [#allocation4], %s8122_s23 }
 0x99d   : > { %p9316_p5 = pnand %p11149_p1, %p11148_p13 }
 0x99f   : > { %p9317_p9 = pneg %p9316_p5 }
 0x9a1   : > { %9543 = dma.done.wait (%p9317_p9), %s8123_s30, 1024  }
 0x9a2   : > { %9545 = vsyncadd (%p9317_p9), %s8123_s30, 4294966272  ;;  %s11150_s12 = sld [smem:[#allocation15_spill]]  ;;  %p21_p12 = scmp.ge.s32.totalorder %s9615_s19, 4  }
 0x9a3   : > { %s11151_s17 = sld [smem:[#allocation16_spill]]  ;;  %s11152_s15 = smov %s9552_s16 }
 0x9a4   : > { %s11154_s18 = smov %s9615_s19  ;;  %23 = sbr.rel (!%p21_p12) target bundleno = 10 (0xa), region = 110 }
 0x9a8   : > { %s11153_s16 = smov %s11150_s12 }
 0x9a9   :  { %8128 = vsyncpa [#allocation3], 1 }
 0x9aa   :  { %8130 = vsyncpa [#allocation3 + $0x1], 1 }
 0x9ab   :  { %8131 = vsyncpa [#allocation6], 1 }
 0x9ac   :  { %8133 = vsyncpa [#allocation6 + $0x1], 1 }
 0x9ad   :  { %8134 = vsyncpa [#allocation9], 1 }
 0x9ae   :  { %8136 = vsyncpa [#allocation9 + $0x1], 1 }
 0x9af   :  { %8137 = vsyncpa [#allocation4], 1 }
 0x9b0   :  { %8139 = vsyncpa [#allocation4 + $0x1], 1 }

</bundles_post_ra>
